<compile_context>
chip_gen: v7x
topology: tpu7x:2x2x1
jax: 0.10.0
libtpu: 0.0.40
codegen_flags: <defaults>
</compile_context>

<pallas_src>
import functools

import jax
import jax.numpy as jnp
from jax.experimental import pallas as pl
from jax.experimental.pallas import tpu as pltpu


def _round_up(x, m):
    return (x + m - 1) // m * m


def _plan_time(T, target=16):
    """Return (Tp, tc): padded sequence length and time-chunk size.
    Tp % tc == 0 and (tc % 8 == 0 or tc == Tp), so the logits block
    (bt, tc, Vp) is always (8,128)-legal and tc never degrades to 1."""
    if T <= target:
        return T, T
    return _round_up(T, target), target


# --------------------- fused LSTM recurrence + FC head ----------------------
def _lstm_fused_kernel(zx_ref, wcat_ref, bfc_ref, h0_ref, c0_ref,
                       logits_ref, hn_ref, cn_ref, h_sc, c_sc,
                       *, hp, vp, tc, t_last, s_last):
    s = pl.program_id(1)          # time-chunk index (serial "arbitrary" axis)
    bt = h_sc.shape[0]

    # h0/c0 are constant-over-time inputs, read only on the first time chunk
    # of each batch shard.
    @pl.when(s == 0)
    def _():
        h_sc[...] = h0_ref[...]
        c_sc[...] = c0_ref[...]

    # Hoisted: JAX does not CSE broadcast_in_dim, so broadcast b_fc once.
    bfc_b = jnp.broadcast_to(bfc_ref[...], (bt, vp))

    def gate_sigmoid(x):
        # sigmoid(x) == 0.5*tanh(0.5*x) + 0.5 : one EUP push instead of two.
        return 0.5 * jnp.tanh(0.5 * x) + 0.5

    for t in range(tc):           # static unroll; tc is small (<= 16)
        h_prev = h_sc[...]
        c_prev = c_sc[...]
        # One fused MXU matmul per timestep: the first 4Hp columns are the
        # recurrent gate pre-activations for step t, the last Vp columns are
        # the FC logits of step t-1 (they ride the same LHS for ~free).
        zfull = jnp.dot(h_prev.astype(wcat_ref.dtype), wcat_ref[...],
                        preferred_element_type=jnp.float32)
        z = zx_ref[t] + zfull[:, :4 * hp]
        i_g = gate_sigmoid(z[:, 0 * hp:1 * hp])
        f_g = gate_sigmoid(z[:, 1 * hp:2 * hp])
        g_g = jnp.tanh(z[:, 2 * hp:3 * hp])
        o_g = gate_sigmoid(z[:, 3 * hp:4 * hp])
        c_new = f_g * c_prev + i_g * g_g
        h_new = o_g * jnp.tanh(c_new)
        c_sc[...] = c_new
        h_sc[...] = h_new
        if t >= 1:
            # Logits for in-chunk step t-1 (batch-major store, no post-kernel
            # transpose). The t==0 FC columns are discarded: that position
            # was already written by the previous chunk's epilogue.
            logits_ref[:, t - 1, :] = zfull[:, 4 * hp:] + bfc_b
        if t == t_last:
            # h_n / c_n captured at the true (unpadded) final timestep.
            @pl.when(s == s_last)
            def _():
                hn_ref[...] = h_new
                cn_ref[...] = c_new

    # Per-chunk epilogue: logits for the chunk's last timestep need the state
    # at the end of the chunk, so they cannot ride the shifted fused matmul.
    logits_ref[:, tc - 1, :] = (
        jnp.dot(h_sc[...].astype(wcat_ref.dtype), wcat_ref[:, 4 * hp:],
                preferred_element_type=jnp.float32) + bfc_b)


def lstm_fused_pallas(zx_tb4h, w_cat, b_fc, h0, c0, *, T_real, time_chunk):
    """zx_tb4h: (Tp, Bp, 4Hp) precomposed input projection (table gather).
    w_cat: (Hp, 4Hp+Vp) = [W_hh^T | W_fc^T]; b_fc: (1, Vp); h0/c0: (Bp, Hp).
    Returns logits (Bp, Tp, Vp) batch-major, h_n (Bp, Hp), c_n (Bp, Hp)."""
    Tp, Bp, four_hp = zx_tb4h.shape
    Hp = four_hp // 4
    Vp = w_cat.shape[1] - four_hp
    tc = time_chunk
    assert Tp % tc == 0

    # Batch sharding only when it can feed v7x's second TensorCore; on
    # single-TC chips a single shard avoids extra serial recurrence passes.
    bt = Bp if Bp < 16 else (Bp // 2 if (Bp // 2) % 8 == 0 else Bp)
    n_b, n_t = Bp // bt, Tp // tc
    t_last = (T_real - 1) % tc
    s_last = (T_real - 1) // tc

    kern = functools.partial(_lstm_fused_kernel, hp=Hp, vp=Vp, tc=tc,
                             t_last=t_last, s_last=s_last)

    # Explicit VMEM budget (matters on v7x's 64 MiB): double-buffered blocks
    # plus resident weights plus scratch, with 2x margin, capped at 64 MiB.
    w_bytes = Hp * (4 * Hp + Vp) * w_cat.dtype.itemsize
    est = (2 * tc * bt * 4 * Hp * 4          # zx blocks
           + 2 * w_bytes                      # W_cat (constant index, 2 bufs)
           + 2 * Vp * 4                       # b_fc
           + 4 * bt * Hp * 4                  # h0, c0
           + 2 * bt * tc * Vp * 4             # logits block
           + 4 * bt * Hp * 4                  # h_n, c_n
           + 2 * bt * Hp * 4)                 # scratch state
    vmem_limit = int(min(max(2 * est, 8 * 1024 * 1024), 64 * 1024 * 1024))

    return pl.pallas_call(
        kern,
        out_shape=(
            jax.ShapeDtypeStruct((Bp, Tp, Vp), jnp.float32),  # logits (batch-major)
            jax.ShapeDtypeStruct((Bp, Hp), jnp.float32),      # h_n
            jax.ShapeDtypeStruct((Bp, Hp), jnp.float32),      # c_n
        ),
        grid_spec=pltpu.PrefetchScalarGridSpec(
            num_scalar_prefetch=0,
            grid=(n_b, n_t),
            in_specs=[
                pl.BlockSpec((tc, bt, 4 * Hp), lambda b, s: (s, b, 0)),   # Z_x chunk
                pl.BlockSpec((Hp, 4 * Hp + Vp), lambda b, s: (0, 0)),     # W_cat
                pl.BlockSpec((1, Vp), lambda b, s: (0, 0)),               # b_fc
                pl.BlockSpec((bt, Hp), lambda b, s: (b, 0)),              # h0
                pl.BlockSpec((bt, Hp), lambda b, s: (b, 0)),              # c0
            ],
            out_specs=[
                pl.BlockSpec((bt, tc, Vp), lambda b, s: (b, s, 0)),
                pl.BlockSpec((bt, Hp), lambda b, s: (b, 0)),
                pl.BlockSpec((bt, Hp), lambda b, s: (b, 0)),
            ],
            scratch_shapes=[
                pltpu.VMEM((bt, Hp), jnp.float32),   # h state (always f32)
                pltpu.VMEM((bt, Hp), jnp.float32),   # c state (always f32)
            ],
        ),
        compiler_params=pltpu.CompilerParams(
            dimension_semantics=("parallel", "arbitrary"),
            vmem_limit_bytes=vmem_limit),
    )(zx_tb4h, w_cat, b_fc, h0, c0)


# ----------------------------- CharLSTM forward ------------------------------
class CharLSTMPallas:
    def __init__(self, vocab_size, hidden_size, n_layers=1, key=None,
                 matmul_dtype=jnp.float32):
        assert n_layers == 1, "kernel implements single-layer LSTM"
        self.vocab_size = vocab_size
        self.hidden_size = hidden_size
        self.n_layers = n_layers
        self.Hp = _round_up(hidden_size, 128)
        self.Vp = _round_up(vocab_size, 128)

        if key is None:
            key = jax.random.PRNGKey(0)
        ks = jax.random.split(key, 7)
        H, V = hidden_size, vocab_size
        s = 1.0 / jnp.sqrt(jnp.float32(H))
        u = lambda k, shp: jax.random.uniform(k, shp, jnp.float32, -s, s)
        # Raw parameters in PyTorch layouts.
        self.embed_w = jax.random.normal(ks[0], (V, H), jnp.float32)   # Embedding
        self.w_ih = u(ks[1], (4 * H, H))                               # LSTM
        self.w_hh = u(ks[2], (4 * H, H))
        self.b_ih = u(ks[3], (4 * H,))
        self.b_hh = u(ks[4], (4 * H,))
        self.fc_w = u(ks[5], (V, H))                                   # Linear
        self.fc_b = u(ks[6], (V,))

        Hp, Vp = self.Hp, self.Vp
        # Precomposed embedding + input projection lookup table:
        #   table[v] = embed[v] @ W_ih^T + (b_ih + b_hh),
        # gate-blocked and zero-padded to lane-aligned Hp-wide blocks.
        raw = self.embed_w @ self.w_ih.T + (self.b_ih + self.b_hh)     # (V, 4H)
        self._zx_table = self._pad_gate_cols(raw)                      # (V, 4Hp) f32

        # Fused recurrent + FC weight: [W_hh^T | W_fc^T]  ->  (Hp, 4Hp + Vp).
        # NOTE: bf16 matmul_dtype is recommended on v6e/v7x; it rounds h_prev
        # each step, so validate drift (or keep W_hh in f32) for very long T.
        whh_t = self._pad_gates_t(self.w_hh)                           # (Hp, 4Hp)
        wfc_t = jnp.pad(self.fc_w.T, ((0, Hp - H), (0, Vp - V)))       # (Hp, Vp)
        self._w_cat = jnp.concatenate([whh_t, wfc_t], axis=1).astype(matmul_dtype)
        self._bfc_p = jnp.pad(self.fc_b, (0, Vp - V)).reshape(1, Vp)   # f32

    def _pad_gate_cols(self, m):
        """(V, 4H) -> (V, 4Hp), each gate in its own zero-padded Hp block."""
        H, Hp = self.hidden_size, self.Hp
        blocks = [jnp.pad(m[:, k * H:(k + 1) * H], ((0, 0), (0, Hp - H)))
                  for k in range(4)]
        return jnp.concatenate(blocks, axis=1)

    def _pad_gates_t(self, w):
        """(4H, H) PyTorch gate weight -> transposed (Hp, 4Hp), each gate in
        its own lane-aligned zero-padded Hp-wide block."""
        H, Hp = self.hidden_size, self.Hp
        blocks = []
        for k in range(4):                     # PyTorch gate order: i, f, g, o
            blk = w[k * H:(k + 1) * H, :].T                       # (H, H)
            blocks.append(jnp.pad(blk, ((0, Hp - H), (0, Hp - H))))
        return jnp.concatenate(blocks, axis=1)                    # (Hp, 4Hp)

    def init_hidden(self, batch_size):
        H = self.hidden_size
        return (jnp.zeros((self.n_layers, batch_size, H), jnp.float32),
                jnp.zeros((self.n_layers, batch_size, H), jnp.float32))

    def __call__(self, x, hidden):
        # x: (B, T) int32 token ids
        B, T = x.shape
        H, Hp, V, Vp = self.hidden_size, self.Hp, self.vocab_size, self.Vp
        Bp = _round_up(B, 8)
        Tp, tc = _plan_time(T)
        h0, c0 = hidden

        # Z_x = table[token]: one XLA row gather, no projection kernel launch.
        # TODO(synk): fuse this gather into the kernel (scalar-prefetched ids +
        # VMEM-resident table) to remove the (Tp,Bp,4Hp) HBM stream entirely.
        zx = jnp.take(self._zx_table, x.T, axis=0)               # (T, B, 4Hp)
        zx = jnp.pad(zx, ((0, Tp - T), (0, Bp - B), (0, 0)))     # (Tp, Bp, 4Hp)

        # Padded initial state (padded lanes/rows are zero -> exact padding).
        h0p = jnp.zeros((Bp, Hp), jnp.float32).at[:B, :H].set(h0[0])
        c0p = jnp.zeros((Bp, Hp), jnp.float32).at[:B, :H].set(c0[0])

        logits_btv, h_n, c_n = lstm_fused_pallas(
            zx, self._w_cat, self._bfc_p, h0p, c0p, T_real=T, time_chunk=tc)

        # Batch-major (Bp, Tp, Vp) emitted directly by the kernel; just slice
        # and reshape (matches PyTorch out.reshape(B*T, -1) row ordering).
        logits = logits_btv[:B, :T, :V].reshape(B * T, V)
        h_out = h_n[:B, :H][None]
        c_out = c_n[:B, :H][None]
        return logits, (h_out, c_out)


# ------------------------------- reference -----------------------------------
def _reference(model, x, hidden):
    h, c = hidden[0][0], hidden[1][0]
    x_emb = jnp.take(model.embed_w, x, axis=0)   # (B, T, H)
    H = model.hidden_size
    outs = []
    for t in range(x.shape[1]):
        z = (x_emb[:, t] @ model.w_ih.T + h @ model.w_hh.T
             + model.b_ih + model.b_hh)
        i = jax.nn.sigmoid(z[:, 0:H])
        f = jax.nn.sigmoid(z[:, H:2 * H])
        g = jnp.tanh(z[:, 2 * H:3 * H])
        o = jax.nn.sigmoid(z[:, 3 * H:4 * H])
        c = f * c + i * g
        h = o * jnp.tanh(c)
        outs.append(h)
    out = jnp.stack(outs, axis=1).reshape(-1, H)
    logits = out @ model.fc_w.T + model.fc_b
    return logits, (h[None], c[None])


if __name__ == "__main__":
    vocab_size, hidden_size = 50, 32
    B, T = 2, 8

    key = jax.random.PRNGKey(0)
    k_param, k_tok = jax.random.split(key)
    # matmul_dtype=jnp.bfloat16 recommended for v6e/v7x production runs;
    # f32 here to keep the correctness check tight.
    model = CharLSTMPallas(vocab_size, hidden_size, n_layers=1, key=k_param)

    x = jax.random.randint(k_tok, (B, T), 0, vocab_size, dtype=jnp.int32)
    hidden = model.init_hidden(B)

    logits, (h_n, c_n) = model(x, hidden)
    jax.block_until_ready((logits, h_n, c_n))

    ref_logits, (ref_h, ref_c) = _reference(model, x, hidden)
    assert logits.shape == (B * T, vocab_size)
    assert h_n.shape == (1, B, hidden_size) and c_n.shape == (1, B, hidden_size)
    assert jnp.allclose(logits, ref_logits, atol=1e-4, rtol=1e-4)
    assert jnp.allclose(h_n, ref_h, atol=1e-4, rtol=1e-4)
    assert jnp.allclose(c_n, ref_c, atol=1e-4, rtol=1e-4)

    print("KERNEL_OK")
</pallas_src>

<mosaic_0001>
module attributes {stable_mosaic.version = 11 : i64} {
  func.func @_lstm_fused_kernel(%arg0: i32, %arg1: i32, %arg2: memref<8x8x512xf32, #tpu.memory_space<vmem>>, %arg3: memref<128x640xf32, #tpu.memory_space<vmem>>, %arg4: memref<1x128xf32, #tpu.memory_space<vmem>>, %arg5: memref<8x128xf32, #tpu.memory_space<vmem>>, %arg6: memref<8x128xf32, #tpu.memory_space<vmem>>, %arg7: memref<8x8x128xf32, #tpu.memory_space<vmem>>, %arg8: memref<8x128xf32, #tpu.memory_space<vmem>>, %arg9: memref<8x128xf32, #tpu.memory_space<vmem>>, %arg10: memref<8x128xf32, #tpu.memory_space<vmem>>, %arg11: memref<8x128xf32, #tpu.memory_space<vmem>>) attributes {dimension_semantics = [#tpu.dimension_semantics<parallel>, #tpu.dimension_semantics<arbitrary>], iteration_bounds = array<i64: 1, 1>, scalar_prefetch = 0 : i64, scratch_operands = 2 : i64, tpu.core_type = #tpu.core_type<tc>, window_params = [{transform_indices = @transform_0, window_bounds = array<i64: 8, 8, 512>}, {pipeline_mode = #tpu.pipeline_mode<synchronous>, transform_indices = @transform_1, window_bounds = array<i64: 128, 640>}, {pipeline_mode = #tpu.pipeline_mode<synchronous>, transform_indices = @transform_2, window_bounds = array<i64: 1, 128>}, {transform_indices = @transform_3, window_bounds = array<i64: 8, 128>}, {transform_indices = @transform_4, window_bounds = array<i64: 8, 128>}, {transform_indices = @transform_5, window_bounds = array<i64: 8, 8, 128>}, {transform_indices = @transform_6, window_bounds = array<i64: 8, 128>}, {transform_indices = @transform_7, window_bounds = array<i64: 8, 128>}]} {
    %c0_i32 = arith.constant 0 : i32
    %0 = arith.cmpi eq, %arg1, %c0_i32 : i32
    %1 = arith.extui %0 : i1 to i32
    %c0_i32_0 = arith.constant 0 : i32
    %2 = arith.cmpi ne, %1, %c0_i32_0 : i32
    scf.if %2 {
      %c0_208 = arith.constant 0 : index
      %c0_209 = arith.constant 0 : index
      %379 = vector.load %arg5[%c0_208, %c0_209] : memref<8x128xf32, #tpu.memory_space<vmem>>, vector<8x128xf32>
      %c0_210 = arith.constant 0 : index
      %c0_211 = arith.constant 0 : index
      %380 = vector.load %arg10[%c0_210, %c0_211] : memref<8x128xf32, #tpu.memory_space<vmem>>, vector<8x128xf32>
      tpu.vector_store %arg10[%c0_210, %c0_211], %379 {strides = array<i32>} : memref<8x128xf32, #tpu.memory_space<vmem>>, vector<8x128xf32>,
      %c0_212 = arith.constant 0 : index
      %c0_213 = arith.constant 0 : index
      %381 = vector.load %arg6[%c0_212, %c0_213] : memref<8x128xf32, #tpu.memory_space<vmem>>, vector<8x128xf32>
      %c0_214 = arith.constant 0 : index
      %c0_215 = arith.constant 0 : index
      %382 = vector.load %arg11[%c0_214, %c0_215] : memref<8x128xf32, #tpu.memory_space<vmem>>, vector<8x128xf32>
      tpu.vector_store %arg11[%c0_214, %c0_215], %381 {strides = array<i32>} : memref<8x128xf32, #tpu.memory_space<vmem>>, vector<8x128xf32>,
    } else {
    }
    %c0 = arith.constant 0 : index
    %c0_1 = arith.constant 0 : index
    %3 = vector.load %arg4[%c0, %c0_1] : memref<1x128xf32, #tpu.memory_space<vmem>>, vector<1x128xf32>
    %4 = vector.shape_cast %3 : vector<1x128xf32> to vector<1x128xf32>
    %5 = vector.broadcast %4 : vector<1x128xf32> to vector<8x128xf32>
    %c0_2 = arith.constant 0 : index
    %c0_3 = arith.constant 0 : index
    %6 = vector.load %arg10[%c0_2, %c0_3] : memref<8x128xf32, #tpu.memory_space<vmem>>, vector<8x128xf32>
    %c0_4 = arith.constant 0 : index
    %c0_5 = arith.constant 0 : index
    %7 = vector.load %arg11[%c0_4, %c0_5] : memref<8x128xf32, #tpu.memory_space<vmem>>, vector<8x128xf32>
    %c0_6 = arith.constant 0 : index
    %c0_7 = arith.constant 0 : index
    %8 = vector.load %arg3[%c0_6, %c0_7] : memref<128x640xf32, #tpu.memory_space<vmem>>, vector<128x640xf32>
    %cst = arith.constant dense<0.000000e+00> : vector<8x640xf32>
    %9 = tpu.matmul %6, %8, %cst {dimension_numbers = #tpu.dot_dimension_numbers<[1], [0], [0], [1], [0, 0, 1, 1], [], []>} : vector<8x128xf32>, vector<128x640xf32>, vector<8x640xf32> -> vector<8x640xf32>
    %c0_8 = arith.constant 0 : index
    %c0_9 = arith.constant 0 : index
    %c0_10 = arith.constant 0 : index
    %10 = vector.load %arg2[%c0_8, %c0_9, %c0_10] : memref<8x8x512xf32, #tpu.memory_space<vmem>>, vector<1x8x512xf32>
    %11 = vector.shape_cast %10 : vector<1x8x512xf32> to vector<8x512xf32>
    %12 = vector.extract_strided_slice %9 {offsets = [0, 0], sizes = [8, 512], strides = [1, 1]} : vector<8x640xf32> to vector<8x512xf32>
    %13 = arith.addf %11, %12 : vector<8x512xf32>
    %14 = vector.extract_strided_slice %13 {offsets = [0, 0], sizes = [8, 128], strides = [1, 1]} : vector<8x512xf32> to vector<8x128xf32>
    %cst_11 = arith.constant 5.000000e-01 : f32
    %15 = vector.broadcast %cst_11 : f32 to vector<8x128xf32>
    %16 = arith.mulf %15, %14 : vector<8x128xf32>
    %17 = math.tanh %16 : vector<8x128xf32>
    %cst_12 = arith.constant 5.000000e-01 : f32
    %18 = vector.broadcast %cst_12 : f32 to vector<8x128xf32>
    %19 = arith.mulf %18, %17 : vector<8x128xf32>
    %cst_13 = arith.constant 5.000000e-01 : f32
    %20 = vector.broadcast %cst_13 : f32 to vector<8x128xf32>
    %21 = arith.addf %19, %20 : vector<8x128xf32>
    %22 = vector.extract_strided_slice %13 {offsets = [0, 128], sizes = [8, 128], strides = [1, 1]} : vector<8x512xf32> to vector<8x128xf32>
    %cst_14 = arith.constant 5.000000e-01 : f32
    %23 = vector.broadcast %cst_14 : f32 to vector<8x128xf32>
    %24 = arith.mulf %23, %22 : vector<8x128xf32>
    %25 = math.tanh %24 : vector<8x128xf32>
    %cst_15 = arith.constant 5.000000e-01 : f32
    %26 = vector.broadcast %cst_15 : f32 to vector<8x128xf32>
    %27 = arith.mulf %26, %25 : vector<8x128xf32>
    %cst_16 = arith.constant 5.000000e-01 : f32
    %28 = vector.broadcast %cst_16 : f32 to vector<8x128xf32>
    %29 = arith.addf %27, %28 : vector<8x128xf32>
    %30 = vector.extract_strided_slice %13 {offsets = [0, 256], sizes = [8, 128], strides = [1, 1]} : vector<8x512xf32> to vector<8x128xf32>
    %31 = math.tanh %30 : vector<8x128xf32>
    %32 = vector.extract_strided_slice %13 {offsets = [0, 384], sizes = [8, 128], strides = [1, 1]} : vector<8x512xf32> to vector<8x128xf32>
    %cst_17 = arith.constant 5.000000e-01 : f32
    %33 = vector.broadcast %cst_17 : f32 to vector<8x128xf32>
    %34 = arith.mulf %33, %32 : vector<8x128xf32>
    %35 = math.tanh %34 : vector<8x128xf32>
    %cst_18 = arith.constant 5.000000e-01 : f32
    %36 = vector.broadcast %cst_18 : f32 to vector<8x128xf32>
    %37 = arith.mulf %36, %35 : vector<8x128xf32>
    %cst_19 = arith.constant 5.000000e-01 : f32
    %38 = vector.broadcast %cst_19 : f32 to vector<8x128xf32>
    %39 = arith.addf %37, %38 : vector<8x128xf32>
    %40 = arith.mulf %29, %7 : vector<8x128xf32>
    %41 = arith.mulf %21, %31 : vector<8x128xf32>
    %42 = arith.addf %40, %41 : vector<8x128xf32>
    %43 = math.tanh %42 : vector<8x128xf32>
    %44 = arith.mulf %39, %43 : vector<8x128xf32>
    %c0_20 = arith.constant 0 : index
    %c0_21 = arith.constant 0 : index
    %45 = vector.load %arg11[%c0_20, %c0_21] : memref<8x128xf32, #tpu.memory_space<vmem>>, vector<8x128xf32>
    tpu.vector_store %arg11[%c0_20, %c0_21], %42 {strides = array<i32>} : memref<8x128xf32, #tpu.memory_space<vmem>>, vector<8x128xf32>,
    %c0_22 = arith.constant 0 : index
    %c0_23 = arith.constant 0 : index
    %46 = vector.load %arg10[%c0_22, %c0_23] : memref<8x128xf32, #tpu.memory_space<vmem>>, vector<8x128xf32>
    tpu.vector_store %arg10[%c0_22, %c0_23], %44 {strides = array<i32>} : memref<8x128xf32, #tpu.memory_space<vmem>>, vector<8x128xf32>,
    %c0_24 = arith.constant 0 : index
    %c0_25 = arith.constant 0 : index
    %47 = vector.load %arg10[%c0_24, %c0_25] : memref<8x128xf32, #tpu.memory_space<vmem>>, vector<8x128xf32>
    %c0_26 = arith.constant 0 : index
    %c0_27 = arith.constant 0 : index
    %48 = vector.load %arg11[%c0_26, %c0_27] : memref<8x128xf32, #tpu.memory_space<vmem>>, vector<8x128xf32>
    %c0_28 = arith.constant 0 : index
    %c0_29 = arith.constant 0 : index
    %49 = vector.load %arg3[%c0_28, %c0_29] : memref<128x640xf32, #tpu.memory_space<vmem>>, vector<128x640xf32>
    %cst_30 = arith.constant dense<0.000000e+00> : vector<8x640xf32>
    %50 = tpu.matmul %47, %49, %cst_30 {dimension_numbers = #tpu.dot_dimension_numbers<[1], [0], [0], [1], [0, 0, 1, 1], [], []>} : vector<8x128xf32>, vector<128x640xf32>, vector<8x640xf32> -> vector<8x640xf32>
    %c1 = arith.constant 1 : index
    %c0_31 = arith.constant 0 : index
    %c0_32 = arith.constant 0 : index
    %51 = vector.load %arg2[%c1, %c0_31, %c0_32] : memref<8x8x512xf32, #tpu.memory_space<vmem>>, vector<1x8x512xf32>
    %52 = vector.shape_cast %51 : vector<1x8x512xf32> to vector<8x512xf32>
    %53 = vector.extract_strided_slice %50 {offsets = [0, 0], sizes = [8, 512], strides = [1, 1]} : vector<8x640xf32> to vector<8x512xf32>
    %54 = arith.addf %52, %53 : vector<8x512xf32>
    %55 = vector.extract_strided_slice %54 {offsets = [0, 0], sizes = [8, 128], strides = [1, 1]} : vector<8x512xf32> to vector<8x128xf32>
    %cst_33 = arith.constant 5.000000e-01 : f32
    %56 = vector.broadcast %cst_33 : f32 to vector<8x128xf32>
    %57 = arith.mulf %56, %55 : vector<8x128xf32>
    %58 = math.tanh %57 : vector<8x128xf32>
    %cst_34 = arith.constant 5.000000e-01 : f32
    %59 = vector.broadcast %cst_34 : f32 to vector<8x128xf32>
    %60 = arith.mulf %59, %58 : vector<8x128xf32>
    %cst_35 = arith.constant 5.000000e-01 : f32
    %61 = vector.broadcast %cst_35 : f32 to vector<8x128xf32>
    %62 = arith.addf %60, %61 : vector<8x128xf32>
    %63 = vector.extract_strided_slice %54 {offsets = [0, 128], sizes = [8, 128], strides = [1, 1]} : vector<8x512xf32> to vector<8x128xf32>
    %cst_36 = arith.constant 5.000000e-01 : f32
    %64 = vector.broadcast %cst_36 : f32 to vector<8x128xf32>
    %65 = arith.mulf %64, %63 : vector<8x128xf32>
    %66 = math.tanh %65 : vector<8x128xf32>
    %cst_37 = arith.constant 5.000000e-01 : f32
    %67 = vector.broadcast %cst_37 : f32 to vector<8x128xf32>
    %68 = arith.mulf %67, %66 : vector<8x128xf32>
    %cst_38 = arith.constant 5.000000e-01 : f32
    %69 = vector.broadcast %cst_38 : f32 to vector<8x128xf32>
    %70 = arith.addf %68, %69 : vector<8x128xf32>
    %71 = vector.extract_strided_slice %54 {offsets = [0, 256], sizes = [8, 128], strides = [1, 1]} : vector<8x512xf32> to vector<8x128xf32>
    %72 = math.tanh %71 : vector<8x128xf32>
    %73 = vector.extract_strided_slice %54 {offsets = [0, 384], sizes = [8, 128], strides = [1, 1]} : vector<8x512xf32> to vector<8x128xf32>
    %cst_39 = arith.constant 5.000000e-01 : f32
    %74 = vector.broadcast %cst_39 : f32 to vector<8x128xf32>
    %75 = arith.mulf %74, %73 : vector<8x128xf32>
    %76 = math.tanh %75 : vector<8x128xf32>
    %cst_40 = arith.constant 5.000000e-01 : f32
    %77 = vector.broadcast %cst_40 : f32 to vector<8x128xf32>
    %78 = arith.mulf %77, %76 : vector<8x128xf32>
    %cst_41 = arith.constant 5.000000e-01 : f32
    %79 = vector.broadcast %cst_41 : f32 to vector<8x128xf32>
    %80 = arith.addf %78, %79 : vector<8x128xf32>
    %81 = arith.mulf %70, %48 : vector<8x128xf32>
    %82 = arith.mulf %62, %72 : vector<8x128xf32>
    %83 = arith.addf %81, %82 : vector<8x128xf32>
    %84 = math.tanh %83 : vector<8x128xf32>
    %85 = arith.mulf %80, %84 : vector<8x128xf32>
    %c0_42 = arith.constant 0 : index
    %c0_43 = arith.constant 0 : index
    %86 = vector.load %arg11[%c0_42, %c0_43] : memref<8x128xf32, #tpu.memory_space<vmem>>, vector<8x128xf32>
    tpu.vector_store %arg11[%c0_42, %c0_43], %83 {strides = array<i32>} : memref<8x128xf32, #tpu.memory_space<vmem>>, vector<8x128xf32>,
    %c0_44 = arith.constant 0 : index
    %c0_45 = arith.constant 0 : index
    %87 = vector.load %arg10[%c0_44, %c0_45] : memref<8x128xf32, #tpu.memory_space<vmem>>, vector<8x128xf32>
    tpu.vector_store %arg10[%c0_44, %c0_45], %85 {strides = array<i32>} : memref<8x128xf32, #tpu.memory_space<vmem>>, vector<8x128xf32>,
    %88 = vector.extract_strided_slice %50 {offsets = [0, 512], sizes = [8, 128], strides = [1, 1]} : vector<8x640xf32> to vector<8x128xf32>
    %89 = arith.addf %88, %5 : vector<8x128xf32>
    %c0_46 = arith.constant 0 : index
    %c0_47 = arith.constant 0 : index
    %c0_48 = arith.constant 0 : index
    %90 = vector.load %arg7[%c0_46, %c0_47, %c0_48] : memref<8x8x128xf32, #tpu.memory_space<vmem>>, vector<8x1x128xf32>
    %91 = vector.shape_cast %90 : vector<8x1x128xf32> to vector<8x128xf32>
    %92 = vector.shape_cast %89 : vector<8x128xf32> to vector<8x1x128xf32>
    tpu.vector_store %arg7[%c0_46, %c0_47, %c0_48], %92 {strides = array<i32>} : memref<8x8x128xf32, #tpu.memory_space<vmem>>, vector<8x1x128xf32>,
    %c0_49 = arith.constant 0 : index
    %c0_50 = arith.constant 0 : index
    %93 = vector.load %arg10[%c0_49, %c0_50] : memref<8x128xf32, #tpu.memory_space<vmem>>, vector<8x128xf32>
    %c0_51 = arith.constant 0 : index
    %c0_52 = arith.constant 0 : index
    %94 = vector.load %arg11[%c0_51, %c0_52] : memref<8x128xf32, #tpu.memory_space<vmem>>, vector<8x128xf32>
    %c0_53 = arith.constant 0 : index
    %c0_54 = arith.constant 0 : index
    %95 = vector.load %arg3[%c0_53, %c0_54] : memref<128x640xf32, #tpu.memory_space<vmem>>, vector<128x640xf32>
    %cst_55 = arith.constant dense<0.000000e+00> : vector<8x640xf32>
    %96 = tpu.matmul %93, %95, %cst_55 {dimension_numbers = #tpu.dot_dimension_numbers<[1], [0], [0], [1], [0, 0, 1, 1], [], []>} : vector<8x128xf32>, vector<128x640xf32>, vector<8x640xf32> -> vector<8x640xf32>
    %c2 = arith.constant 2 : index
    %c0_56 = arith.constant 0 : index
    %c0_57 = arith.constant 0 : index
    %97 = vector.load %arg2[%c2, %c0_56, %c0_57] : memref<8x8x512xf32, #tpu.memory_space<vmem>>, vector<1x8x512xf32>
    %98 = vector.shape_cast %97 : vector<1x8x512xf32> to vector<8x512xf32>
    %99 = vector.extract_strided_slice %96 {offsets = [0, 0], sizes = [8, 512], strides = [1, 1]} : vector<8x640xf32> to vector<8x512xf32>
    %100 = arith.addf %98, %99 : vector<8x512xf32>
    %101 = vector.extract_strided_slice %100 {offsets = [0, 0], sizes = [8, 128], strides = [1, 1]} : vector<8x512xf32> to vector<8x128xf32>
    %cst_58 = arith.constant 5.000000e-01 : f32
    %102 = vector.broadcast %cst_58 : f32 to vector<8x128xf32>
    %103 = arith.mulf %102, %101 : vector<8x128xf32>
    %104 = math.tanh %103 : vector<8x128xf32>
    %cst_59 = arith.constant 5.000000e-01 : f32
    %105 = vector.broadcast %cst_59 : f32 to vector<8x128xf32>
    %106 = arith.mulf %105, %104 : vector<8x128xf32>
    %cst_60 = arith.constant 5.000000e-01 : f32
    %107 = vector.broadcast %cst_60 : f32 to vector<8x128xf32>
    %108 = arith.addf %106, %107 : vector<8x128xf32>
    %109 = vector.extract_strided_slice %100 {offsets = [0, 128], sizes = [8, 128], strides = [1, 1]} : vector<8x512xf32> to vector<8x128xf32>
    %cst_61 = arith.constant 5.000000e-01 : f32
    %110 = vector.broadcast %cst_61 : f32 to vector<8x128xf32>
    %111 = arith.mulf %110, %109 : vector<8x128xf32>
    %112 = math.tanh %111 : vector<8x128xf32>
    %cst_62 = arith.constant 5.000000e-01 : f32
    %113 = vector.broadcast %cst_62 : f32 to vector<8x128xf32>
    %114 = arith.mulf %113, %112 : vector<8x128xf32>
    %cst_63 = arith.constant 5.000000e-01 : f32
    %115 = vector.broadcast %cst_63 : f32 to vector<8x128xf32>
    %116 = arith.addf %114, %115 : vector<8x128xf32>
    %117 = vector.extract_strided_slice %100 {offsets = [0, 256], sizes = [8, 128], strides = [1, 1]} : vector<8x512xf32> to vector<8x128xf32>
    %118 = math.tanh %117 : vector<8x128xf32>
    %119 = vector.extract_strided_slice %100 {offsets = [0, 384], sizes = [8, 128], strides = [1, 1]} : vector<8x512xf32> to vector<8x128xf32>
    %cst_64 = arith.constant 5.000000e-01 : f32
    %120 = vector.broadcast %cst_64 : f32 to vector<8x128xf32>
    %121 = arith.mulf %120, %119 : vector<8x128xf32>
    %122 = math.tanh %121 : vector<8x128xf32>
    %cst_65 = arith.constant 5.000000e-01 : f32
    %123 = vector.broadcast %cst_65 : f32 to vector<8x128xf32>
    %124 = arith.mulf %123, %122 : vector<8x128xf32>
    %cst_66 = arith.constant 5.000000e-01 : f32
    %125 = vector.broadcast %cst_66 : f32 to vector<8x128xf32>
    %126 = arith.addf %124, %125 : vector<8x128xf32>
    %127 = arith.mulf %116, %94 : vector<8x128xf32>
    %128 = arith.mulf %108, %118 : vector<8x128xf32>
    %129 = arith.addf %127, %128 : vector<8x128xf32>
    %130 = math.tanh %129 : vector<8x128xf32>
    %131 = arith.mulf %126, %130 : vector<8x128xf32>
    %c0_67 = arith.constant 0 : index
    %c0_68 = arith.constant 0 : index
    %132 = vector.load %arg11[%c0_67, %c0_68] : memref<8x128xf32, #tpu.memory_space<vmem>>, vector<8x128xf32>
    tpu.vector_store %arg11[%c0_67, %c0_68], %129 {strides = array<i32>} : memref<8x128xf32, #tpu.memory_space<vmem>>, vector<8x128xf32>,
    %c0_69 = arith.constant 0 : index
    %c0_70 = arith.constant 0 : index
    %133 = vector.load %arg10[%c0_69, %c0_70] : memref<8x128xf32, #tpu.memory_space<vmem>>, vector<8x128xf32>
    tpu.vector_store %arg10[%c0_69, %c0_70], %131 {strides = array<i32>} : memref<8x128xf32, #tpu.memory_space<vmem>>, vector<8x128xf32>,
    %134 = vector.extract_strided_slice %96 {offsets = [0, 512], sizes = [8, 128], strides = [1, 1]} : vector<8x640xf32> to vector<8x128xf32>
    %135 = arith.addf %134, %5 : vector<8x128xf32>
    %c0_71 = arith.constant 0 : index
    %c1_72 = arith.constant 1 : index
    %c0_73 = arith.constant 0 : index
    %136 = vector.load %arg7[%c0_71, %c1_72, %c0_73] : memref<8x8x128xf32, #tpu.memory_space<vmem>>, vector<8x1x128xf32>
    %137 = vector.shape_cast %136 : vector<8x1x128xf32> to vector<8x128xf32>
    %138 = vector.shape_cast %135 : vector<8x128xf32> to vector<8x1x128xf32>
    tpu.vector_store %arg7[%c0_71, %c1_72, %c0_73], %138 {strides = array<i32>} : memref<8x8x128xf32, #tpu.memory_space<vmem>>, vector<8x1x128xf32>,
    %c0_74 = arith.constant 0 : index
    %c0_75 = arith.constant 0 : index
    %139 = vector.load %arg10[%c0_74, %c0_75] : memref<8x128xf32, #tpu.memory_space<vmem>>, vector<8x128xf32>
    %c0_76 = arith.constant 0 : index
    %c0_77 = arith.constant 0 : index
    %140 = vector.load %arg11[%c0_76, %c0_77] : memref<8x128xf32, #tpu.memory_space<vmem>>, vector<8x128xf32>
    %c0_78 = arith.constant 0 : index
    %c0_79 = arith.constant 0 : index
    %141 = vector.load %arg3[%c0_78, %c0_79] : memref<128x640xf32, #tpu.memory_space<vmem>>, vector<128x640xf32>
    %cst_80 = arith.constant dense<0.000000e+00> : vector<8x640xf32>
    %142 = tpu.matmul %139, %141, %cst_80 {dimension_numbers = #tpu.dot_dimension_numbers<[1], [0], [0], [1], [0, 0, 1, 1], [], []>} : vector<8x128xf32>, vector<128x640xf32>, vector<8x640xf32> -> vector<8x640xf32>
    %c3 = arith.constant 3 : index
    %c0_81 = arith.constant 0 : index
    %c0_82 = arith.constant 0 : index
    %143 = vector.load %arg2[%c3, %c0_81, %c0_82] : memref<8x8x512xf32, #tpu.memory_space<vmem>>, vector<1x8x512xf32>
    %144 = vector.shape_cast %143 : vector<1x8x512xf32> to vector<8x512xf32>
    %145 = vector.extract_strided_slice %142 {offsets = [0, 0], sizes = [8, 512], strides = [1, 1]} : vector<8x640xf32> to vector<8x512xf32>
    %146 = arith.addf %144, %145 : vector<8x512xf32>
    %147 = vector.extract_strided_slice %146 {offsets = [0, 0], sizes = [8, 128], strides = [1, 1]} : vector<8x512xf32> to vector<8x128xf32>
    %cst_83 = arith.constant 5.000000e-01 : f32
    %148 = vector.broadcast %cst_83 : f32 to vector<8x128xf32>
    %149 = arith.mulf %148, %147 : vector<8x128xf32>
    %150 = math.tanh %149 : vector<8x128xf32>
    %cst_84 = arith.constant 5.000000e-01 : f32
    %151 = vector.broadcast %cst_84 : f32 to vector<8x128xf32>
    %152 = arith.mulf %151, %150 : vector<8x128xf32>
    %cst_85 = arith.constant 5.000000e-01 : f32
    %153 = vector.broadcast %cst_85 : f32 to vector<8x128xf32>
    %154 = arith.addf %152, %153 : vector<8x128xf32>
    %155 = vector.extract_strided_slice %146 {offsets = [0, 128], sizes = [8, 128], strides = [1, 1]} : vector<8x512xf32> to vector<8x128xf32>
    %cst_86 = arith.constant 5.000000e-01 : f32
    %156 = vector.broadcast %cst_86 : f32 to vector<8x128xf32>
    %157 = arith.mulf %156, %155 : vector<8x128xf32>
    %158 = math.tanh %157 : vector<8x128xf32>
    %cst_87 = arith.constant 5.000000e-01 : f32
    %159 = vector.broadcast %cst_87 : f32 to vector<8x128xf32>
    %160 = arith.mulf %159, %158 : vector<8x128xf32>
    %cst_88 = arith.constant 5.000000e-01 : f32
    %161 = vector.broadcast %cst_88 : f32 to vector<8x128xf32>
    %162 = arith.addf %160, %161 : vector<8x128xf32>
    %163 = vector.extract_strided_slice %146 {offsets = [0, 256], sizes = [8, 128], strides = [1, 1]} : vector<8x512xf32> to vector<8x128xf32>
    %164 = math.tanh %163 : vector<8x128xf32>
    %165 = vector.extract_strided_slice %146 {offsets = [0, 384], sizes = [8, 128], strides = [1, 1]} : vector<8x512xf32> to vector<8x128xf32>
    %cst_89 = arith.constant 5.000000e-01 : f32
    %166 = vector.broadcast %cst_89 : f32 to vector<8x128xf32>
    %167 = arith.mulf %166, %165 : vector<8x128xf32>
    %168 = math.tanh %167 : vector<8x128xf32>
    %cst_90 = arith.constant 5.000000e-01 : f32
    %169 = vector.broadcast %cst_90 : f32 to vector<8x128xf32>
    %170 = arith.mulf %169, %168 : vector<8x128xf32>
    %cst_91 = arith.constant 5.000000e-01 : f32
    %171 = vector.broadcast %cst_91 : f32 to vector<8x128xf32>
    %172 = arith.addf %170, %171 : vector<8x128xf32>
    %173 = arith.mulf %162, %140 : vector<8x128xf32>
    %174 = arith.mulf %154, %164 : vector<8x128xf32>
    %175 = arith.addf %173, %174 : vector<8x128xf32>
    %176 = math.tanh %175 : vector<8x128xf32>
    %177 = arith.mulf %172, %176 : vector<8x128xf32>
    %c0_92 = arith.constant 0 : index
    %c0_93 = arith.constant 0 : index
    %178 = vector.load %arg11[%c0_92, %c0_93] : memref<8x128xf32, #tpu.memory_space<vmem>>, vector<8x128xf32>
    tpu.vector_store %arg11[%c0_92, %c0_93], %175 {strides = array<i32>} : memref<8x128xf32, #tpu.memory_space<vmem>>, vector<8x128xf32>,
    %c0_94 = arith.constant 0 : index
    %c0_95 = arith.constant 0 : index
    %179 = vector.load %arg10[%c0_94, %c0_95] : memref<8x128xf32, #tpu.memory_space<vmem>>, vector<8x128xf32>
    tpu.vector_store %arg10[%c0_94, %c0_95], %177 {strides = array<i32>} : memref<8x128xf32, #tpu.memory_space<vmem>>, vector<8x128xf32>,
    %180 = vector.extract_strided_slice %142 {offsets = [0, 512], sizes = [8, 128], strides = [1, 1]} : vector<8x640xf32> to vector<8x128xf32>
    %181 = arith.addf %180, %5 : vector<8x128xf32>
    %c0_96 = arith.constant 0 : index
    %c2_97 = arith.constant 2 : index
    %c0_98 = arith.constant 0 : index
    %182 = vector.load %arg7[%c0_96, %c2_97, %c0_98] : memref<8x8x128xf32, #tpu.memory_space<vmem>>, vector<8x1x128xf32>
    %183 = vector.shape_cast %182 : vector<8x1x128xf32> to vector<8x128xf32>
    %184 = vector.shape_cast %181 : vector<8x128xf32> to vector<8x1x128xf32>
    tpu.vector_store %arg7[%c0_96, %c2_97, %c0_98], %184 {strides = array<i32>} : memref<8x8x128xf32, #tpu.memory_space<vmem>>, vector<8x1x128xf32>,
    %c0_99 = arith.constant 0 : index
    %c0_100 = arith.constant 0 : index
    %185 = vector.load %arg10[%c0_99, %c0_100] : memref<8x128xf32, #tpu.memory_space<vmem>>, vector<8x128xf32>
    %c0_101 = arith.constant 0 : index
    %c0_102 = arith.constant 0 : index
    %186 = vector.load %arg11[%c0_101, %c0_102] : memref<8x128xf32, #tpu.memory_space<vmem>>, vector<8x128xf32>
    %c0_103 = arith.constant 0 : index
    %c0_104 = arith.constant 0 : index
    %187 = vector.load %arg3[%c0_103, %c0_104] : memref<128x640xf32, #tpu.memory_space<vmem>>, vector<128x640xf32>
    %cst_105 = arith.constant dense<0.000000e+00> : vector<8x640xf32>
    %188 = tpu.matmul %185, %187, %cst_105 {dimension_numbers = #tpu.dot_dimension_numbers<[1], [0], [0], [1], [0, 0, 1, 1], [], []>} : vector<8x128xf32>, vector<128x640xf32>, vector<8x640xf32> -> vector<8x640xf32>
    %c4 = arith.constant 4 : index
    %c0_106 = arith.constant 0 : index
    %c0_107 = arith.constant 0 : index
    %189 = vector.load %arg2[%c4, %c0_106, %c0_107] : memref<8x8x512xf32, #tpu.memory_space<vmem>>, vector<1x8x512xf32>
    %190 = vector.shape_cast %189 : vector<1x8x512xf32> to vector<8x512xf32>
    %191 = vector.extract_strided_slice %188 {offsets = [0, 0], sizes = [8, 512], strides = [1, 1]} : vector<8x640xf32> to vector<8x512xf32>
    %192 = arith.addf %190, %191 : vector<8x512xf32>
    %193 = vector.extract_strided_slice %192 {offsets = [0, 0], sizes = [8, 128], strides = [1, 1]} : vector<8x512xf32> to vector<8x128xf32>
    %cst_108 = arith.constant 5.000000e-01 : f32
    %194 = vector.broadcast %cst_108 : f32 to vector<8x128xf32>
    %195 = arith.mulf %194, %193 : vector<8x128xf32>
    %196 = math.tanh %195 : vector<8x128xf32>
    %cst_109 = arith.constant 5.000000e-01 : f32
    %197 = vector.broadcast %cst_109 : f32 to vector<8x128xf32>
    %198 = arith.mulf %197, %196 : vector<8x128xf32>
    %cst_110 = arith.constant 5.000000e-01 : f32
    %199 = vector.broadcast %cst_110 : f32 to vector<8x128xf32>
    %200 = arith.addf %198, %199 : vector<8x128xf32>
    %201 = vector.extract_strided_slice %192 {offsets = [0, 128], sizes = [8, 128], strides = [1, 1]} : vector<8x512xf32> to vector<8x128xf32>
    %cst_111 = arith.constant 5.000000e-01 : f32
    %202 = vector.broadcast %cst_111 : f32 to vector<8x128xf32>
    %203 = arith.mulf %202, %201 : vector<8x128xf32>
    %204 = math.tanh %203 : vector<8x128xf32>
    %cst_112 = arith.constant 5.000000e-01 : f32
    %205 = vector.broadcast %cst_112 : f32 to vector<8x128xf32>
    %206 = arith.mulf %205, %204 : vector<8x128xf32>
    %cst_113 = arith.constant 5.000000e-01 : f32
    %207 = vector.broadcast %cst_113 : f32 to vector<8x128xf32>
    %208 = arith.addf %206, %207 : vector<8x128xf32>
    %209 = vector.extract_strided_slice %192 {offsets = [0, 256], sizes = [8, 128], strides = [1, 1]} : vector<8x512xf32> to vector<8x128xf32>
    %210 = math.tanh %209 : vector<8x128xf32>
    %211 = vector.extract_strided_slice %192 {offsets = [0, 384], sizes = [8, 128], strides = [1, 1]} : vector<8x512xf32> to vector<8x128xf32>
    %cst_114 = arith.constant 5.000000e-01 : f32
    %212 = vector.broadcast %cst_114 : f32 to vector<8x128xf32>
    %213 = arith.mulf %212, %211 : vector<8x128xf32>
    %214 = math.tanh %213 : vector<8x128xf32>
    %cst_115 = arith.constant 5.000000e-01 : f32
    %215 = vector.broadcast %cst_115 : f32 to vector<8x128xf32>
    %216 = arith.mulf %215, %214 : vector<8x128xf32>
    %cst_116 = arith.constant 5.000000e-01 : f32
    %217 = vector.broadcast %cst_116 : f32 to vector<8x128xf32>
    %218 = arith.addf %216, %217 : vector<8x128xf32>
    %219 = arith.mulf %208, %186 : vector<8x128xf32>
    %220 = arith.mulf %200, %210 : vector<8x128xf32>
    %221 = arith.addf %219, %220 : vector<8x128xf32>
    %222 = math.tanh %221 : vector<8x128xf32>
    %223 = arith.mulf %218, %222 : vector<8x128xf32>
    %c0_117 = arith.constant 0 : index
    %c0_118 = arith.constant 0 : index
    %224 = vector.load %arg11[%c0_117, %c0_118] : memref<8x128xf32, #tpu.memory_space<vmem>>, vector<8x128xf32>
    tpu.vector_store %arg11[%c0_117, %c0_118], %221 {strides = array<i32>} : memref<8x128xf32, #tpu.memory_space<vmem>>, vector<8x128xf32>,
    %c0_119 = arith.constant 0 : index
    %c0_120 = arith.constant 0 : index
    %225 = vector.load %arg10[%c0_119, %c0_120] : memref<8x128xf32, #tpu.memory_space<vmem>>, vector<8x128xf32>
    tpu.vector_store %arg10[%c0_119, %c0_120], %223 {strides = array<i32>} : memref<8x128xf32, #tpu.memory_space<vmem>>, vector<8x128xf32>,
    %226 = vector.extract_strided_slice %188 {offsets = [0, 512], sizes = [8, 128], strides = [1, 1]} : vector<8x640xf32> to vector<8x128xf32>
    %227 = arith.addf %226, %5 : vector<8x128xf32>
    %c0_121 = arith.constant 0 : index
    %c3_122 = arith.constant 3 : index
    %c0_123 = arith.constant 0 : index
    %228 = vector.load %arg7[%c0_121, %c3_122, %c0_123] : memref<8x8x128xf32, #tpu.memory_space<vmem>>, vector<8x1x128xf32>
    %229 = vector.shape_cast %228 : vector<8x1x128xf32> to vector<8x128xf32>
    %230 = vector.shape_cast %227 : vector<8x128xf32> to vector<8x1x128xf32>
    tpu.vector_store %arg7[%c0_121, %c3_122, %c0_123], %230 {strides = array<i32>} : memref<8x8x128xf32, #tpu.memory_space<vmem>>, vector<8x1x128xf32>,
    %c0_124 = arith.constant 0 : index
    %c0_125 = arith.constant 0 : index
    %231 = vector.load %arg10[%c0_124, %c0_125] : memref<8x128xf32, #tpu.memory_space<vmem>>, vector<8x128xf32>
    %c0_126 = arith.constant 0 : index
    %c0_127 = arith.constant 0 : index
    %232 = vector.load %arg11[%c0_126, %c0_127] : memref<8x128xf32, #tpu.memory_space<vmem>>, vector<8x128xf32>
    %c0_128 = arith.constant 0 : index
    %c0_129 = arith.constant 0 : index
    %233 = vector.load %arg3[%c0_128, %c0_129] : memref<128x640xf32, #tpu.memory_space<vmem>>, vector<128x640xf32>
    %cst_130 = arith.constant dense<0.000000e+00> : vector<8x640xf32>
    %234 = tpu.matmul %231, %233, %cst_130 {dimension_numbers = #tpu.dot_dimension_numbers<[1], [0], [0], [1], [0, 0, 1, 1], [], []>} : vector<8x128xf32>, vector<128x640xf32>, vector<8x640xf32> -> vector<8x640xf32>
    %c5 = arith.constant 5 : index
    %c0_131 = arith.constant 0 : index
    %c0_132 = arith.constant 0 : index
    %235 = vector.load %arg2[%c5, %c0_131, %c0_132] : memref<8x8x512xf32, #tpu.memory_space<vmem>>, vector<1x8x512xf32>
    %236 = vector.shape_cast %235 : vector<1x8x512xf32> to vector<8x512xf32>
    %237 = vector.extract_strided_slice %234 {offsets = [0, 0], sizes = [8, 512], strides = [1, 1]} : vector<8x640xf32> to vector<8x512xf32>
    %238 = arith.addf %236, %237 : vector<8x512xf32>
    %239 = vector.extract_strided_slice %238 {offsets = [0, 0], sizes = [8, 128], strides = [1, 1]} : vector<8x512xf32> to vector<8x128xf32>
    %cst_133 = arith.constant 5.000000e-01 : f32
    %240 = vector.broadcast %cst_133 : f32 to vector<8x128xf32>
    %241 = arith.mulf %240, %239 : vector<8x128xf32>
    %242 = math.tanh %241 : vector<8x128xf32>
    %cst_134 = arith.constant 5.000000e-01 : f32
    %243 = vector.broadcast %cst_134 : f32 to vector<8x128xf32>
    %244 = arith.mulf %243, %242 : vector<8x128xf32>
    %cst_135 = arith.constant 5.000000e-01 : f32
    %245 = vector.broadcast %cst_135 : f32 to vector<8x128xf32>
    %246 = arith.addf %244, %245 : vector<8x128xf32>
    %247 = vector.extract_strided_slice %238 {offsets = [0, 128], sizes = [8, 128], strides = [1, 1]} : vector<8x512xf32> to vector<8x128xf32>
    %cst_136 = arith.constant 5.000000e-01 : f32
    %248 = vector.broadcast %cst_136 : f32 to vector<8x128xf32>
    %249 = arith.mulf %248, %247 : vector<8x128xf32>
    %250 = math.tanh %249 : vector<8x128xf32>
    %cst_137 = arith.constant 5.000000e-01 : f32
    %251 = vector.broadcast %cst_137 : f32 to vector<8x128xf32>
    %252 = arith.mulf %251, %250 : vector<8x128xf32>
    %cst_138 = arith.constant 5.000000e-01 : f32
    %253 = vector.broadcast %cst_138 : f32 to vector<8x128xf32>
    %254 = arith.addf %252, %253 : vector<8x128xf32>
    %255 = vector.extract_strided_slice %238 {offsets = [0, 256], sizes = [8, 128], strides = [1, 1]} : vector<8x512xf32> to vector<8x128xf32>
    %256 = math.tanh %255 : vector<8x128xf32>
    %257 = vector.extract_strided_slice %238 {offsets = [0, 384], sizes = [8, 128], strides = [1, 1]} : vector<8x512xf32> to vector<8x128xf32>
    %cst_139 = arith.constant 5.000000e-01 : f32
    %258 = vector.broadcast %cst_139 : f32 to vector<8x128xf32>
    %259 = arith.mulf %258, %257 : vector<8x128xf32>
    %260 = math.tanh %259 : vector<8x128xf32>
    %cst_140 = arith.constant 5.000000e-01 : f32
    %261 = vector.broadcast %cst_140 : f32 to vector<8x128xf32>
    %262 = arith.mulf %261, %260 : vector<8x128xf32>
    %cst_141 = arith.constant 5.000000e-01 : f32
    %263 = vector.broadcast %cst_141 : f32 to vector<8x128xf32>
    %264 = arith.addf %262, %263 : vector<8x128xf32>
    %265 = arith.mulf %254, %232 : vector<8x128xf32>
    %266 = arith.mulf %246, %256 : vector<8x128xf32>
    %267 = arith.addf %265, %266 : vector<8x128xf32>
    %268 = math.tanh %267 : vector<8x128xf32>
    %269 = arith.mulf %264, %268 : vector<8x128xf32>
    %c0_142 = arith.constant 0 : index
    %c0_143 = arith.constant 0 : index
    %270 = vector.load %arg11[%c0_142, %c0_143] : memref<8x128xf32, #tpu.memory_space<vmem>>, vector<8x128xf32>
    tpu.vector_store %arg11[%c0_142, %c0_143], %267 {strides = array<i32>} : memref<8x128xf32, #tpu.memory_space<vmem>>, vector<8x128xf32>,
    %c0_144 = arith.constant 0 : index
    %c0_145 = arith.constant 0 : index
    %271 = vector.load %arg10[%c0_144, %c0_145] : memref<8x128xf32, #tpu.memory_space<vmem>>, vector<8x128xf32>
    tpu.vector_store %arg10[%c0_144, %c0_145], %269 {strides = array<i32>} : memref<8x128xf32, #tpu.memory_space<vmem>>, vector<8x128xf32>,
    %272 = vector.extract_strided_slice %234 {offsets = [0, 512], sizes = [8, 128], strides = [1, 1]} : vector<8x640xf32> to vector<8x128xf32>
    %273 = arith.addf %272, %5 : vector<8x128xf32>
    %c0_146 = arith.constant 0 : index
    %c4_147 = arith.constant 4 : index
    %c0_148 = arith.constant 0 : index
    %274 = vector.load %arg7[%c0_146, %c4_147, %c0_148] : memref<8x8x128xf32, #tpu.memory_space<vmem>>, vector<8x1x128xf32>
    %275 = vector.shape_cast %274 : vector<8x1x128xf32> to vector<8x128xf32>
    %276 = vector.shape_cast %273 : vector<8x128xf32> to vector<8x1x128xf32>
    tpu.vector_store %arg7[%c0_146, %c4_147, %c0_148], %276 {strides = array<i32>} : memref<8x8x128xf32, #tpu.memory_space<vmem>>, vector<8x1x128xf32>,
    %c0_149 = arith.constant 0 : index
    %c0_150 = arith.constant 0 : index
    %277 = vector.load %arg10[%c0_149, %c0_150] : memref<8x128xf32, #tpu.memory_space<vmem>>, vector<8x128xf32>
    %c0_151 = arith.constant 0 : index
    %c0_152 = arith.constant 0 : index
    %278 = vector.load %arg11[%c0_151, %c0_152] : memref<8x128xf32, #tpu.memory_space<vmem>>, vector<8x128xf32>
    %c0_153 = arith.constant 0 : index
    %c0_154 = arith.constant 0 : index
    %279 = vector.load %arg3[%c0_153, %c0_154] : memref<128x640xf32, #tpu.memory_space<vmem>>, vector<128x640xf32>
    %cst_155 = arith.constant dense<0.000000e+00> : vector<8x640xf32>
    %280 = tpu.matmul %277, %279, %cst_155 {dimension_numbers = #tpu.dot_dimension_numbers<[1], [0], [0], [1], [0, 0, 1, 1], [], []>} : vector<8x128xf32>, vector<128x640xf32>, vector<8x640xf32> -> vector<8x640xf32>
    %c6 = arith.constant 6 : index
    %c0_156 = arith.constant 0 : index
    %c0_157 = arith.constant 0 : index
    %281 = vector.load %arg2[%c6, %c0_156, %c0_157] : memref<8x8x512xf32, #tpu.memory_space<vmem>>, vector<1x8x512xf32>
    %282 = vector.shape_cast %281 : vector<1x8x512xf32> to vector<8x512xf32>
    %283 = vector.extract_strided_slice %280 {offsets = [0, 0], sizes = [8, 512], strides = [1, 1]} : vector<8x640xf32> to vector<8x512xf32>
    %284 = arith.addf %282, %283 : vector<8x512xf32>
    %285 = vector.extract_strided_slice %284 {offsets = [0, 0], sizes = [8, 128], strides = [1, 1]} : vector<8x512xf32> to vector<8x128xf32>
    %cst_158 = arith.constant 5.000000e-01 : f32
    %286 = vector.broadcast %cst_158 : f32 to vector<8x128xf32>
    %287 = arith.mulf %286, %285 : vector<8x128xf32>
    %288 = math.tanh %287 : vector<8x128xf32>
    %cst_159 = arith.constant 5.000000e-01 : f32
    %289 = vector.broadcast %cst_159 : f32 to vector<8x128xf32>
    %290 = arith.mulf %289, %288 : vector<8x128xf32>
    %cst_160 = arith.constant 5.000000e-01 : f32
    %291 = vector.broadcast %cst_160 : f32 to vector<8x128xf32>
    %292 = arith.addf %290, %291 : vector<8x128xf32>
    %293 = vector.extract_strided_slice %284 {offsets = [0, 128], sizes = [8, 128], strides = [1, 1]} : vector<8x512xf32> to vector<8x128xf32>
    %cst_161 = arith.constant 5.000000e-01 : f32
    %294 = vector.broadcast %cst_161 : f32 to vector<8x128xf32>
    %295 = arith.mulf %294, %293 : vector<8x128xf32>
    %296 = math.tanh %295 : vector<8x128xf32>
    %cst_162 = arith.constant 5.000000e-01 : f32
    %297 = vector.broadcast %cst_162 : f32 to vector<8x128xf32>
    %298 = arith.mulf %297, %296 : vector<8x128xf32>
    %cst_163 = arith.constant 5.000000e-01 : f32
    %299 = vector.broadcast %cst_163 : f32 to vector<8x128xf32>
    %300 = arith.addf %298, %299 : vector<8x128xf32>
    %301 = vector.extract_strided_slice %284 {offsets = [0, 256], sizes = [8, 128], strides = [1, 1]} : vector<8x512xf32> to vector<8x128xf32>
    %302 = math.tanh %301 : vector<8x128xf32>
    %303 = vector.extract_strided_slice %284 {offsets = [0, 384], sizes = [8, 128], strides = [1, 1]} : vector<8x512xf32> to vector<8x128xf32>
    %cst_164 = arith.constant 5.000000e-01 : f32
    %304 = vector.broadcast %cst_164 : f32 to vector<8x128xf32>
    %305 = arith.mulf %304, %303 : vector<8x128xf32>
    %306 = math.tanh %305 : vector<8x128xf32>
    %cst_165 = arith.constant 5.000000e-01 : f32
    %307 = vector.broadcast %cst_165 : f32 to vector<8x128xf32>
    %308 = arith.mulf %307, %306 : vector<8x128xf32>
    %cst_166 = arith.constant 5.000000e-01 : f32
    %309 = vector.broadcast %cst_166 : f32 to vector<8x128xf32>
    %310 = arith.addf %308, %309 : vector<8x128xf32>
    %311 = arith.mulf %300, %278 : vector<8x128xf32>
    %312 = arith.mulf %292, %302 : vector<8x128xf32>
    %313 = arith.addf %311, %312 : vector<8x128xf32>
    %314 = math.tanh %313 : vector<8x128xf32>
    %315 = arith.mulf %310, %314 : vector<8x128xf32>
    %c0_167 = arith.constant 0 : index
    %c0_168 = arith.constant 0 : index
    %316 = vector.load %arg11[%c0_167, %c0_168] : memref<8x128xf32, #tpu.memory_space<vmem>>, vector<8x128xf32>
    tpu.vector_store %arg11[%c0_167, %c0_168], %313 {strides = array<i32>} : memref<8x128xf32, #tpu.memory_space<vmem>>, vector<8x128xf32>,
    %c0_169 = arith.constant 0 : index
    %c0_170 = arith.constant 0 : index
    %317 = vector.load %arg10[%c0_169, %c0_170] : memref<8x128xf32, #tpu.memory_space<vmem>>, vector<8x128xf32>
    tpu.vector_store %arg10[%c0_169, %c0_170], %315 {strides = array<i32>} : memref<8x128xf32, #tpu.memory_space<vmem>>, vector<8x128xf32>,
    %318 = vector.extract_strided_slice %280 {offsets = [0, 512], sizes = [8, 128], strides = [1, 1]} : vector<8x640xf32> to vector<8x128xf32>
    %319 = arith.addf %318, %5 : vector<8x128xf32>
    %c0_171 = arith.constant 0 : index
    %c5_172 = arith.constant 5 : index
    %c0_173 = arith.constant 0 : index
    %320 = vector.load %arg7[%c0_171, %c5_172, %c0_173] : memref<8x8x128xf32, #tpu.memory_space<vmem>>, vector<8x1x128xf32>
    %321 = vector.shape_cast %320 : vector<8x1x128xf32> to vector<8x128xf32>
    %322 = vector.shape_cast %319 : vector<8x128xf32> to vector<8x1x128xf32>
    tpu.vector_store %arg7[%c0_171, %c5_172, %c0_173], %322 {strides = array<i32>} : memref<8x8x128xf32, #tpu.memory_space<vmem>>, vector<8x1x128xf32>,
    %c0_174 = arith.constant 0 : index
    %c0_175 = arith.constant 0 : index
    %323 = vector.load %arg10[%c0_174, %c0_175] : memref<8x128xf32, #tpu.memory_space<vmem>>, vector<8x128xf32>
    %c0_176 = arith.constant 0 : index
    %c0_177 = arith.constant 0 : index
    %324 = vector.load %arg11[%c0_176, %c0_177] : memref<8x128xf32, #tpu.memory_space<vmem>>, vector<8x128xf32>
    %c0_178 = arith.constant 0 : index
    %c0_179 = arith.constant 0 : index
    %325 = vector.load %arg3[%c0_178, %c0_179] : memref<128x640xf32, #tpu.memory_space<vmem>>, vector<128x640xf32>
    %cst_180 = arith.constant dense<0.000000e+00> : vector<8x640xf32>
    %326 = tpu.matmul %323, %325, %cst_180 {dimension_numbers = #tpu.dot_dimension_numbers<[1], [0], [0], [1], [0, 0, 1, 1], [], []>} : vector<8x128xf32>, vector<128x640xf32>, vector<8x640xf32> -> vector<8x640xf32>
    %c7 = arith.constant 7 : index
    %c0_181 = arith.constant 0 : index
    %c0_182 = arith.constant 0 : index
    %327 = vector.load %arg2[%c7, %c0_181, %c0_182] : memref<8x8x512xf32, #tpu.memory_space<vmem>>, vector<1x8x512xf32>
    %328 = vector.shape_cast %327 : vector<1x8x512xf32> to vector<8x512xf32>
    %329 = vector.extract_strided_slice %326 {offsets = [0, 0], sizes = [8, 512], strides = [1, 1]} : vector<8x640xf32> to vector<8x512xf32>
    %330 = arith.addf %328, %329 : vector<8x512xf32>
    %331 = vector.extract_strided_slice %330 {offsets = [0, 0], sizes = [8, 128], strides = [1, 1]} : vector<8x512xf32> to vector<8x128xf32>
    %cst_183 = arith.constant 5.000000e-01 : f32
    %332 = vector.broadcast %cst_183 : f32 to vector<8x128xf32>
    %333 = arith.mulf %332, %331 : vector<8x128xf32>
    %334 = math.tanh %333 : vector<8x128xf32>
    %cst_184 = arith.constant 5.000000e-01 : f32
    %335 = vector.broadcast %cst_184 : f32 to vector<8x128xf32>
    %336 = arith.mulf %335, %334 : vector<8x128xf32>
    %cst_185 = arith.constant 5.000000e-01 : f32
    %337 = vector.broadcast %cst_185 : f32 to vector<8x128xf32>
    %338 = arith.addf %336, %337 : vector<8x128xf32>
    %339 = vector.extract_strided_slice %330 {offsets = [0, 128], sizes = [8, 128], strides = [1, 1]} : vector<8x512xf32> to vector<8x128xf32>
    %cst_186 = arith.constant 5.000000e-01 : f32
    %340 = vector.broadcast %cst_186 : f32 to vector<8x128xf32>
    %341 = arith.mulf %340, %339 : vector<8x128xf32>
    %342 = math.tanh %341 : vector<8x128xf32>
    %cst_187 = arith.constant 5.000000e-01 : f32
    %343 = vector.broadcast %cst_187 : f32 to vector<8x128xf32>
    %344 = arith.mulf %343, %342 : vector<8x128xf32>
    %cst_188 = arith.constant 5.000000e-01 : f32
    %345 = vector.broadcast %cst_188 : f32 to vector<8x128xf32>
    %346 = arith.addf %344, %345 : vector<8x128xf32>
    %347 = vector.extract_strided_slice %330 {offsets = [0, 256], sizes = [8, 128], strides = [1, 1]} : vector<8x512xf32> to vector<8x128xf32>
    %348 = math.tanh %347 : vector<8x128xf32>
    %349 = vector.extract_strided_slice %330 {offsets = [0, 384], sizes = [8, 128], strides = [1, 1]} : vector<8x512xf32> to vector<8x128xf32>
    %cst_189 = arith.constant 5.000000e-01 : f32
    %350 = vector.broadcast %cst_189 : f32 to vector<8x128xf32>
    %351 = arith.mulf %350, %349 : vector<8x128xf32>
    %352 = math.tanh %351 : vector<8x128xf32>
    %cst_190 = arith.constant 5.000000e-01 : f32
    %353 = vector.broadcast %cst_190 : f32 to vector<8x128xf32>
    %354 = arith.mulf %353, %352 : vector<8x128xf32>
    %cst_191 = arith.constant 5.000000e-01 : f32
    %355 = vector.broadcast %cst_191 : f32 to vector<8x128xf32>
    %356 = arith.addf %354, %355 : vector<8x128xf32>
    %357 = arith.mulf %346, %324 : vector<8x128xf32>
    %358 = arith.mulf %338, %348 : vector<8x128xf32>
    %359 = arith.addf %357, %358 : vector<8x128xf32>
    %360 = math.tanh %359 : vector<8x128xf32>
    %361 = arith.mulf %356, %360 : vector<8x128xf32>
    %c0_192 = arith.constant 0 : index
    %c0_193 = arith.constant 0 : index
    %362 = vector.load %arg11[%c0_192, %c0_193] : memref<8x128xf32, #tpu.memory_space<vmem>>, vector<8x128xf32>
    tpu.vector_store %arg11[%c0_192, %c0_193], %359 {strides = array<i32>} : memref<8x128xf32, #tpu.memory_space<vmem>>, vector<8x128xf32>,
    %c0_194 = arith.constant 0 : index
    %c0_195 = arith.constant 0 : index
    %363 = vector.load %arg10[%c0_194, %c0_195] : memref<8x128xf32, #tpu.memory_space<vmem>>, vector<8x128xf32>
    tpu.vector_store %arg10[%c0_194, %c0_195], %361 {strides = array<i32>} : memref<8x128xf32, #tpu.memory_space<vmem>>, vector<8x128xf32>,
    %364 = vector.extract_strided_slice %326 {offsets = [0, 512], sizes = [8, 128], strides = [1, 1]} : vector<8x640xf32> to vector<8x128xf32>
    %365 = arith.addf %364, %5 : vector<8x128xf32>
    %c0_196 = arith.constant 0 : index
    %c6_197 = arith.constant 6 : index
    %c0_198 = arith.constant 0 : index
    %366 = vector.load %arg7[%c0_196, %c6_197, %c0_198] : memref<8x8x128xf32, #tpu.memory_space<vmem>>, vector<8x1x128xf32>
    %367 = vector.shape_cast %366 : vector<8x1x128xf32> to vector<8x128xf32>
    %368 = vector.shape_cast %365 : vector<8x128xf32> to vector<8x1x128xf32>
    tpu.vector_store %arg7[%c0_196, %c6_197, %c0_198], %368 {strides = array<i32>} : memref<8x8x128xf32, #tpu.memory_space<vmem>>, vector<8x1x128xf32>,
    %c0_i32_199 = arith.constant 0 : i32
    %369 = arith.cmpi eq, %arg1, %c0_i32_199 : i32
    %370 = arith.extui %369 : i1 to i32
    %c0_i32_200 = arith.constant 0 : i32
    %371 = arith.cmpi ne, %370, %c0_i32_200 : i32
    scf.if %371 {
      %c0_208 = arith.constant 0 : index
      %c0_209 = arith.constant 0 : index
      %379 = vector.load %arg8[%c0_208, %c0_209] : memref<8x128xf32, #tpu.memory_space<vmem>>, vector<8x128xf32>
      tpu.vector_store %arg8[%c0_208, %c0_209], %361 {strides = array<i32>} : memref<8x128xf32, #tpu.memory_space<vmem>>, vector<8x128xf32>,
      %c0_210 = arith.constant 0 : index
      %c0_211 = arith.constant 0 : index
      %380 = vector.load %arg9[%c0_210, %c0_211] : memref<8x128xf32, #tpu.memory_space<vmem>>, vector<8x128xf32>
      tpu.vector_store %arg9[%c0_210, %c0_211], %359 {strides = array<i32>} : memref<8x128xf32, #tpu.memory_space<vmem>>, vector<8x128xf32>,
    } else {
    }
    %c0_201 = arith.constant 0 : index
    %c0_202 = arith.constant 0 : index
    %372 = vector.load %arg10[%c0_201, %c0_202] : memref<8x128xf32, #tpu.memory_space<vmem>>, vector<8x128xf32>
    %c0_203 = arith.constant 0 : index
    %c512 = arith.constant 512 : index
    %373 = vector.load %arg3[%c0_203, %c512] : memref<128x640xf32, #tpu.memory_space<vmem>>, vector<128x128xf32>
    %cst_204 = arith.constant dense<0.000000e+00> : vector<8x128xf32>
    %374 = tpu.matmul %372, %373, %cst_204 {dimension_numbers = #tpu.dot_dimension_numbers<[1], [0], [0], [1], [0, 0, 1, 1], [], []>} : vector<8x128xf32>, vector<128x128xf32>, vector<8x128xf32> -> vector<8x128xf32>
    %375 = arith.addf %374, %5 : vector<8x128xf32>
    %c0_205 = arith.constant 0 : index
    %c7_206 = arith.constant 7 : index
    %c0_207 = arith.constant 0 : index
    %376 = vector.load %arg7[%c0_205, %c7_206, %c0_207] : memref<8x8x128xf32, #tpu.memory_space<vmem>>, vector<8x1x128xf32>
    %377 = vector.shape_cast %376 : vector<8x1x128xf32> to vector<8x128xf32>
    %378 = vector.shape_cast %375 : vector<8x128xf32> to vector<8x1x128xf32>
    tpu.vector_store %arg7[%c0_205, %c7_206, %c0_207], %378 {strides = array<i32>} : memref<8x8x128xf32, #tpu.memory_space<vmem>>, vector<8x1x128xf32>,
    return
  }
  func.func @transform_0(%arg0: i32, %arg1: i32) -> (i32, i32, i32) {
    %c0_i32 = arith.constant 0 : i32
    %c0_i32_0 = arith.constant 0 : i32
    return %arg1, %arg0, %c0_i32 : i32, i32, i32
  }
  func.func @transform_1(%arg0: i32, %arg1: i32) -> (i32, i32) {
    %c0_i32 = arith.constant 0 : i32
    %c0_i32_0 = arith.constant 0 : i32
    %c0_i32_1 = arith.constant 0 : i32
    return %c0_i32, %c0_i32_0 : i32, i32
  }
  func.func @transform_2(%arg0: i32, %arg1: i32) -> (i32, i32) {
    %c0_i32 = arith.constant 0 : i32
    %c0_i32_0 = arith.constant 0 : i32
    %c0_i32_1 = arith.constant 0 : i32
    return %c0_i32, %c0_i32_0 : i32, i32
  }
  func.func @transform_3(%arg0: i32, %arg1: i32) -> (i32, i32) {
    %c0_i32 = arith.constant 0 : i32
    %c0_i32_0 = arith.constant 0 : i32
    return %arg0, %c0_i32 : i32, i32
  }
  func.func @transform_4(%arg0: i32, %arg1: i32) -> (i32, i32) {
    %c0_i32 = arith.constant 0 : i32
    %c0_i32_0 = arith.constant 0 : i32
    return %arg0, %c0_i32 : i32, i32
  }
  func.func @transform_5(%arg0: i32, %arg1: i32) -> (i32, i32, i32) {
    %c0_i32 = arith.constant 0 : i32
    %c0_i32_0 = arith.constant 0 : i32
    return %arg0, %arg1, %c0_i32 : i32, i32, i32
  }
  func.func @transform_6(%arg0: i32, %arg1: i32) -> (i32, i32) {
    %c0_i32 = arith.constant 0 : i32
    %c0_i32_0 = arith.constant 0 : i32
    return %arg0, %c0_i32 : i32, i32
  }
  func.func @transform_7(%arg0: i32, %arg1: i32) -> (i32, i32) {
    %c0_i32 = arith.constant 0 : i32
    %c0_i32_0 = arith.constant 0 : i32
    return %arg0, %c0_i32 : i32, i32
  }
}

</mosaic_0001>

<bundles_post_ra>
// kernel: tpu_custom_call.1
= control target key start
LH: loop header
LB: loop body
LE: loop exit
PB: predicated region body
PF: predicated region fallthrough
CT: control target
= control target key end

     0   :  { %13 = vsyncpa [#allocation5], 0  ;;  %s5499_s0 = inlined_call_operand.hbm [shape: f32[8,8,512], index: 0, kind: input, shape index: {}]   ;;  %s5500_s1 = inlined_call_operand.hbm [shape: f32[128,640], index: 1, kind: input, shape index: {}]   ;;  %s5501_s2 = inlined_call_operand.vmem [shape: f32[1,128], index: 2, kind: input, shape index: {}]   ;;  %s5502_s3 = inlined_call_operand.vmem [shape: f32[8,128], index: 3, kind: input, shape index: {}]   ;;  %s5503_s4 = inlined_call_operand.hbm [shape: f32[8,128], index: 4, kind: input, shape index: {}]   ;;  %s5504_s5 = inlined_call_operand.hbm [shape: f32[8,8,128], index: 5, kind: output, shape index: {0}]   ;;  %s5505_s6 = inlined_call_operand.hbm [shape: f32[8,128], index: 6, kind: output, shape index: {1}]   ;;  %s5506_s7 = inlined_call_operand.hbm [shape: f32[8,128], index: 7, kind: output, shape index: {2}]  }
   0x1   :  { %14 = vsyncpa [#allocation8], 0 }
   0x2   :  { %15 = vsyncpa [#allocation6], 0 }
   0x3   :  { %16 = vsyncpa [#allocation12], 0  ;;  %s4638_s24 = smov [#allocation7]   ;;  %s4498_s28 = scalar_lea.hbm %s5500_s1, 10240 }
   0x4   :  { %s34_s25 = sshll.u32 %s4638_s24, 4  ;;  %p4499_p0 = scmp.ne.s32.totalorder %s5500_s1, %s4498_s28  ;;  %s35_s25 = int_to_ptr.vmem [resolvable:$true] %s34_s25 }
   0x5   :  { %p4502_p1 = scmp.lt.u32.totalorder %s4498_s28, %s5500_s1 }
   0x7   :  { %p4504_p2 = pnand %p4502_p1, %p4499_p0 }
   0x9   :  { %4507 = shalt.err (!%p4504_p2)
}
   0xa   :  { %s4508_s10 = scalar_lea.vmem %s35_s25, 10240  ;;  %p4513_p4 = scmp.lt.s32.totalorder %s35_s25, %s35_s25 }
   0xb   :  { %p4509_p3 = scmp.ne.s32.totalorder %s35_s25, %s4508_s10  ;;  %p4514_p5 = scmp.lt.s32.totalorder %s4508_s10, %s4508_s10 }
   0xd   :  { %p4515_p6 = por %p4514_p5, %p4513_p4 }
   0xf   :  { %p4516_p7 = pnand %p4515_p6, %p4509_p3 }
  0x11   :  { %4519 = shalt.err (!%p4516_p7)
}
  0x12   :  { %s4639_s11 = smov 640   ;;  %s4640_s12 = smov 40  }
  0x13   :  { %40 = dma.hbm_to_vmem [thread:$0]  %s5500_s1, 10240, %s35_s25, [#allocation8], %s4639_s11, %s4639_s11, %s4640_s12  }
  0x14   :  { %s4641_s15 = smov [#allocation4]   ;;  %s4520_s19 = scalar_lea.hbm %s5499_s0, 4096 }
  0x15   :  { %s22_s16 = sshll.u32 %s4641_s15, 4  ;;  %p4521_p8 = scmp.ne.s32.totalorder %s5499_s0, %s4520_s19  ;;  %s23_s16 = int_to_ptr.vmem [resolvable:$true] %s22_s16 }
  0x16   :  { %p4524_p9 = scmp.lt.u32.totalorder %s4520_s19, %s5499_s0 }
  0x18   :  { %p4526_p10 = pnand %p4524_p9, %p4521_p8 }
  0x1a   :  { %4529 = shalt.err (!%p4526_p10)
}
  0x1b   :  { %s4530_s24 = scalar_lea.vmem %s23_s16, 4096  ;;  %p4535_p12 = scmp.lt.s32.totalorder %s23_s16, %s23_s16 }
  0x1c   :  { %p4531_p11 = scmp.ne.s32.totalorder %s23_s16, %s4530_s24  ;;  %p4536_p13 = scmp.lt.s32.totalorder %s4530_s24, %s4530_s24 }
  0x1e   :  { %p4537_p0 = por %p4536_p13, %p4535_p12 }
  0x20   :  { %p4538_p1 = pnand %p4537_p0, %p4531_p11 }
  0x22   :  { %4541 = shalt.err (!%p4538_p1)
}
  0x23   :  { %s4642_s1 = smov 512   ;;  %s4643_s25 = smov 32  }
  0x24   :  { %28 = dma.hbm_to_vmem [thread:$0]  %s5499_s0, 4096, %s23_s16, [#allocation5], %s4642_s1, %s4642_s1, %s4643_s25  }
  0x25   :  { %s4644_s28 = smov [#allocation9]   ;;  %s4542_s9 = scalar_lea.hbm %s5503_s4, 128 }
  0x26   :  { %s51_s29 = sshll.u32 %s4644_s28, 4  ;;  %p4543_p2 = scmp.ne.s32.totalorder %s5503_s4, %s4542_s9  ;;  %s52_s29 = int_to_ptr.vmem [resolvable:$true] %s51_s29 }
  0x27   :  { %p4546_p3 = scmp.lt.u32.totalorder %s4542_s9, %s5503_s4 }
  0x29   :  { %p4548_p4 = pnand %p4546_p3, %p4543_p2 }
  0x2b   :  { %4551 = shalt.err (!%p4548_p4)
}
  0x2c   :  { %s4552_s14 = scalar_lea.vmem %s52_s29, 128  ;;  %p4557_p6 = scmp.lt.s32.totalorder %s52_s29, %s52_s29 }
  0x2d   :  { %p4553_p5 = scmp.ne.s32.totalorder %s52_s29, %s4552_s14  ;;  %p4558_p7 = scmp.lt.s32.totalorder %s4552_s14, %s4552_s14 }
  0x2f   :  { %p4559_p8 = por %p4558_p7, %p4557_p6 }
  0x31   :  { %p4560_p9 = pnand %p4559_p8, %p4553_p5 }
  0x33   :  { %4563 = shalt.err (!%p4560_p9)
}
  0x34   :  { %54 = dma.hbm_to_vmem [thread:$0]  %s5503_s4, 128, %s52_s29, [#allocation8]  }
  0x35   :  { %4630 = dma.done.wait [#allocation5], 4096  }
  0x36   :  { %4631 = vsyncadd [#allocation5], 4294963200 }
  0x37   :  { %4632 = dma.done.wait [#allocation8], 10368  }
  0x38   :  { %4633 = vsyncadd [#allocation8], 4294956928  ;;  %v5507_v0 = vmov 0.0   ;;  %v82_v1 = vld [vmem:[#allocation7 + $0x8] sm:$0xff]  ;;  %v86_v2 = vld [vmem:[#allocation7 + $0x30] sm:$0xff]  ;;  %vm4647_vm0 = vmmov 0  }
  0x39   :  { %209 = vmatprep.mubr.f32.mxu0 %v5507_v0  ;;  %280 = vmatprep.mubr.f32.mxu1 %v5507_v0  ;;  %v81_v3 = vld [vmem:[#allocation7] sm:$0xff]  ;;  %v4732_v4 = vpack.c.bf16 %v86_v2, %v82_v1  ;;  %v85_v5 = vld [vmem:[#allocation7 + $0x28] sm:$0xff]  ;;  %v90_v6 = vld [vmem:[#allocation7 + $0x58] sm:$0xff] }
  0x3a   :  { %v94_v7 = vld [vmem:[#allocation7 + $0x80] sm:$0xff]  ;;  %v4734_v8 = vpack.c.bf16 %v85_v5, %v81_v3  ;;  %v89_v10 = vld [vmem:[#allocation7 + $0x50] sm:$0xff]  ;;  %v93_v11 = vld [vmem:[#allocation7 + $0x78] sm:$0xff] }
  0x3b   :  { %v4736_v9 = vpack.c.bf16 %v94_v7, %v90_v6  ;;  %v84_v12 = vld [vmem:[#allocation7 + $0x18] sm:$0xff]  ;;  %3698 = vmatprep.subr.bf16.mxu0 %v4732_v4  ;;  %v88_v13 = vld [vmem:[#allocation7 + $0x40] sm:$0xff]  ;;  %v83_v14 = vld [vmem:[#allocation7 + $0x10] sm:$0xff]  ;;  %v4740_v16 = vpack.c.bf16 %v93_v11, %v89_v10 }
  0x3c   :  { %v87_v15 = vld [vmem:[#allocation7 + $0x38] sm:$0xff]  ;;  %3700 = vmatpush1.bf16.msra.mxu0 %v4734_v8  ;;  %v4742_v17 = vpack.c.bf16 %v88_v13, %v84_v12  ;;  %v98_v19 = vld [vmem:[#allocation7 + $0xa8] sm:$0xff]  ;;  %v102_v20 = vld [vmem:[#allocation7 + $0xd0] sm:$0xff] }
  0x3d   :  { %v4744_v18 = vpack.c.bf16 %v87_v15, %v83_v14  ;;  %v97_v21 = vld [vmem:[#allocation7 + $0xa0] sm:$0xff]  ;;  %3702 = vmatprep.subr.bf16.mxu0 %v4736_v9  ;;  %v4747_v22 = vpack.c.bf16 %v102_v20, %v98_v19  ;;  %v101_v23 = vld [vmem:[#allocation7 + $0xc8] sm:$0xff]  ;;  %v96_v25 = vld [vmem:[#allocation7 + $0x90] sm:$0xff] }
  0x3e   :  { %v92_v24 = vld [vmem:[#allocation7 + $0x68] sm:$0xff]  ;;  %3730 = vmatprep.subr.bf16.mxu1 %v4742_v17  ;;  %v91_v27 = vld [vmem:[#allocation7 + $0x60] sm:$0xff]  ;;  %v106_v29 = vld [vmem:[#allocation7 + $0xf8] sm:$0xff]  ;;  %v4756_v32 = vpack.c.bf16 %v101_v23, %v97_v21 }
  0x3f   :  { %v4750_v26 = vpack.c.bf16 %v96_v25, %v92_v24  ;;  %v95_v28 = vld [vmem:[#allocation7 + $0x88] sm:$0xff]  ;;  %3732 = vmatpush1.bf16.msra.mxu1 %v4744_v18  ;;  %v110_v31 = vld [vmem:[#allocation7 + $0x120] sm:$0xff]  ;;  %v100_v33 = vld [vmem:[#allocation7 + $0xb8] sm:$0xff] }
  0x40   :  { %v4753_v30 = vpack.c.bf16 %v95_v28, %v91_v27  ;;  %3704 = vmatpush1.bf16.msra.mxu0 %v4740_v16  ;;  %v104_v34 = vld [vmem:[#allocation7 + $0xe0] sm:$0xff]  ;;  %v99_v35 = vld [vmem:[#allocation7 + $0xb0] sm:$0xff]  ;;  %v4760_v36 = vpack.c.bf16 %v110_v31, %v106_v29  ;;  %v109_v38 = vld [vmem:[#allocation7 + $0x118] sm:$0xff] }
  0x41   :  { %3734 = vmatprep.subr.bf16.mxu1 %v4750_v26  ;;  %3706 = vmatprep.subr.bf16.mxu0 %v4747_v22  ;;  %v105_v37 = vld [vmem:[#allocation7 + $0xf0] sm:$0xff]  ;;  %v4762_v39 = vpack.c.bf16 %v104_v34, %v100_v33  ;;  %v103_v40 = vld [vmem:[#allocation7 + $0xd8] sm:$0xff]  ;;  %v114_v41 = vld [vmem:[#allocation7 + $0x148] sm:$0xff] }
  0x42   :  { %v118_v42 = vld [vmem:[#allocation7 + $0x170] sm:$0xff]  ;;  %v108_v43 = vld [vmem:[#allocation7 + $0x108] sm:$0xff]  ;;  %v4765_v44 = vpack.c.bf16 %v103_v40, %v99_v35  ;;  %v4768_v46 = vpack.c.bf16 %v109_v38, %v105_v37  ;;  %v113_v47 = vld [vmem:[#allocation7 + $0x140] sm:$0xff] }
  0x43   :  { %3736 = vmatpush1.bf16.msra.mxu1 %v4753_v30  ;;  %v112_v45 = vld [vmem:[#allocation7 + $0x130] sm:$0xff]  ;;  %v107_v49 = vld [vmem:[#allocation7 + $0x100] sm:$0xff]  ;;  %v111_v50 = vld [vmem:[#allocation7 + $0x128] sm:$0xff]  ;;  %v4774_v51 = vpack.c.bf16 %v118_v42, %v114_v41 }
  0x44   :  { %3708 = vmatpush1.bf16.msra.mxu0 %v4756_v32  ;;  %3738 = vmatprep.subr.bf16.mxu1 %v4762_v39  ;;  %v4771_v48 = vpack.c.bf16 %v112_v45, %v108_v43  ;;  %v117_v52 = vld [vmem:[#allocation7 + $0x168] sm:$0xff]  ;;  %v116_v53 = vld [vmem:[#allocation7 + $0x158] sm:$0xff]  ;;  %v120_v54 = vld [vmem:[#allocation7 + $0x180] sm:$0xff]  ;;  %v4777_v57 = vpack.c.bf16 %v111_v50, %v107_v49  ;;  %v5509_v50 = vmov 0.0|0.0  }
  0x45   :  { %3710 = vmatprep.subr.bf16.mxu0 %v4760_v36  ;;  %v122_v55 = vld [vmem:[#allocation7 + $0x198] sm:$0xff]  ;;  %v126_v56 = vld [vmem:[#allocation7 + $0x1c0] sm:$0xff]  ;;  %v4780_v58 = vpack.c.bf16 %v117_v52, %v113_v47  ;;  %v121_v59 = vld [vmem:[#allocation7 + $0x190] sm:$0xff]  ;;  %v4783_v60 = vpack.c.bf16 %v120_v54, %v116_v53 }
  0x46   :  { %v115_v61 = vld [vmem:[#allocation7 + $0x150] sm:$0xff]  ;;  %v119_v62 = vld [vmem:[#allocation7 + $0x178] sm:$0xff]  ;;  %v4786_v63 = vpack.c.bf16 %v126_v56, %v122_v55  ;;  %v124_v2 = vld [vmem:[#allocation7 + $0x1a8] sm:$0xff] }
  0x47   :  { %3740 = vmatpush1.bf16.msra.mxu1 %v4765_v44  ;;  %v125_v1 = vld [vmem:[#allocation7 + $0x1b8] sm:$0xff]  ;;  %v128_v3 = vld [vmem:[#allocation7 + $0x1d0] sm:$0xff]  ;;  %v130_v5 = vld [vmem:[#allocation7 + $0x1e8] sm:$0xff]  ;;  %v4789_v7 = vpack.c.bf16 %v119_v62, %v115_v61 }
  0x48   :  { %3712 = vmatpush1.bf16.msra.mxu0 %v4768_v46  ;;  %3742 = vmatprep.subr.bf16.mxu1 %v4771_v48  ;;  %v134_v6 = vld [vmem:[#allocation7 + $0x210] sm:$0xff]  ;;  %v4792_v10 = vpack.c.bf16 %v125_v1, %v121_v59  ;;  %v129_v11 = vld [vmem:[#allocation7 + $0x1e0] sm:$0xff]  ;;  %v4795_v12 = vpack.c.bf16 %v128_v3, %v124_v2  ;;  %v127_v14 = vld [vmem:[#allocation7 + $0x1c8] sm:$0xff] }
  0x49   :  { %3714 = vmatprep.subr.bf16.mxu0 %v4774_v51  ;;  %v123_v13 = vld [vmem:[#allocation7 + $0x1a0] sm:$0xff]  ;;  %v4798_v15 = vpack.c.bf16 %v134_v6, %v130_v5  ;;  %v133_v19 = vld [vmem:[#allocation7 + $0x208] sm:$0xff]  ;;  %v132_v20 = vld [vmem:[#allocation7 + $0x1f8] sm:$0xff] }
  0x4a   :  { %v136_v21 = vld [vmem:[#allocation7 + $0x220] sm:$0xff]  ;;  %v138_v23 = vld [vmem:[#allocation7 + $0x238] sm:$0xff]  ;;  %v4801_v25 = vpack.c.bf16 %v127_v14, %v123_v13  ;;  %v4804_v27 = vpack.c.bf16 %v133_v19, %v129_v11  ;;  %v137_v28 = vld [vmem:[#allocation7 + $0x230] sm:$0xff] }
  0x4b   :  { %3744 = vmatpush1.bf16.msra.mxu1 %v4777_v57  ;;  %v142_v24 = vld [vmem:[#allocation7 + $0x260] sm:$0xff]  ;;  %v4807_v29 = vpack.c.bf16 %v136_v21, %v132_v20  ;;  %v131_v31 = vld [vmem:[#allocation7 + $0x1f0] sm:$0xff]  ;;  %v135_v33 = vld [vmem:[#allocation7 + $0x218] sm:$0xff] }
  0x4c   :  { %3716 = vmatpush1.bf16.msra.mxu0 %v4780_v58  ;;  %3746 = vmatprep.subr.bf16.mxu1 %v4783_v60  ;;  %v4810_v34 = vpack.c.bf16 %v142_v24, %v138_v23  ;;  %v141_v35 = vld [vmem:[#allocation7 + $0x258] sm:$0xff]  ;;  %v140_v37 = vld [vmem:[#allocation7 + $0x248] sm:$0xff]  ;;  %v144_v38 = vld [vmem:[#allocation7 + $0x270] sm:$0xff]  ;;  %v4813_v40 = vpack.c.bf16 %v135_v33, %v131_v31 }
  0x4d   :  { %3718 = vmatprep.subr.bf16.mxu0 %v4786_v63  ;;  %v4816_v41 = vpack.c.bf16 %v141_v35, %v137_v28  ;;  %v4819_v42 = vpack.c.bf16 %v144_v38, %v140_v37  ;;  %v139_v43 = vld [vmem:[#allocation7 + $0x240] sm:$0xff]  ;;  %v143_v45 = vld [vmem:[#allocation7 + $0x268] sm:$0xff]  ;;  %v289_v59 = vld [vmem:[#allocation4 + $0x10] sm:$0xff] }
  0x4e   :  { %v4823_v47 = vpack.c.bf16 %v143_v45, %v139_v43  ;;  %v68_v49 = vld [vmem:[%s5502_s3] sm:$0xff]  ;;  %v288_v53 = vld [vmem:[#allocation4 + $0x8] sm:$0xff]  ;;  %v290_v6 = vld [vmem:[#allocation4 + $0x18] sm:$0xff] }
  0x4f   :  { %3748 = vmatpush1.bf16.msra.mxu1 %v4789_v7  ;;  %v287_v52 = vld [vmem:[#allocation4] sm:$0xff]  ;;  %v326_v45 = vld [vmem:[#allocation7 + $0x48] sm:$0xff] }
  0x50   :  { %3720 = vmatpush1.bf16.msra.mxu0 %v4792_v10  ;;  %3750 = vmatprep.subr.bf16.mxu1 %v4795_v12  ;;  %v70_v24 = vld [vmem:[#allocation9] sm:$0xff] }
  0x51   :  { %3722 = vmatprep.subr.bf16.mxu0 %v4798_v15  ;;  %v321_v43 = vld [vmem:[#allocation7 + $0x20] sm:$0xff] }
  0x53   :  { %3752 = vmatpush1.bf16.msra.mxu1 %v4801_v25 }
  0x54   :  { %3724 = vmatpush1.bf16.msra.mxu0 %v4804_v27  ;;  %3754 = vmatprep.subr.bf16.mxu1 %v4807_v29 }
  0x55   :  { %3726 = vmatprep.subr.bf16.mxu0 %v4810_v34 }
  0x57   :  { %3756 = vmatpush1.bf16.msra.mxu1 %v4813_v40 }
  0x58   :  { %3728 = vmatpush1.bf16.msra.mxu0 %v4816_v41  ;;  %3758 = vmatprep.subr.bf16.mxu1 %v4819_v42 }
  0x59   :  { %3762 = vmatprep.subr.bf16.mxu0 %v4732_v4 }
  0x5b   :  { %210 = vmatmul.mubr.f32.vlgmr.msra.gmra.mrb[0].mxu0 %v68_v49  ;;  %3760 = vmatpush1.bf16.msra.mxu1 %v4823_v47 }
  0x5c   :  { %3764 = vmatpush1.bf16.msra.mxu0 %v4734_v8  ;;  %3794 = vmatprep.subr.bf16.mxu1 %v4742_v17 }
  0x5d   :  { %3766 = vmatprep.subr.bf16.mxu0 %v4736_v9  ;;  %461 = vmatprep.mubr.f32.mxu0 %v5507_v0 }
  0x5e   :  { %281 = vmatmul.mubr.f32.vlgmr.msra.gmra.mrb[0].mxu1 %v68_v49 }
  0x5f   :  { %3796 = vmatpush1.bf16.msra.mxu1 %v4744_v18  ;;  %532 = vmatprep.mubr.f32.mxu1 %v5507_v0 }
  0x60   :  { %3768 = vmatpush1.bf16.msra.mxu0 %v4740_v16  ;;  %3798 = vmatprep.subr.bf16.mxu1 %v4750_v26 }
  0x61   :  { %3770 = vmatprep.subr.bf16.mxu0 %v4747_v22 }
  0x63   :  { %3800 = vmatpush1.bf16.msra.mxu1 %v4753_v30 }
  0x64   :  { %3772 = vmatpush1.bf16.msra.mxu0 %v4756_v32  ;;  %3802 = vmatprep.subr.bf16.mxu1 %v4762_v39 }
  0x65   :  { %3774 = vmatprep.subr.bf16.mxu0 %v4760_v36 }
  0x67   :  { %3804 = vmatpush1.bf16.msra.mxu1 %v4765_v44 }
  0x68   :  { %3776 = vmatpush1.bf16.msra.mxu0 %v4768_v46  ;;  %3806 = vmatprep.subr.bf16.mxu1 %v4771_v48 }
  0x69   :  { %3778 = vmatprep.subr.bf16.mxu0 %v4774_v51 }
  0x6b   :  { %3808 = vmatpush1.bf16.msra.mxu1 %v4777_v57 }
  0x6c   :  { %3780 = vmatpush1.bf16.msra.mxu0 %v4780_v58  ;;  %3810 = vmatprep.subr.bf16.mxu1 %v4783_v60 }
  0x6d   :  { %3782 = vmatprep.subr.bf16.mxu0 %v4786_v63 }
  0x6f   :  { %3812 = vmatpush1.bf16.msra.mxu1 %v4789_v7 }
  0x70   :  { %3784 = vmatpush1.bf16.msra.mxu0 %v4792_v10  ;;  %3814 = vmatprep.subr.bf16.mxu1 %v4795_v12 }
  0x71   :  { %3786 = vmatprep.subr.bf16.mxu0 %v4798_v15 }
  0x73   :  { %3816 = vmatpush1.bf16.msra.mxu1 %v4801_v25 }
  0x74   :  { %3788 = vmatpush1.bf16.msra.mxu0 %v4804_v27  ;;  %3818 = vmatprep.subr.bf16.mxu1 %v4807_v29 }
  0x75   :  { %3790 = vmatprep.subr.bf16.mxu0 %v4810_v34 }
  0x77   :  { %3820 = vmatpush1.bf16.msra.mxu1 %v4813_v40 }
  0x78   :  { %3792 = vmatpush1.bf16.msra.mxu0 %v4816_v41  ;;  %3822 = vmatprep.subr.bf16.mxu1 %v4819_v42 }
  0x79   :  { %3825 = vmatprep.subr.bf16.mxu0 %v5509_v50 }
  0x7b   :  { %3824 = vmatpush1.bf16.msra.mxu1 %v4823_v47 }
  0x7c   :  { %3850 = vmatprep.subr.bf16.mxu1 %v4732_v4 }
 0x12e   :  { %v211_v54 = vpop.f32.mrb[0].mxu0 }
 0x12f   :  { %v291_v55 = vadd.f32 %v287_v52, %v211_v54  ;;  %v213_v56 = vpop.f32.mrb[1].mxu0 }
 0x130   :  { %v292_v61 = vadd.f32 %v288_v53, %v213_v56  ;;  %v4870_v53 = vpack.c.bf16 %v326_v45, %v321_v43  ;;  %v336_v56 = vld [vmem:[#allocation7 + $0x98] sm:$0xff] }
 0x131   :  { %v295_v62 = vmul.f32 0.5, %v291_v55  ;;  %v282_v1 = vpop.f32.mrb[0].mxu1  ;;  %v331_v55 = vld [vmem:[#allocation7 + $0x70] sm:$0xff] }
 0x132   :  { %v299_v2 = vmul.f32 0.5, %v292_v61  ;;  %v293_v3 = vadd.f32 %v289_v59, %v282_v1  ;;  %v284_v5 = vpop.f32.mrb[1].mxu1  ;;  %v4873_v59 = vpack.c.bf16 %v336_v56, %v331_v55  ;;  %v341_v61 = vld [vmem:[#allocation7 + $0xc0] sm:$0xff] }
 0x133   :  { %4417 = vtanh.f32 %v295_v62  ;;  %v294_v4 = vadd.f32 %v290_v6, %v284_v5  ;;  %v346_v62 = vld [vmem:[#allocation7 + $0xe8] sm:$0xff] }
 0x134   :  { %4419 = vtanh.f32 %v299_v2  ;;  %v4882_v1 = vpack.c.bf16 %v346_v62, %v341_v61  ;;  %v351_v2 = vld [vmem:[#allocation7 + $0x110] sm:$0xff] }
 0x135   :  { %4421 = vtanh.f32 %v293_v3  ;;  %v304_v11 = vmul.f32 0.5, %v294_v4  ;;  %v356_v3 = vld [vmem:[#allocation7 + $0x138] sm:$0xff] }
 0x136   :  { %v4888_v5 = vpack.c.bf16 %v356_v3, %v351_v2 }
 0x137   :  { %4423 = vtanh.f32 %v304_v11 }
 0x13d   :  { %v4418_v13 = vpop.eup %4417 }
 0x13e   :  { %v4420_v14 = vpop.eup %4419  ;;  %v297_v19 = vmul.f32 0.5, %v4418_v13 }
 0x13f   :  { %v4422_v20 = vpop.eup %4421  ;;  %v301_v21 = vmul.f32 0.5, %v4420_v14 }
 0x140   :  { %v298_v23 = vadd.f32 0.5, %v297_v19 }
 0x141   :  { %v302_v28 = vadd.f32 0.5, %v301_v21  ;;  %v4424_v37 = vpop.eup %4423 }
 0x142   :  { %v309_v31 = vmul.f32 %v4422_v20, %v298_v23  ;;  %v306_v38 = vmul.f32 0.5, %v4424_v37  ;;  %v4648_v20 = vmov 1966171168   ;;  %v644_v23 = vlaneseq  ;;  %v4944_v37 = vld [vmem:[%s5501_s2] ss:$0 sm:$0xff] }
 0x143   :  { %v308_v33 = vmul.f32 %v302_v28, %v70_v24  ;;  %v642_v21 = vunpack.c.l.s4 %v4648_v20  ;;  %v1123_v20 = vld [vmem:[#allocation7 + $0xd0] sm:$0xff] }
 0x144   :  { %v307_v49 = vadd.f32 0.5, %v306_v38 }
 0x145   :  { %v4867_v35 = vadd.f32 %v309_v31, %v308_v33  ;;  %v643_v28 = vunpack.c.0.s8 %v642_v21  ;;  %v645_v31 = vshrl.u32 %v644_v23, 7  ;;  %v1117_v23 = vld [vmem:[#allocation7 + $0xa0] sm:$0xff] }
 0x147   :  { %4425 = vtanh.f32 %v4867_v35  ;;  %v4946_v38 = vsub.s32 %v643_v28, %v645_v31  ;;  %v1120_v28 = vld [vmem:[#allocation7 + $0xb8] sm:$0xff] }
 0x151   :  { %v4426_v52 = vpop.eup %4425 }
 0x152   :  { %v312_v54 = vmul.f32 %v4426_v52, %v307_v49 }
 0x154   :  { %462 = vmatmul.mubr.f32.vlgmr.msra.gmra.mrb[2].mxu0 %v312_v54  ;;  %533 = vmatmul.mubr.f32.vlgmr.msra.gmra.mrb[2].mxu1 %v312_v54 }
 0x155   :  { %3827 = vmatpush3.bf16.msra.mxu0 %v4870_v53  ;;  %3449 = vmatprep.mubr.msk.f32.mxu0 %vm4647_vm0, %v5507_v0 }
 0x156   :  { %3828 = vmatprep.subr.bf16.mxu0 %v5509_v50  ;;  %3852 = vmatpush1.bf16.msra.mxu1 %v4734_v8  ;;  %v361_v8 = vld [vmem:[#allocation7 + $0x160] sm:$0xff] }
 0x157   :  { %3854 = vmatprep.subr.bf16.mxu1 %v4736_v9  ;;  %851 = vmatprep.mubr.f32.mxu1 %v5507_v0  ;;  %v366_v9 = vld [vmem:[#allocation7 + $0x188] sm:$0xff] }
 0x158   :  { %v4894_v6 = vpack.c.bf16 %v366_v9, %v361_v8 }
 0x159   :  { %3830 = vmatpush3.bf16.msra.mxu0 %v4873_v59 }
 0x15a   :  { %3831 = vmatprep.subr.bf16.mxu0 %v5509_v50  ;;  %3856 = vmatpush1.bf16.msra.mxu1 %v4740_v16  ;;  %v371_v16 = vld [vmem:[#allocation7 + $0x1b0] sm:$0xff] }
 0x15b   :  { %3858 = vmatprep.subr.bf16.mxu1 %v4747_v22  ;;  %v376_v22 = vld [vmem:[#allocation7 + $0x1d8] sm:$0xff] }
 0x15c   :  { %v4900_v4 = vpack.c.bf16 %v376_v22, %v371_v16 }
 0x15d   :  { %3833 = vmatpush3.bf16.msra.mxu0 %v4882_v1 }
 0x15e   :  { %3834 = vmatprep.subr.bf16.mxu0 %v5509_v50  ;;  %3860 = vmatpush1.bf16.msra.mxu1 %v4756_v32  ;;  %v381_v32 = vld [vmem:[#allocation7 + $0x200] sm:$0xff] }
 0x15f   :  { %3862 = vmatprep.subr.bf16.mxu1 %v4760_v36  ;;  %v386_v36 = vld [vmem:[#allocation7 + $0x228] sm:$0xff] }
 0x160   :  { %v4906_v11 = vpack.c.bf16 %v386_v36, %v381_v32 }
 0x161   :  { %3836 = vmatpush3.bf16.msra.mxu0 %v4888_v5 }
 0x162   :  { %3837 = vmatprep.subr.bf16.mxu0 %v5509_v50  ;;  %3864 = vmatpush1.bf16.msra.mxu1 %v4768_v46  ;;  %v391_v46 = vld [vmem:[#allocation7 + $0x250] sm:$0xff] }
 0x163   :  { %3866 = vmatprep.subr.bf16.mxu1 %v4774_v51  ;;  %v396_v51 = vld [vmem:[#allocation7 + $0x278] sm:$0xff] }
 0x164   :  { %v4912_v13 = vpack.c.bf16 %v396_v51, %v391_v46  ;;  %v1098_v51 = vld [vmem:[#allocation7 + $0x8] sm:$0xff] }
 0x165   :  { %3839 = vmatpush3.bf16.msra.mxu0 %v4894_v6 }
 0x166   :  { %3840 = vmatprep.subr.bf16.mxu0 %v5509_v50  ;;  %3868 = vmatpush1.bf16.msra.mxu1 %v4780_v58 }
 0x167   :  { %3870 = vmatprep.subr.bf16.mxu1 %v4786_v63 }
 0x169   :  { %3842 = vmatpush3.bf16.msra.mxu0 %v4900_v4 }
 0x16a   :  { %3843 = vmatprep.subr.bf16.mxu0 %v5509_v50  ;;  %3872 = vmatpush1.bf16.msra.mxu1 %v4792_v10  ;;  %v613_v10 = vld [vmem:[#allocation4 + $0x38] sm:$0xff] }
 0x16b   :  { %3874 = vmatprep.subr.bf16.mxu1 %v4798_v15 }
 0x16d   :  { %3845 = vmatpush3.bf16.msra.mxu0 %v4906_v11 }
 0x16e   :  { %3846 = vmatprep.subr.bf16.mxu0 %v5509_v50  ;;  %3876 = vmatpush1.bf16.msra.mxu1 %v4804_v27 }
 0x16f   :  { %3878 = vmatprep.subr.bf16.mxu1 %v4810_v34 }
 0x171   :  { %3848 = vmatpush3.bf16.msra.mxu0 %v4912_v13 }
 0x172   :  { %3882 = vmatprep.subr.bf16.mxu0 %v4742_v17  ;;  %3880 = vmatpush1.bf16.msra.mxu1 %v4816_v41  ;;  %v610_v17 = vld [vmem:[#allocation4 + $0x20] sm:$0xff] }
 0x173   :  { %3913 = vmatprep.subr.bf16.mxu1 %v5509_v50 }
 0x174   :  { %3450 = vmatmul.mubr.f32.vlgmr.msra.gmra.mrb[4].mxu0 %v312_v54 }
 0x175   :  { %3884 = vmatpush1.bf16.msra.mxu0 %v4744_v18  ;;  %922 = vmatprep.mubr.f32.mxu0 %v5507_v0  ;;  %v611_v18 = vld [vmem:[#allocation4 + $0x28] sm:$0xff] }
 0x176   :  { %3886 = vmatprep.subr.bf16.mxu0 %v4750_v26 }
 0x179   :  { %3888 = vmatpush1.bf16.msra.mxu0 %v4753_v30 }
 0x17a   :  { %3890 = vmatprep.subr.bf16.mxu0 %v4762_v39 }
 0x17d   :  { %3892 = vmatpush1.bf16.msra.mxu0 %v4765_v44 }
 0x17e   :  { %3894 = vmatprep.subr.bf16.mxu0 %v4771_v48 }
 0x181   :  { %3896 = vmatpush1.bf16.msra.mxu0 %v4777_v57  ;;  %v612_v57 = vld [vmem:[#allocation4 + $0x30] sm:$0xff] }
 0x182   :  { %3898 = vmatprep.subr.bf16.mxu0 %v4783_v60 }
 0x185   :  { %3900 = vmatpush1.bf16.msra.mxu0 %v4789_v7 }
 0x186   :  { %3902 = vmatprep.subr.bf16.mxu0 %v4795_v12 }
 0x189   :  { %3904 = vmatpush1.bf16.msra.mxu0 %v4801_v25 }
 0x18a   :  { %3906 = vmatprep.subr.bf16.mxu0 %v4807_v29 }
 0x18d   :  { %3908 = vmatpush1.bf16.msra.mxu0 %v4813_v40 }
 0x18e   :  { %3910 = vmatprep.subr.bf16.mxu0 %v4819_v42 }
 0x191   :  { %3912 = vmatpush1.bf16.msra.mxu0 %v4823_v47 }
 0x227   :  { %v463_v26 = vpop.f32.mrb[2].mxu0  ;;  %v534_v30 = vpop.f32.mrb[2].mxu1 }
 0x228   :  { %v614_v39 = vadd.f32 %v610_v17, %v463_v26  ;;  %v465_v44 = vpop.f32.mrb[3].mxu0  ;;  %v536_v48 = vpop.f32.mrb[3].mxu1  ;;  %v616_v7 = vadd.f32 %v612_v57, %v534_v30  ;;  %v1103_v17 = vld [vmem:[#allocation7 + $0x30] sm:$0xff]  ;;  %v1097_v26 = vld [vmem:[#allocation7] sm:$0xff]  ;;  %v1102_v30 = vld [vmem:[#allocation7 + $0x28] sm:$0xff] }
 0x229   :  { %v615_v58 = vadd.f32 %v611_v18, %v465_v44  ;;  %v617_v12 = vadd.f32 %v613_v10, %v536_v48  ;;  %v4974_v18 = vpack.c.bf16 %v1103_v17, %v1098_v51  ;;  %v4976_v44 = vpack.c.bf16 %v1102_v30, %v1097_v26  ;;  %v1105_v48 = vld [vmem:[#allocation7 + $0x40] sm:$0xff]  ;;  %v1099_v57 = vld [vmem:[#allocation7 + $0x10] sm:$0xff]  ;;  %v1142_v17 = vld [vmem:[#allocation7 + $0x168] sm:$0xff] }
 0x22a   :  { %v618_v60 = vmul.f32 0.5, %v614_v39  ;;  %v1100_v39 = vld [vmem:[#allocation7 + $0x18] sm:$0xff]  ;;  %v1113_v10 = vld [vmem:[#allocation7 + $0x80] sm:$0xff] }
 0x22b   :  { %v622_v63 = vmul.f32 0.5, %v615_v58  ;;  %v627_v15 = vmul.f32 0.5, %v617_v12  ;;  %v1104_v58 = vld [vmem:[#allocation7 + $0x38] sm:$0xff]  ;;  %3938 = vmatprep.subr.bf16.mxu0 %v4974_v18  ;;  %v1137_v51 = vld [vmem:[#allocation7 + $0x140] sm:$0xff] }
 0x22c   :  { %4427 = vtanh.f32 %v618_v60  ;;  %v4979_v60 = vpack.c.bf16 %v1105_v48, %v1100_v39  ;;  %v1140_v26 = vld [vmem:[#allocation7 + $0x158] sm:$0xff]  ;;  %v5024_v30 = vpack.c.bf16 %v1142_v17, %v1137_v51  ;;  %v1145_v39 = vld [vmem:[#allocation7 + $0x180] sm:$0xff]  ;;  %v1139_v48 = vld [vmem:[#allocation7 + $0x150] sm:$0xff] }
 0x22d   :  { %4429 = vtanh.f32 %v622_v63  ;;  %v4981_v63 = vpack.c.bf16 %v1104_v58, %v1099_v57  ;;  %v1144_v57 = vld [vmem:[#allocation7 + $0x178] sm:$0xff]  ;;  %v5027_v58 = vpack.c.bf16 %v1145_v39, %v1140_v26  ;;  %v1173_v51 = vld [vmem:[#allocation7 + $0x260] sm:$0xff]  ;;  %v1167_v26 = vld [vmem:[#allocation7 + $0x230] sm:$0xff] }
 0x22e   :  { %4431 = vtanh.f32 %v616_v7  ;;  %v1108_v7 = vld [vmem:[#allocation7 + $0x58] sm:$0xff] }
 0x22f   :  { %4433 = vtanh.f32 %v627_v15  ;;  %v4985_v12 = vpack.c.bf16 %v1113_v10, %v1108_v7  ;;  %v1107_v15 = vld [vmem:[#allocation7 + $0x50] sm:$0xff]  ;;  %v5029_v7 = vpack.c.bf16 %v1144_v57, %v1139_v48  ;;  %v1148_v10 = vld [vmem:[#allocation7 + $0x198] sm:$0xff]  ;;  %v1170_v48 = vld [vmem:[#allocation7 + $0x248] sm:$0xff] }
 0x230   :  { %v1172_v39 = vld [vmem:[#allocation7 + $0x258] sm:$0xff] }
 0x231   :  { %v5060_v57 = vpack.c.bf16 %v1172_v39, %v1167_v26 }
 0x236   :  { %v4428_v25 = vpop.eup %4427 }
 0x237   :  { %v4430_v27 = vpop.eup %4429  ;;  %v620_v29 = vmul.f32 0.5, %v4428_v25  ;;  %v1112_v25 = vld [vmem:[#allocation7 + $0x78] sm:$0xff] }
 0x238   :  { %v624_v34 = vmul.f32 0.5, %v4430_v27  ;;  %v4432_v41 = vpop.eup %4431  ;;  %v1110_v27 = vld [vmem:[#allocation7 + $0x68] sm:$0xff] }
 0x239   :  { %v621_v40 = vadd.f32 0.5, %v620_v29  ;;  %v4434_v24 = vpop.eup %4433  ;;  %v4988_v29 = vpack.c.bf16 %v1112_v25, %v1107_v15  ;;  %v1153_v15 = vld [vmem:[#allocation7 + $0x1c0] sm:$0xff] }
 0x23a   :  { %v625_v42 = vadd.f32 0.5, %v624_v34  ;;  %v629_v33 = vmul.f32 0.5, %v4434_v24  ;;  %v1115_v34 = vld [vmem:[#allocation7 + $0x90] sm:$0xff]  ;;  %v1122_v24 = vld [vmem:[#allocation7 + $0xc8] sm:$0xff]  ;;  %v5033_v25 = vpack.c.bf16 %v1153_v15, %v1148_v10  ;;  %v1169_v15 = vld [vmem:[#allocation7 + $0x240] sm:$0xff] }
 0x23b   :  { %v632_v47 = vmul.f32 %v4432_v41, %v621_v40  ;;  %v1109_v40 = vld [vmem:[#allocation7 + $0x60] sm:$0xff]  ;;  %v1114_v41 = vld [vmem:[#allocation7 + $0x88] sm:$0xff]  ;;  %v5000_v31 = vpack.c.bf16 %v1122_v24, %v1117_v23  ;;  %v1175_v10 = vld [vmem:[#allocation7 + $0x270] sm:$0xff] }
 0x23c   :  { %v631_v14 = vmul.f32 %v625_v42, %v4867_v35  ;;  %v630_v49 = vadd.f32 0.5, %v629_v33  ;;  %v4991_v42 = vpack.c.bf16 %v1115_v34, %v1110_v27  ;;  %v1125_v33 = vld [vmem:[#allocation7 + $0xe0] sm:$0xff]  ;;  %v1147_v27 = vld [vmem:[#allocation7 + $0x190] sm:$0xff]  ;;  %v1152_v34 = vld [vmem:[#allocation7 + $0x1b8] sm:$0xff] }
 0x23d   :  { %v1154_v23 = vld [vmem:[#allocation7 + $0x1c8] sm:$0xff] }
 0x23e   :  { %v4938_v19 = vadd.f32 %v632_v47, %v631_v14  ;;  %v4993_v47 = vpack.c.bf16 %v1114_v41, %v1109_v40  ;;  %v1118_v14 = vld [vmem:[#allocation7 + $0xa8] sm:$0xff]  ;;  %v5036_v41 = vpack.c.bf16 %v1152_v34, %v1147_v27  ;;  %v5063_v34 = vpack.c.bf16 %v1175_v10, %v1170_v48 }
 0x23f   :  { %v4997_v21 = vpack.c.bf16 %v1123_v20, %v1118_v14  ;;  %v1150_v40 = vld [vmem:[#allocation7 + $0x1a8] sm:$0xff]  ;;  %v1155_v14 = vld [vmem:[#allocation7 + $0x1d0] sm:$0xff]  ;;  %v1149_v20 = vld [vmem:[#allocation7 + $0x1a0] sm:$0xff] }
 0x240   :  { %4435 = vtanh.f32 %v4938_v19  ;;  %v5039_v24 = vpack.c.bf16 %v1155_v14, %v1150_v40  ;;  %v1174_v27 = vld [vmem:[#allocation7 + $0x268] sm:$0xff]  ;;  %v1000_v14 = vld [vmem:[#allocation4 + $0x40] sm:$0xff] }
 0x241   :  { %v5065_v40 = vpack.c.bf16 %v1174_v27, %v1169_v15 }
 0x247   :  { %v605_v43 = vpop.f32.mrb[4].mxu0 }
 0x248   :  { %v638_v35 = vadd.f32 %v4944_v37, %v605_v43  ;;  %v3451_v45 = vpop.f32.mrb[5].mxu0  ;;  %v1119_v43 = vld [vmem:[#allocation7 + $0xb0] sm:$0xff] }
 0x249   :  { %v5003_v45 = vpack.c.bf16 %v1125_v33, %v1120_v28  ;;  %v5041_v28 = vpack.c.bf16 %v1154_v23, %v1149_v20  ;;  %v1158_v33 = vld [vmem:[#allocation7 + $0x1e8] sm:$0xff] }
 0x24a   :  { %v4436_v52 = vpop.eup %4435  ;;  %v640_v54 = vcombine.high %v638_v35, %v638_v35  ;;  %v647_v55 = vrot.slane %v638_v35, %v4946_v38  ;;  %v1124_v35 = vld [vmem:[#allocation7 + $0xd8] sm:$0xff]  ;;  %v1001_v20 = vld [vmem:[#allocation4 + $0x48] sm:$0xff] }
 0x24b   :  { %v635_v56 = vmul.f32 %v4436_v52, %v630_v49  ;;  %v5005_v49 = vpack.c.bf16 %v1124_v35, %v1119_v43  ;;  %v1128_v52 = vld [vmem:[#allocation7 + $0xf8] sm:$0xff]  ;;  %v1163_v43 = vld [vmem:[#allocation7 + $0x210] sm:$0xff] }
 0x24c   :  { %v654_v61 = vrot.slane %v640_v54, %v4946_v38  ;;  %v655_v62 = vcombine.high %v647_v55, %v647_v55  ;;  %v663_v2 = vrot.slane %v647_v55, %v4946_v38  ;;  %3249 = vst.sshfl [vmem:[#allocation10] sm:$0x1 pattern:$0x73625140] %v647_v55  ;;  %v1133_v54 = vld [vmem:[#allocation7 + $0x120] sm:$0xff]  ;;  %v5045_v35 = vpack.c.bf16 %v1163_v43, %v1158_v33 }
 0x24d   :  { %852 = vmatmul.mubr.f32.vlgmr.msra.gmra.mrb[4].mxu1 %v635_v56  ;;  %923 = vmatmul.mubr.f32.vlgmr.msra.gmra.mrb[6].mxu0 %v635_v56  ;;  %v5009_v55 = vpack.c.bf16 %v1133_v54, %v1128_v52  ;;  %v1157_v52 = vld [vmem:[#allocation7 + $0x1e0] sm:$0xff]  ;;  %v1162_v54 = vld [vmem:[#allocation7 + $0x208] sm:$0xff] }
 0x24e   :  { %v656_v3 = vcombine.high %v654_v61, %v654_v61  ;;  %v670_v8 = vrot.slane %v654_v61, %v4946_v38  ;;  %v677_v9 = vrot.slane %v655_v62, %v4946_v38  ;;  %v685_v16 = vcombine.high %v663_v2, %v663_v2  ;;  %3250 = vst.sshfl [vmem:[#allocation10 + $0x8] sm:$0x1 pattern:$0x73625140] %v655_v62  ;;  %v1130_v62 = vld [vmem:[#allocation7 + $0x108] sm:$0xff] }
 0x24f   :  { %3251 = vst.sshfl [vmem:[#allocation10 + $0x20] sm:$0x1 pattern:$0x73625140] %v654_v61  ;;  %3915 = vmatpush3.bf16.msra.mxu1 %v4870_v53  ;;  %3484 = vmatprep.mubr.msk.f32.mxu1 %vm4647_vm0, %v5507_v0  ;;  %v1132_v61 = vld [vmem:[#allocation7 + $0x118] sm:$0xff] }
 0x250   :  { %3916 = vmatprep.subr.bf16.mxu1 %v5509_v50  ;;  %v684_v22 = vrot.slane %v656_v3, %v4946_v38  ;;  %v686_v32 = vcombine.high %v670_v8, %v670_v8  ;;  %v687_v36 = vcombine.high %v677_v9, %v677_v9  ;;  %699 = vst [vmem:[#allocation10 + $0x10] sm:$0x1] %v685_v16  ;;  %3252 = vst.sshfl [vmem:[#allocation10 + $0x28] sm:$0x1 pattern:$0x73625140] %v656_v3 }
 0x251   :  { %1241 = vmatprep.mubr.f32.mxu0 %v5507_v0  ;;  %3940 = vmatpush1.bf16.msra.mxu0 %v4976_v44  ;;  %v1135_v3 = vld [vmem:[#allocation7 + $0x130] sm:$0xff]  ;;  %v1129_v8 = vld [vmem:[#allocation7 + $0x100] sm:$0xff]  ;;  %v1134_v9 = vld [vmem:[#allocation7 + $0x128] sm:$0xff] }
 0x252   :  { %v688_v46 = vcombine.high %v684_v22, %v684_v22  ;;  %700 = vst [vmem:[#allocation10 + $0x18] sm:$0x1] %v687_v36  ;;  %703 = vst [vmem:[#allocation10 + $0x30] sm:$0x1] %v686_v32  ;;  %3942 = vmatprep.subr.bf16.mxu0 %v4985_v12  ;;  %v5015_v16 = vpack.c.bf16 %v1135_v3, %v1130_v62  ;;  %v5017_v22 = vpack.c.bf16 %v1134_v9, %v1129_v8  ;;  %v1138_v32 = vld [vmem:[#allocation7 + $0x148] sm:$0xff]  ;;  %v1143_v36 = vld [vmem:[#allocation7 + $0x170] sm:$0xff] }
 0x253   :  { %3918 = vmatpush3.bf16.msra.mxu1 %v4873_v59  ;;  %v1165_v62 = vld [vmem:[#allocation7 + $0x220] sm:$0xff]  ;;  %v1159_v3 = vld [vmem:[#allocation7 + $0x1f0] sm:$0xff]  ;;  %v1164_v8 = vld [vmem:[#allocation7 + $0x218] sm:$0xff] }
 0x254   :  { %3919 = vmatprep.subr.bf16.mxu1 %v5509_v50  ;;  %704 = vst [vmem:[#allocation10 + $0x38] sm:$0x1] %v688_v46  ;;  %v5021_v46 = vpack.c.bf16 %v1143_v36, %v1138_v32  ;;  %v5053_v32 = vpack.c.bf16 %v1164_v8, %v1159_v3  ;;  %v1168_v36 = vld [vmem:[#allocation7 + $0x238] sm:$0xff] }
 0x255   :  { %3944 = vmatpush1.bf16.msra.mxu0 %v4988_v29  ;;  %v5057_v17 = vpack.c.bf16 %v1173_v51, %v1168_v36  ;;  %v1003_v51 = vld [vmem:[#allocation4 + $0x58] sm:$0xff] }
 0x256   :  { %3946 = vmatprep.subr.bf16.mxu0 %v4997_v21 }
 0x257   :  { %3921 = vmatpush3.bf16.msra.mxu1 %v4882_v1 }
 0x258   :  { %3922 = vmatprep.subr.bf16.mxu1 %v5509_v50 }
 0x259   :  { %3948 = vmatpush1.bf16.msra.mxu0 %v5000_v31 }
 0x25a   :  { %3950 = vmatprep.subr.bf16.mxu0 %v5009_v55 }
 0x25b   :  { %3924 = vmatpush3.bf16.msra.mxu1 %v4888_v5 }
 0x25c   :  { %3925 = vmatprep.subr.bf16.mxu1 %v5509_v50 }
 0x25f   :  { %3927 = vmatpush3.bf16.msra.mxu1 %v4894_v6 }
 0x260   :  { %3928 = vmatprep.subr.bf16.mxu1 %v5509_v50 }
 0x263   :  { %3930 = vmatpush3.bf16.msra.mxu1 %v4900_v4 }
 0x264   :  { %3931 = vmatprep.subr.bf16.mxu1 %v5509_v50 }
 0x267   :  { %3933 = vmatpush3.bf16.msra.mxu1 %v4906_v11 }
 0x268   :  { %3934 = vmatprep.subr.bf16.mxu1 %v5509_v50 }
 0x26b   :  { %3936 = vmatpush3.bf16.msra.mxu1 %v4912_v13 }
 0x26c   :  { %3970 = vmatprep.subr.bf16.mxu1 %v4979_v60 }
 0x26e   :  { %3485 = vmatmul.mubr.f32.vlgmr.msra.gmra.mrb[6].mxu1 %v635_v56  ;;  %v1127_v56 = vld [vmem:[#allocation7 + $0xf0] sm:$0xff] }
 0x26f   :  { %1312 = vmatprep.mubr.f32.mxu1 %v5507_v0  ;;  %3972 = vmatpush1.bf16.msra.mxu1 %v4981_v63  ;;  %v5012_v2 = vpack.c.bf16 %v1132_v61, %v1127_v56  ;;  %v1160_v56 = vld [vmem:[#allocation7 + $0x1f8] sm:$0xff]  ;;  %v5048_v61 = vpack.c.bf16 %v1162_v54, %v1157_v52 }
 0x270   :  { %3974 = vmatprep.subr.bf16.mxu1 %v4991_v42  ;;  %v5051_v9 = vpack.c.bf16 %v1165_v62, %v1160_v56  ;;  %v1002_v56 = vld [vmem:[#allocation4 + $0x50] sm:$0xff] }
 0x271   :  { %3952 = vmatpush1.bf16.msra.mxu0 %v5012_v2 }
 0x272   :  { %3954 = vmatprep.subr.bf16.mxu0 %v5021_v46 }
 0x273   :  { %3976 = vmatpush1.bf16.msra.mxu1 %v4993_v47 }
 0x274   :  { %3978 = vmatprep.subr.bf16.mxu1 %v5003_v45 }
 0x275   :  { %3956 = vmatpush1.bf16.msra.mxu0 %v5024_v30 }
 0x276   :  { %3958 = vmatprep.subr.bf16.mxu0 %v5033_v25 }
 0x277   :  { %3980 = vmatpush1.bf16.msra.mxu1 %v5005_v49 }
 0x278   :  { %3982 = vmatprep.subr.bf16.mxu1 %v5015_v16 }
 0x279   :  { %3960 = vmatpush1.bf16.msra.mxu0 %v5036_v41 }
 0x27a   :  { %3962 = vmatprep.subr.bf16.mxu0 %v5045_v35 }
 0x27b   :  { %3984 = vmatpush1.bf16.msra.mxu1 %v5017_v22 }
 0x27c   :  { %3986 = vmatprep.subr.bf16.mxu1 %v5027_v58 }
 0x27d   :  { %3964 = vmatpush1.bf16.msra.mxu0 %v5048_v61 }
 0x27e   :  { %3966 = vmatprep.subr.bf16.mxu0 %v5057_v17 }
 0x27f   :  { %3988 = vmatpush1.bf16.msra.mxu1 %v5029_v7 }
 0x280   :  { %3990 = vmatprep.subr.bf16.mxu1 %v5039_v24 }
 0x281   :  { %3968 = vmatpush1.bf16.msra.mxu0 %v5060_v57 }
 0x282   :  { %4001 = vmatprep.subr.bf16.mxu0 %v5509_v50 }
 0x283   :  { %3992 = vmatpush1.bf16.msra.mxu1 %v5041_v28 }
 0x284   :  { %3994 = vmatprep.subr.bf16.mxu1 %v5051_v9 }
 0x287   :  { %3996 = vmatpush1.bf16.msra.mxu1 %v5053_v32 }
 0x288   :  { %3998 = vmatprep.subr.bf16.mxu1 %v5063_v34 }
 0x28b   :  { %4000 = vmatpush1.bf16.msra.mxu1 %v5065_v40 }
 0x28c   :  { %4026 = vmatprep.subr.bf16.mxu1 %v4974_v18 }
 0x320   :  { %v853_v23 = vpop.f32.mrb[4].mxu1  ;;  %v924_v33 = vpop.f32.mrb[6].mxu0 }
 0x321   :  { %v1004_v43 = vadd.f32 %v1000_v14, %v853_v23  ;;  %v855_v52 = vpop.f32.mrb[5].mxu1  ;;  %v926_v54 = vpop.f32.mrb[7].mxu0  ;;  %v1006_v36 = vadd.f32 %v1002_v56, %v924_v33 }
 0x322   :  { %v1005_v62 = vadd.f32 %v1001_v20, %v855_v52  ;;  %v1007_v26 = vadd.f32 %v1003_v51, %v926_v54 }
 0x323   :  { %v1008_v3 = vmul.f32 0.5, %v1004_v43 }
 0x324   :  { %v1012_v8 = vmul.f32 0.5, %v1005_v62  ;;  %v1017_v39 = vmul.f32 0.5, %v1007_v26 }
 0x325   :  { %4437 = vtanh.f32 %v1008_v3 }
 0x326   :  { %4439 = vtanh.f32 %v1012_v8 }
 0x327   :  { %4441 = vtanh.f32 %v1006_v36 }
 0x328   :  { %4443 = vtanh.f32 %v1017_v39 }
 0x32f   :  { %v4438_v48 = vpop.eup %4437 }
 0x330   :  { %v4440_v10 = vpop.eup %4439  ;;  %v1010_v15 = vmul.f32 0.5, %v4438_v48 }
 0x331   :  { %v1014_v27 = vmul.f32 0.5, %v4440_v10  ;;  %v4442_v14 = vpop.eup %4441 }
 0x332   :  { %v1011_v0 = vadd.f32 0.5, %v1010_v15  ;;  %v4444_v33 = vpop.eup %4443 }
 0x333   :  { %v1015_v23 = vadd.f32 0.5, %v1014_v27  ;;  %v1019_v52 = vmul.f32 0.5, %v4444_v33  ;;  %v5511_v27 = vmov 0.0|0.0  }
 0x334   :  { %v1022_v50 = vmul.f32 %v4442_v14, %v1011_v0  ;;  %v5512_v14 = vmov 0.0  }
 0x335   :  { %v1021_v20 = vmul.f32 %v1015_v23, %v4938_v19  ;;  %v1020_v3 = vadd.f32 0.5, %v1019_v52 }
 0x337   :  { %v5073_v43 = vadd.f32 %v1022_v50, %v1021_v20 }
 0x339   :  { %4445 = vtanh.f32 %v5073_v43 }
 0x341   :  { %v995_v56 = vpop.f32.mrb[6].mxu1 }
 0x342   :  { %v1028_v54 = vadd.f32 %v4944_v37, %v995_v56  ;;  %v3486_v62 = vpop.f32.mrb[7].mxu1 }
 0x343   :  { %v4446_v8 = vpop.eup %4445 }
 0x344   :  { %v1030_v36 = vcombine.high %v1028_v54, %v1028_v54  ;;  %v1037_v51 = vrot.slane %v1028_v54, %v4946_v38  ;;  %v1025_v26 = vmul.f32 %v4446_v8, %v1020_v3  ;;  %v1393_v8 = vld [vmem:[#allocation4 + $0x78] sm:$0xff] }
 0x346   :  { %v1044_v0 = vrot.slane %v1030_v36, %v4946_v38  ;;  %v1045_v39 = vcombine.high %v1037_v51, %v1037_v51  ;;  %v1053_v50 = vrot.slane %v1037_v51, %v4946_v38  ;;  %3253 = vst.sshfl [vmem:[#allocation10 + $0x1] sm:$0x1 pattern:$0x73625140] %v1037_v51  ;;  %1242 = vmatmul.mubr.f32.vlgmr.msra.gmra.mrb[8].mxu0 %v1025_v26 }
 0x347   :  { %1313 = vmatmul.mubr.f32.vlgmr.msra.gmra.mrb[8].mxu1 %v1025_v26  ;;  %4003 = vmatpush3.bf16.msra.mxu0 %v4870_v53  ;;  %v1390_v53 = vld [vmem:[#allocation4 + $0x60] sm:$0xff] }
 0x348   :  { %v1046_v19 = vcombine.high %v1044_v0, %v1044_v0  ;;  %v1060_v48 = vrot.slane %v1044_v0, %v4946_v38  ;;  %v1067_v10 = vrot.slane %v1045_v39, %v4946_v38  ;;  %v1075_v15 = vcombine.high %v1053_v50, %v1053_v50  ;;  %3254 = vst.sshfl [vmem:[#allocation10 + $0x9] sm:$0x1 pattern:$0x73625140] %v1045_v39 }
 0x349   :  { %3255 = vst.sshfl [vmem:[#allocation10 + $0x21] sm:$0x1 pattern:$0x73625140] %v1044_v0  ;;  %4004 = vmatprep.subr.bf16.mxu0 %v5511_v27  ;;  %3519 = vmatprep.mubr.msk.f32.mxu0 %vm4647_vm0, %v5512_v14 }
 0x34a   :  { %v1074_v23 = vrot.slane %v1046_v19, %v4946_v38  ;;  %v1076_v20 = vcombine.high %v1060_v48, %v1060_v48  ;;  %v1077_v33 = vcombine.high %v1067_v10, %v1067_v10  ;;  %1089 = vst [vmem:[#allocation10 + $0x11] sm:$0x1] %v1075_v15  ;;  %3256 = vst.sshfl [vmem:[#allocation10 + $0x29] sm:$0x1 pattern:$0x73625140] %v1046_v19  ;;  %4028 = vmatpush1.bf16.msra.mxu1 %v4976_v44 }
 0x34b   :  { %1631 = vmatprep.mubr.f32.mxu1 %v5512_v14  ;;  %4030 = vmatprep.subr.bf16.mxu1 %v4985_v12 }
 0x34c   :  { %v1078_v52 = vcombine.high %v1074_v23, %v1074_v23  ;;  %1090 = vst [vmem:[#allocation10 + $0x19] sm:$0x1] %v1077_v33  ;;  %1093 = vst [vmem:[#allocation10 + $0x31] sm:$0x1] %v1076_v20  ;;  %4006 = vmatpush3.bf16.msra.mxu0 %v4873_v59  ;;  %v1391_v59 = vld [vmem:[#allocation4 + $0x68] sm:$0xff] }
 0x34d   :  { %4007 = vmatprep.subr.bf16.mxu0 %v5511_v27 }
 0x34e   :  { %1094 = vst [vmem:[#allocation10 + $0x39] sm:$0x1] %v1078_v52  ;;  %4032 = vmatpush1.bf16.msra.mxu1 %v4988_v29 }
 0x34f   :  { %4034 = vmatprep.subr.bf16.mxu1 %v4997_v21 }
 0x350   :  { %4009 = vmatpush3.bf16.msra.mxu0 %v4882_v1 }
 0x351   :  { %4010 = vmatprep.subr.bf16.mxu0 %v5511_v27 }
 0x352   :  { %4036 = vmatpush1.bf16.msra.mxu1 %v5000_v31 }
 0x353   :  { %4038 = vmatprep.subr.bf16.mxu1 %v5009_v55 }
 0x354   :  { %4012 = vmatpush3.bf16.msra.mxu0 %v4888_v5 }
 0x355   :  { %4013 = vmatprep.subr.bf16.mxu0 %v5511_v27 }
 0x356   :  { %4040 = vmatpush1.bf16.msra.mxu1 %v5012_v2 }
 0x357   :  { %4042 = vmatprep.subr.bf16.mxu1 %v5021_v46 }
 0x358   :  { %4015 = vmatpush3.bf16.msra.mxu0 %v4894_v6 }
 0x359   :  { %4016 = vmatprep.subr.bf16.mxu0 %v5511_v27 }
 0x35a   :  { %4044 = vmatpush1.bf16.msra.mxu1 %v5024_v30 }
 0x35b   :  { %4046 = vmatprep.subr.bf16.mxu1 %v5033_v25 }
 0x35c   :  { %4018 = vmatpush3.bf16.msra.mxu0 %v4900_v4 }
 0x35d   :  { %4019 = vmatprep.subr.bf16.mxu0 %v5511_v27 }
 0x35e   :  { %4048 = vmatpush1.bf16.msra.mxu1 %v5036_v41 }
 0x35f   :  { %4050 = vmatprep.subr.bf16.mxu1 %v5045_v35 }
 0x360   :  { %4021 = vmatpush3.bf16.msra.mxu0 %v4906_v11 }
 0x361   :  { %4022 = vmatprep.subr.bf16.mxu0 %v5511_v27 }
 0x362   :  { %4052 = vmatpush1.bf16.msra.mxu1 %v5048_v61 }
 0x363   :  { %4054 = vmatprep.subr.bf16.mxu1 %v5057_v17 }
 0x364   :  { %4024 = vmatpush3.bf16.msra.mxu0 %v4912_v13  ;;  %v1392_v13 = vld [vmem:[#allocation4 + $0x70] sm:$0xff] }
 0x365   :  { %4058 = vmatprep.subr.bf16.mxu0 %v4979_v60 }
 0x366   :  { %4056 = vmatpush1.bf16.msra.mxu1 %v5060_v57 }
 0x367   :  { %3520 = vmatmul.mubr.f32.vlgmr.msra.gmra.mrb[10].mxu0 %v1025_v26  ;;  %4089 = vmatprep.subr.bf16.mxu1 %v5511_v27 }
 0x368   :  { %4060 = vmatpush1.bf16.msra.mxu0 %v4981_v63  ;;  %1702 = vmatprep.mubr.f32.mxu0 %v5512_v14 }
 0x369   :  { %4062 = vmatprep.subr.bf16.mxu0 %v4991_v42 }
 0x36c   :  { %4064 = vmatpush1.bf16.msra.mxu0 %v4993_v47 }
 0x36d   :  { %4066 = vmatprep.subr.bf16.mxu0 %v5003_v45 }
 0x370   :  { %4068 = vmatpush1.bf16.msra.mxu0 %v5005_v49 }
 0x371   :  { %4070 = vmatprep.subr.bf16.mxu0 %v5015_v16 }
 0x374   :  { %4072 = vmatpush1.bf16.msra.mxu0 %v5017_v22 }
 0x375   :  { %4074 = vmatprep.subr.bf16.mxu0 %v5027_v58 }
 0x378   :  { %4076 = vmatpush1.bf16.msra.mxu0 %v5029_v7 }
 0x379   :  { %4078 = vmatprep.subr.bf16.mxu0 %v5039_v24 }
 0x37c   :  { %4080 = vmatpush1.bf16.msra.mxu0 %v5041_v28 }
 0x37d   :  { %4082 = vmatprep.subr.bf16.mxu0 %v5051_v9 }
 0x380   :  { %4084 = vmatpush1.bf16.msra.mxu0 %v5053_v32 }
 0x381   :  { %4086 = vmatprep.subr.bf16.mxu0 %v5063_v34 }
 0x384   :  { %4088 = vmatpush1.bf16.msra.mxu0 %v5065_v40 }
 0x385   :  { %4114 = vmatprep.subr.bf16.mxu0 %v4974_v18 }
 0x419   :  { %v1243_v1 = vpop.f32.mrb[8].mxu0 }
 0x41a   :  { %v1314_v5 = vpop.f32.mrb[8].mxu1  ;;  %v1394_v6 = vadd.f32 %v1390_v53, %v1243_v1  ;;  %v1245_v4 = vpop.f32.mrb[9].mxu0  ;;  %v1491_v53 = vld [vmem:[#allocation7 + $0x20] sm:$0xff] }
 0x41b   :  { %v1316_v11 = vpop.f32.mrb[9].mxu1  ;;  %v1395_v56 = vadd.f32 %v1391_v59, %v1245_v4  ;;  %v1396_v3 = vadd.f32 %v1392_v13, %v1314_v5  ;;  %v1496_v59 = vld [vmem:[#allocation7 + $0x48] sm:$0xff] }
 0x41c   :  { %v1398_v54 = vmul.f32 0.5, %v1394_v6  ;;  %v1397_v36 = vadd.f32 %v1393_v8, %v1316_v11 }
 0x41d   :  { %v1402_v62 = vmul.f32 0.5, %v1395_v56  ;;  %v5141_v56 = vpack.c.bf16 %v1496_v59, %v1491_v53  ;;  %v1526_v53 = vld [vmem:[#allocation7 + $0x138] sm:$0xff]  ;;  %v1536_v59 = vld [vmem:[#allocation7 + $0x188] sm:$0xff] }
 0x41e   :  { %4447 = vtanh.f32 %v1398_v54  ;;  %v1407_v51 = vmul.f32 0.5, %v1397_v36  ;;  %v1506_v54 = vld [vmem:[#allocation7 + $0x98] sm:$0xff] }
 0x41f   :  { %4449 = vtanh.f32 %v1402_v62 }
 0x420   :  { %4451 = vtanh.f32 %v1396_v3 }
 0x421   :  { %4453 = vtanh.f32 %v1407_v51 }
 0x428   :  { %v4448_v26 = vpop.eup %4447 }
 0x429   :  { %v4450_v18 = vpop.eup %4449  ;;  %v1400_v0 = vmul.f32 0.5, %v4448_v26 }
 0x42a   :  { %v1404_v39 = vmul.f32 0.5, %v4450_v18  ;;  %v4452_v19 = vpop.eup %4451 }
 0x42b   :  { %v1401_v50 = vadd.f32 0.5, %v1400_v0  ;;  %v4454_v20 = vpop.eup %4453 }
 0x42c   :  { %v1405_v48 = vadd.f32 0.5, %v1404_v39  ;;  %v1409_v33 = vmul.f32 0.5, %v4454_v20 }
 0x42d   :  { %v1412_v10 = vmul.f32 %v4452_v19, %v1401_v50  ;;  %v1511_v50 = vld [vmem:[#allocation7 + $0xc0] sm:$0xff]  ;;  %v1516_v19 = vld [vmem:[#allocation7 + $0xe8] sm:$0xff] }
 0x42e   :  { %v1411_v15 = vmul.f32 %v1405_v48, %v5073_v43  ;;  %v1410_v6 = vadd.f32 0.5, %v1409_v33  ;;  %v1501_v43 = vld [vmem:[#allocation7 + $0x70] sm:$0xff]  ;;  %v5162_v33 = vpack.c.bf16 %v1516_v19, %v1511_v50 }
 0x42f   :  { %v5149_v51 = vpack.c.bf16 %v1506_v54, %v1501_v43 }
 0x430   :  { %v5136_v23 = vadd.f32 %v1412_v10, %v1411_v15 }
 0x432   :  { %4455 = vtanh.f32 %v5136_v23 }
 0x43a   :  { %v1385_v52 = vpop.f32.mrb[10].mxu0 }
 0x43b   :  { %v1418_v1 = vadd.f32 %v4944_v37, %v1385_v52  ;;  %v3521_v5 = vpop.f32.mrb[11].mxu0  ;;  %v1521_v52 = vld [vmem:[#allocation7 + $0x110] sm:$0xff] }
 0x43c   :  { %v4456_v4 = vpop.eup %4455 }
 0x43d   :  { %v1420_v11 = vcombine.high %v1418_v1, %v1418_v1  ;;  %v1427_v13 = vrot.slane %v1418_v1, %v4946_v38  ;;  %v5143_v62 = vmul.f32 %v4456_v4, %v1410_v6 }
 0x43f   :  { %v1434_v3 = vrot.slane %v1420_v11, %v4946_v38  ;;  %v1435_v8 = vcombine.high %v1427_v13, %v1427_v13  ;;  %v1443_v36 = vrot.slane %v1427_v13, %v4946_v38  ;;  %3257 = vst.sshfl [vmem:[#allocation10 + $0x2] sm:$0x1 pattern:$0x73625140] %v1427_v13  ;;  %1632 = vmatmul.mubr.f32.vlgmr.msra.gmra.mrb[10].mxu1 %v5143_v62 }
 0x440   :  { %1703 = vmatmul.mubr.f32.vlgmr.msra.gmra.mrb[12].mxu0 %v5143_v62  ;;  %4091 = vmatpush3.bf16.msra.mxu1 %v5141_v56 }
 0x441   :  { %v1436_v26 = vcombine.high %v1434_v3, %v1434_v3  ;;  %v1450_v18 = vrot.slane %v1434_v3, %v4946_v38  ;;  %v1457_v0 = vrot.slane %v1435_v8, %v4946_v38  ;;  %v1465_v39 = vcombine.high %v1443_v36, %v1443_v36  ;;  %3258 = vst.sshfl [vmem:[#allocation10 + $0xa] sm:$0x1 pattern:$0x73625140] %v1435_v8 }
 0x442   :  { %3259 = vst.sshfl [vmem:[#allocation10 + $0x22] sm:$0x1 pattern:$0x73625140] %v1434_v3  ;;  %4092 = vmatprep.subr.bf16.mxu1 %v5511_v27  ;;  %3554 = vmatprep.mubr.msk.f32.mxu1 %vm4647_vm0, %v5512_v14 }
 0x443   :  { %v1464_v48 = vrot.slane %v1436_v26, %v4946_v38  ;;  %v1466_v10 = vcombine.high %v1450_v18, %v1450_v18  ;;  %v1467_v15 = vcombine.high %v1457_v0, %v1457_v0  ;;  %1479 = vst [vmem:[#allocation10 + $0x12] sm:$0x1] %v1465_v39  ;;  %3260 = vst.sshfl [vmem:[#allocation10 + $0x2a] sm:$0x1 pattern:$0x73625140] %v1436_v26  ;;  %4116 = vmatpush1.bf16.msra.mxu0 %v4976_v44 }
 0x444   :  { %2021 = vmatprep.mubr.f32.mxu0 %v5512_v14  ;;  %4118 = vmatprep.subr.bf16.mxu0 %v4985_v12  ;;  %v5168_v44 = vpack.c.bf16 %v1526_v53, %v1521_v52  ;;  %v1531_v12 = vld [vmem:[#allocation7 + $0x160] sm:$0xff] }
 0x445   :  { %v1468_v20 = vcombine.high %v1464_v48, %v1464_v48  ;;  %1480 = vst [vmem:[#allocation10 + $0x1a] sm:$0x1] %v1467_v15  ;;  %1483 = vst [vmem:[#allocation10 + $0x32] sm:$0x1] %v1466_v10  ;;  %4094 = vmatpush3.bf16.msra.mxu1 %v5149_v51  ;;  %v5174_v1 = vpack.c.bf16 %v1536_v59, %v1531_v12  ;;  %v2268_v59 = vld [vmem:[#allocation7 + $0x8] sm:$0xff] }
 0x446   :  { %4095 = vmatprep.subr.bf16.mxu1 %v5511_v27 }
 0x447   :  { %1484 = vst [vmem:[#allocation10 + $0x3a] sm:$0x1] %v1468_v20  ;;  %4120 = vmatpush1.bf16.msra.mxu0 %v4988_v29  ;;  %v1541_v29 = vld [vmem:[#allocation7 + $0x1b0] sm:$0xff] }
 0x448   :  { %4122 = vmatprep.subr.bf16.mxu0 %v4997_v21  ;;  %v1546_v21 = vld [vmem:[#allocation7 + $0x1d8] sm:$0xff] }
 0x449   :  { %4097 = vmatpush3.bf16.msra.mxu1 %v5162_v33  ;;  %v5180_v5 = vpack.c.bf16 %v1546_v21, %v1541_v29  ;;  %v2273_v29 = vld [vmem:[#allocation7 + $0x30] sm:$0xff] }
 0x44a   :  { %4098 = vmatprep.subr.bf16.mxu1 %v5511_v27  ;;  %v5248_v21 = vpack.c.bf16 %v2273_v29, %v2268_v59  ;;  %v2312_v59 = vld [vmem:[#allocation7 + $0x168] sm:$0xff]  ;;  %v2310_v29 = vld [vmem:[#allocation7 + $0x158] sm:$0xff] }
 0x44b   :  { %4124 = vmatpush1.bf16.msra.mxu0 %v5000_v31  ;;  %v1551_v31 = vld [vmem:[#allocation7 + $0x200] sm:$0xff] }
 0x44c   :  { %4126 = vmatprep.subr.bf16.mxu0 %v5009_v55  ;;  %v1556_v55 = vld [vmem:[#allocation7 + $0x228] sm:$0xff] }
 0x44d   :  { %4100 = vmatpush3.bf16.msra.mxu1 %v5168_v44  ;;  %v5186_v6 = vpack.c.bf16 %v1556_v55, %v1551_v31  ;;  %v2267_v31 = vld [vmem:[#allocation7] sm:$0xff]  ;;  %v2272_v55 = vld [vmem:[#allocation7 + $0x28] sm:$0xff] }
 0x44e   :  { %4101 = vmatprep.subr.bf16.mxu1 %v5511_v27 }
 0x44f   :  { %4128 = vmatpush1.bf16.msra.mxu0 %v5012_v2  ;;  %v1561_v2 = vld [vmem:[#allocation7 + $0x250] sm:$0xff] }
 0x450   :  { %4130 = vmatprep.subr.bf16.mxu0 %v5021_v46  ;;  %v1566_v46 = vld [vmem:[#allocation7 + $0x278] sm:$0xff] }
 0x451   :  { %4103 = vmatpush3.bf16.msra.mxu1 %v5174_v1  ;;  %v5192_v4 = vpack.c.bf16 %v1566_v46, %v1561_v2  ;;  %v2270_v2 = vld [vmem:[#allocation7 + $0x18] sm:$0xff]  ;;  %v5250_v46 = vpack.c.bf16 %v2272_v55, %v2267_v31  ;;  %v2315_v55 = vld [vmem:[#allocation7 + $0x180] sm:$0xff] }
 0x452   :  { %4104 = vmatprep.subr.bf16.mxu1 %v5511_v27 }
 0x453   :  { %4132 = vmatpush1.bf16.msra.mxu0 %v5024_v30 }
 0x454   :  { %4134 = vmatprep.subr.bf16.mxu0 %v5033_v25 }
 0x455   :  { %4106 = vmatpush3.bf16.msra.mxu1 %v5180_v5 }
 0x456   :  { %4107 = vmatprep.subr.bf16.mxu1 %v5511_v27 }
 0x457   :  { %4136 = vmatpush1.bf16.msra.mxu0 %v5036_v41  ;;  %v1783_v41 = vld [vmem:[#allocation4 + $0x98] sm:$0xff] }
 0x458   :  { %4138 = vmatprep.subr.bf16.mxu0 %v5045_v35 }
 0x459   :  { %4109 = vmatpush3.bf16.msra.mxu1 %v5186_v6 }
 0x45a   :  { %4110 = vmatprep.subr.bf16.mxu1 %v5511_v27 }
 0x45b   :  { %4140 = vmatpush1.bf16.msra.mxu0 %v5048_v61 }
 0x45c   :  { %4142 = vmatprep.subr.bf16.mxu0 %v5057_v17 }
 0x45d   :  { %4112 = vmatpush3.bf16.msra.mxu1 %v5192_v4 }
 0x45e   :  { %4146 = vmatprep.subr.bf16.mxu1 %v4979_v60  ;;  %v1780_v60 = vld [vmem:[#allocation4 + $0x80] sm:$0xff] }
 0x45f   :  { %4144 = vmatpush1.bf16.msra.mxu0 %v5060_v57 }
 0x460   :  { %3555 = vmatmul.mubr.f32.vlgmr.msra.gmra.mrb[12].mxu1 %v5143_v62  ;;  %4177 = vmatprep.subr.bf16.mxu0 %v5511_v27 }
 0x461   :  { %4148 = vmatpush1.bf16.msra.mxu1 %v4981_v63  ;;  %2092 = vmatprep.mubr.f32.mxu1 %v5512_v14  ;;  %v1781_v63 = vld [vmem:[#allocation4 + $0x88] sm:$0xff] }
 0x462   :  { %4150 = vmatprep.subr.bf16.mxu1 %v4991_v42 }
 0x465   :  { %4152 = vmatpush1.bf16.msra.mxu1 %v4993_v47 }
 0x466   :  { %4154 = vmatprep.subr.bf16.mxu1 %v5003_v45 }
 0x469   :  { %4156 = vmatpush1.bf16.msra.mxu1 %v5005_v49 }
 0x46a   :  { %4158 = vmatprep.subr.bf16.mxu1 %v5015_v16 }
 0x46d   :  { %4160 = vmatpush1.bf16.msra.mxu1 %v5017_v22  ;;  %v1782_v22 = vld [vmem:[#allocation4 + $0x90] sm:$0xff] }
 0x46e   :  { %4162 = vmatprep.subr.bf16.mxu1 %v5027_v58 }
 0x471   :  { %4164 = vmatpush1.bf16.msra.mxu1 %v5029_v7 }
 0x472   :  { %4166 = vmatprep.subr.bf16.mxu1 %v5039_v24 }
 0x475   :  { %4168 = vmatpush1.bf16.msra.mxu1 %v5041_v28 }
 0x476   :  { %4170 = vmatprep.subr.bf16.mxu1 %v5051_v9 }
 0x479   :  { %4172 = vmatpush1.bf16.msra.mxu1 %v5053_v32 }
 0x47a   :  { %4174 = vmatprep.subr.bf16.mxu1 %v5063_v34 }
 0x47d   :  { %4176 = vmatpush1.bf16.msra.mxu1 %v5065_v40 }
 0x47e   :  { %4202 = vmatprep.subr.bf16.mxu1 %v5248_v21 }
 0x512   :  { %v1633_v42 = vpop.f32.mrb[10].mxu1 }
 0x513   :  { %v1704_v47 = vpop.f32.mrb[12].mxu0  ;;  %v1784_v45 = vadd.f32 %v1780_v60, %v1633_v42  ;;  %v1635_v49 = vpop.f32.mrb[11].mxu1  ;;  %v2275_v60 = vld [vmem:[#allocation7 + $0x40] sm:$0xff]  ;;  %v2274_v42 = vld [vmem:[#allocation7 + $0x38] sm:$0xff] }
 0x514   :  { %v1706_v16 = vpop.f32.mrb[13].mxu0  ;;  %v1785_v30 = vadd.f32 %v1781_v63, %v1635_v49  ;;  %v1786_v25 = vadd.f32 %v1782_v22, %v1704_v47  ;;  %v2269_v63 = vld [vmem:[#allocation7 + $0x10] sm:$0xff]  ;;  %v5253_v47 = vpack.c.bf16 %v2275_v60, %v2270_v2  ;;  %v2278_v49 = vld [vmem:[#allocation7 + $0x58] sm:$0xff] }
 0x515   :  { %v1788_v58 = vmul.f32 0.5, %v1784_v45  ;;  %v1787_v24 = vadd.f32 %v1783_v41, %v1706_v16  ;;  %v5255_v45 = vpack.c.bf16 %v2274_v42, %v2269_v63  ;;  %v2283_v16 = vld [vmem:[#allocation7 + $0x80] sm:$0xff]  ;;  %v2285_v41 = vld [vmem:[#allocation7 + $0x90] sm:$0xff]  ;;  %v2314_v60 = vld [vmem:[#allocation7 + $0x178] sm:$0xff]  ;;  %v5301_v63 = vpack.c.bf16 %v2315_v55, %v2310_v29 }
 0x516   :  { %v1792_v7 = vmul.f32 0.5, %v1785_v30  ;;  %v5259_v22 = vpack.c.bf16 %v2283_v16, %v2278_v49  ;;  %v2277_v30 = vld [vmem:[#allocation7 + $0x50] sm:$0xff]  ;;  %v2318_v49 = vld [vmem:[#allocation7 + $0x198] sm:$0xff]  ;;  %v2323_v16 = vld [vmem:[#allocation7 + $0x1c0] sm:$0xff] }
 0x517   :  { %4457 = vtanh.f32 %v1788_v58  ;;  %v1797_v28 = vmul.f32 0.5, %v1787_v24  ;;  %v2282_v58 = vld [vmem:[#allocation7 + $0x78] sm:$0xff]  ;;  %v2279_v24 = vld [vmem:[#allocation7 + $0x60] sm:$0xff]  ;;  %v2309_v2 = vld [vmem:[#allocation7 + $0x150] sm:$0xff] }
 0x518   :  { %4459 = vtanh.f32 %v1792_v7  ;;  %v2280_v7 = vld [vmem:[#allocation7 + $0x68] sm:$0xff]  ;;  %v5303_v42 = vpack.c.bf16 %v2314_v60, %v2309_v2  ;;  %v2342_v29 = vld [vmem:[#allocation7 + $0x258] sm:$0xff]  ;;  %v2345_v60 = vld [vmem:[#allocation7 + $0x270] sm:$0xff] }
 0x519   :  { %4461 = vtanh.f32 %v1786_v25  ;;  %v5262_v25 = vpack.c.bf16 %v2282_v58, %v2277_v30  ;;  %v5307_v30 = vpack.c.bf16 %v2323_v16, %v2318_v49  ;;  %v2317_v58 = vld [vmem:[#allocation7 + $0x190] sm:$0xff]  ;;  %v2340_v55 = vld [vmem:[#allocation7 + $0x248] sm:$0xff]  ;;  %v2339_v49 = vld [vmem:[#allocation7 + $0x240] sm:$0xff] }
 0x51a   :  { %4463 = vtanh.f32 %v1797_v28  ;;  %v2284_v28 = vld [vmem:[#allocation7 + $0x88] sm:$0xff] }
 0x51b   :  { %v2344_v16 = vld [vmem:[#allocation7 + $0x268] sm:$0xff] }
 0x521   :  { %v4458_v35 = vpop.eup %4457 }
 0x522   :  { %v4460_v61 = vpop.eup %4459  ;;  %v1790_v9 = vmul.f32 0.5, %v4458_v35  ;;  %v5265_v35 = vpack.c.bf16 %v2285_v41, %v2280_v7  ;;  %v2322_v7 = vld [vmem:[#allocation7 + $0x1b8] sm:$0xff]  ;;  %v2320_v41 = vld [vmem:[#allocation7 + $0x1a8] sm:$0xff] }
 0x523   :  { %v1794_v32 = vmul.f32 0.5, %v4460_v61  ;;  %v4462_v57 = vpop.eup %4461  ;;  %v5267_v61 = vpack.c.bf16 %v2284_v28, %v2279_v24  ;;  %v5310_v24 = vpack.c.bf16 %v2322_v7, %v2317_v58  ;;  %v2325_v28 = vld [vmem:[#allocation7 + $0x1d0] sm:$0xff]  ;;  %v5337_v58 = vpack.c.bf16 %v2345_v60, %v2340_v55 }
 0x524   :  { %v1791_v17 = vadd.f32 0.5, %v1790_v9  ;;  %v4464_v43 = vpop.eup %4463  ;;  %v2288_v9 = vld [vmem:[#allocation7 + $0xa8] sm:$0xff]  ;;  %v5339_v7 = vpack.c.bf16 %v2344_v16, %v2339_v49 }
 0x525   :  { %v1795_v34 = vadd.f32 0.5, %v1794_v32  ;;  %v1799_v54 = vmul.f32 0.5, %v4464_v43  ;;  %v2293_v32 = vld [vmem:[#allocation7 + $0xd0] sm:$0xff]  ;;  %v2295_v43 = vld [vmem:[#allocation7 + $0xe0] sm:$0xff] }
 0x526   :  { %v1802_v40 = vmul.f32 %v4462_v57, %v1791_v17  ;;  %v5271_v17 = vpack.c.bf16 %v2293_v32, %v2288_v9  ;;  %v2287_v57 = vld [vmem:[#allocation7 + $0xa0] sm:$0xff]  ;;  %v2324_v32 = vld [vmem:[#allocation7 + $0x1c8] sm:$0xff] }
 0x527   :  { %v1801_v11 = vmul.f32 %v1795_v34, %v5136_v23  ;;  %v1800_v36 = vadd.f32 0.5, %v1799_v54  ;;  %v2292_v34 = vld [vmem:[#allocation7 + $0xc8] sm:$0xff]  ;;  %v2289_v54 = vld [vmem:[#allocation7 + $0xb0] sm:$0xff]  ;;  %v2319_v9 = vld [vmem:[#allocation7 + $0x1a0] sm:$0xff] }
 0x529   :  { %v5219_v13 = vadd.f32 %v1802_v40, %v1801_v11  ;;  %v2290_v40 = vld [vmem:[#allocation7 + $0xb8] sm:$0xff]  ;;  %v5274_v11 = vpack.c.bf16 %v2292_v34, %v2287_v57  ;;  %v5313_v57 = vpack.c.bf16 %v2325_v28, %v2320_v41  ;;  %v5315_v34 = vpack.c.bf16 %v2324_v32, %v2319_v9  ;;  %v2170_v41 = vld [vmem:[#allocation4 + $0xa0] sm:$0xff]  ;;  %v2171_v28 = vld [vmem:[#allocation4 + $0xa8] sm:$0xff] }
 0x52b   :  { %4465 = vtanh.f32 %v5219_v13 }
 0x533   :  { %v1775_v62 = vpop.f32.mrb[12].mxu1 }
 0x534   :  { %v1808_v3 = vadd.f32 %v4944_v37, %v1775_v62  ;;  %v3556_v8 = vpop.f32.mrb[13].mxu1  ;;  %v2294_v62 = vld [vmem:[#allocation7 + $0xd8] sm:$0xff] }
 0x535   :  { %v4466_v26 = vpop.eup %4465  ;;  %v5279_v8 = vpack.c.bf16 %v2294_v62, %v2289_v54  ;;  %v2327_v62 = vld [vmem:[#allocation7 + $0x1e0] sm:$0xff] }
 0x536   :  { %v1810_v18 = vcombine.high %v1808_v3, %v1808_v3  ;;  %v1817_v0 = vrot.slane %v1808_v3, %v4946_v38  ;;  %v1805_v39 = vmul.f32 %v4466_v26, %v1800_v36  ;;  %v5277_v3 = vpack.c.bf16 %v2295_v43, %v2290_v40  ;;  %v2298_v36 = vld [vmem:[#allocation7 + $0xf8] sm:$0xff]  ;;  %v2303_v26 = vld [vmem:[#allocation7 + $0x120] sm:$0xff]  ;;  %v2328_v40 = vld [vmem:[#allocation7 + $0x1e8] sm:$0xff] }
 0x537   :  { %v2333_v43 = vld [vmem:[#allocation7 + $0x210] sm:$0xff] }
 0x538   :  { %v1824_v50 = vrot.slane %v1810_v18, %v4946_v38  ;;  %v1825_v19 = vcombine.high %v1817_v0, %v1817_v0  ;;  %v1833_v23 = vrot.slane %v1817_v0, %v4946_v38  ;;  %3261 = vst.sshfl [vmem:[#allocation10 + $0x3] sm:$0x1 pattern:$0x73625140] %v1817_v0  ;;  %2022 = vmatmul.mubr.f32.vlgmr.msra.gmra.mrb[14].mxu0 %v1805_v39  ;;  %v2297_v0 = vld [vmem:[#allocation7 + $0xf0] sm:$0xff] }
 0x539   :  { %2093 = vmatmul.mubr.f32.vlgmr.msra.gmra.mrb[14].mxu1 %v1805_v39  ;;  %4179 = vmatpush3.bf16.msra.mxu0 %v5141_v56  ;;  %v5283_v18 = vpack.c.bf16 %v2303_v26, %v2298_v36  ;;  %v5319_v54 = vpack.c.bf16 %v2333_v43, %v2328_v40  ;;  %v2332_v36 = vld [vmem:[#allocation7 + $0x208] sm:$0xff]  ;;  %v2330_v26 = vld [vmem:[#allocation7 + $0x1f8] sm:$0xff] }
 0x53a   :  { %v1826_v48 = vcombine.high %v1824_v50, %v1824_v50  ;;  %v1840_v10 = vrot.slane %v1824_v50, %v4946_v38  ;;  %v1847_v37 = vrot.slane %v1825_v19, %v4946_v38  ;;  %v1855_v15 = vcombine.high %v1833_v23, %v1833_v23  ;;  %3262 = vst.sshfl [vmem:[#allocation10 + $0xb] sm:$0x1 pattern:$0x73625140] %v1825_v19  ;;  %v2305_v23 = vld [vmem:[#allocation7 + $0x130] sm:$0xff] }
 0x53b   :  { %3263 = vst.sshfl [vmem:[#allocation10 + $0x23] sm:$0x1 pattern:$0x73625140] %v1824_v50  ;;  %4180 = vmatprep.subr.bf16.mxu0 %v5511_v27  ;;  %3589 = vmatprep.mubr.msk.f32.mxu0 %vm4647_vm0, %v5512_v14  ;;  %v2300_v50 = vld [vmem:[#allocation7 + $0x108] sm:$0xff] }
 0x53c   :  { %v1854_v20 = vrot.slane %v1826_v48, %v4946_v38  ;;  %v1856_v52 = vcombine.high %v1840_v10, %v1840_v10  ;;  %v1857_v53 = vcombine.high %v1847_v37, %v1847_v37  ;;  %1869 = vst [vmem:[#allocation10 + $0x13] sm:$0x1] %v1855_v15  ;;  %3264 = vst.sshfl [vmem:[#allocation10 + $0x2b] sm:$0x1 pattern:$0x73625140] %v1826_v48  ;;  %2411 = vmatprep.mubr.f32.mxu1 %v5512_v14 }
 0x53d   :  { %4182 = vmatpush3.bf16.msra.mxu0 %v5149_v51  ;;  %4204 = vmatpush1.bf16.msra.mxu1 %v5250_v46  ;;  %v2299_v48 = vld [vmem:[#allocation7 + $0x100] sm:$0xff]  ;;  %v2304_v10 = vld [vmem:[#allocation7 + $0x128] sm:$0xff]  ;;  %v5289_v37 = vpack.c.bf16 %v2305_v23, %v2300_v50  ;;  %v2329_v50 = vld [vmem:[#allocation7 + $0x1f0] sm:$0xff] }
 0x53e   :  { %v1858_v12 = vcombine.high %v1854_v20, %v1854_v20  ;;  %1870 = vst [vmem:[#allocation10 + $0x1b] sm:$0x1] %v1857_v53  ;;  %1873 = vst [vmem:[#allocation10 + $0x33] sm:$0x1] %v1856_v52  ;;  %4183 = vmatprep.subr.bf16.mxu0 %v5511_v27  ;;  %4206 = vmatprep.subr.bf16.mxu1 %v5259_v22  ;;  %v5291_v15 = vpack.c.bf16 %v2304_v10, %v2299_v48  ;;  %v2308_v20 = vld [vmem:[#allocation7 + $0x148] sm:$0xff]  ;;  %v2313_v52 = vld [vmem:[#allocation7 + $0x170] sm:$0xff] }
 0x53f   :  { %v5295_v53 = vpack.c.bf16 %v2313_v52, %v2308_v20  ;;  %v2334_v23 = vld [vmem:[#allocation7 + $0x218] sm:$0xff]  ;;  %v2343_v52 = vld [vmem:[#allocation7 + $0x260] sm:$0xff] }
 0x540   :  { %1874 = vst [vmem:[#allocation10 + $0x3b] sm:$0x1] %v1858_v12  ;;  %v2307_v12 = vld [vmem:[#allocation7 + $0x140] sm:$0xff]  ;;  %v5327_v10 = vpack.c.bf16 %v2334_v23, %v2329_v50  ;;  %v2338_v20 = vld [vmem:[#allocation7 + $0x238] sm:$0xff] }
 0x541   :  { %4185 = vmatpush3.bf16.msra.mxu0 %v5162_v33  ;;  %4208 = vmatpush1.bf16.msra.mxu1 %v5262_v25  ;;  %v5298_v31 = vpack.c.bf16 %v2312_v59, %v2307_v12  ;;  %v5331_v12 = vpack.c.bf16 %v2343_v52, %v2338_v20  ;;  %v2337_v59 = vld [vmem:[#allocation7 + $0x230] sm:$0xff]  ;;  %v2173_v20 = vld [vmem:[#allocation4 + $0xb8] sm:$0xff] }
 0x542   :  { %4186 = vmatprep.subr.bf16.mxu0 %v5511_v27  ;;  %4210 = vmatprep.subr.bf16.mxu1 %v5271_v17  ;;  %v5334_v2 = vpack.c.bf16 %v2342_v29, %v2337_v59 }
 0x545   :  { %4188 = vmatpush3.bf16.msra.mxu0 %v5168_v44  ;;  %4212 = vmatpush1.bf16.msra.mxu1 %v5274_v11 }
 0x546   :  { %4189 = vmatprep.subr.bf16.mxu0 %v5511_v27  ;;  %4214 = vmatprep.subr.bf16.mxu1 %v5283_v18 }
 0x549   :  { %4191 = vmatpush3.bf16.msra.mxu0 %v5174_v1 }
 0x54a   :  { %4192 = vmatprep.subr.bf16.mxu0 %v5511_v27 }
 0x54d   :  { %4194 = vmatpush3.bf16.msra.mxu0 %v5180_v5 }
 0x54e   :  { %4195 = vmatprep.subr.bf16.mxu0 %v5511_v27 }
 0x551   :  { %4197 = vmatpush3.bf16.msra.mxu0 %v5186_v6 }
 0x552   :  { %4198 = vmatprep.subr.bf16.mxu0 %v5511_v27 }
 0x555   :  { %4200 = vmatpush3.bf16.msra.mxu0 %v5192_v4 }
 0x556   :  { %4234 = vmatprep.subr.bf16.mxu0 %v5253_v47 }
 0x558   :  { %3590 = vmatmul.mubr.f32.vlgmr.msra.gmra.mrb[16].mxu0 %v1805_v39  ;;  %v2302_v39 = vld [vmem:[#allocation7 + $0x118] sm:$0xff] }
 0x559   :  { %2482 = vmatprep.mubr.f32.mxu0 %v5512_v14  ;;  %4236 = vmatpush1.bf16.msra.mxu0 %v5255_v45  ;;  %v5286_v19 = vpack.c.bf16 %v2302_v39, %v2297_v0  ;;  %v5322_v0 = vpack.c.bf16 %v2332_v36, %v2327_v62  ;;  %v2335_v39 = vld [vmem:[#allocation7 + $0x220] sm:$0xff]  ;;  %v2172_v36 = vld [vmem:[#allocation4 + $0xb0] sm:$0xff] }
 0x55a   :  { %4238 = vmatprep.subr.bf16.mxu0 %v5265_v35  ;;  %v5325_v48 = vpack.c.bf16 %v2335_v39, %v2330_v26 }
 0x55b   :  { %4216 = vmatpush1.bf16.msra.mxu1 %v5286_v19 }
 0x55c   :  { %4218 = vmatprep.subr.bf16.mxu1 %v5295_v53 }
 0x55d   :  { %4240 = vmatpush1.bf16.msra.mxu0 %v5267_v61 }
 0x55e   :  { %4242 = vmatprep.subr.bf16.mxu0 %v5277_v3 }
 0x55f   :  { %4220 = vmatpush1.bf16.msra.mxu1 %v5298_v31 }
 0x560   :  { %4222 = vmatprep.subr.bf16.mxu1 %v5307_v30 }
 0x561   :  { %4244 = vmatpush1.bf16.msra.mxu0 %v5279_v8 }
 0x562   :  { %4246 = vmatprep.subr.bf16.mxu0 %v5289_v37 }
 0x563   :  { %4224 = vmatpush1.bf16.msra.mxu1 %v5310_v24 }
 0x564   :  { %4226 = vmatprep.subr.bf16.mxu1 %v5319_v54 }
 0x565   :  { %4248 = vmatpush1.bf16.msra.mxu0 %v5291_v15 }
 0x566   :  { %4250 = vmatprep.subr.bf16.mxu0 %v5301_v63 }
 0x567   :  { %4228 = vmatpush1.bf16.msra.mxu1 %v5322_v0 }
 0x568   :  { %4230 = vmatprep.subr.bf16.mxu1 %v5331_v12 }
 0x569   :  { %4252 = vmatpush1.bf16.msra.mxu0 %v5303_v42 }
 0x56a   :  { %4254 = vmatprep.subr.bf16.mxu0 %v5313_v57 }
 0x56b   :  { %4232 = vmatpush1.bf16.msra.mxu1 %v5334_v2 }
 0x56c   :  { %4265 = vmatprep.subr.bf16.mxu1 %v5511_v27 }
 0x56d   :  { %4256 = vmatpush1.bf16.msra.mxu0 %v5315_v34 }
 0x56e   :  { %4258 = vmatprep.subr.bf16.mxu0 %v5325_v48 }
 0x571   :  { %4260 = vmatpush1.bf16.msra.mxu0 %v5327_v10 }
 0x572   :  { %4262 = vmatprep.subr.bf16.mxu0 %v5337_v58 }
 0x575   :  { %4264 = vmatpush1.bf16.msra.mxu0 %v5339_v7 }
 0x576   :  { %4290 = vmatprep.subr.bf16.mxu0 %v5248_v21 }
 0x60b   :  { %v2023_v9 = vpop.f32.mrb[14].mxu0 }
 0x60c   :  { %v2094_v32 = vpop.f32.mrb[14].mxu1  ;;  %v2174_v40 = vadd.f32 %v2170_v41, %v2023_v9  ;;  %v2025_v43 = vpop.f32.mrb[15].mxu0 }
 0x60d   :  { %v2096_v62 = vpop.f32.mrb[15].mxu1  ;;  %v2175_v26 = vadd.f32 %v2171_v28, %v2025_v43  ;;  %v2176_v23 = vadd.f32 %v2172_v36, %v2094_v32 }
 0x60e   :  { %v2178_v39 = vmul.f32 0.5, %v2174_v40  ;;  %v2177_v52 = vadd.f32 %v2173_v20, %v2096_v62  ;;  %v5353_v62 = vld [vmem:[%s5501_s2] ss:$0 sm:$0xff]  ;;  %s4649_s2 = smov [#allocation11]  }
 0x60f   :  { %v2182_v50 = vmul.f32 0.5, %v2175_v26  ;;  %s3221_s20 = sshll.u32 %s4649_s2, 4  ;;  %s3222_s20 = int_to_ptr.vmem [resolvable:$true] %s3221_s20 }
 0x610   :  { %4467 = vtanh.f32 %v2178_v39  ;;  %v2187_v59 = vmul.f32 0.5, %v2177_v52  ;;  %s4564_s21 = scalar_lea.vmem %s3222_s20, 128  ;;  %p4569_p11 = scmp.lt.s32.totalorder %s3222_s20, %s3222_s20 }
 0x611   :  { %4469 = vtanh.f32 %v2182_v50  ;;  %p4565_p10 = scmp.ne.s32.totalorder %s3222_s20, %s4564_s21  ;;  %p4570_p12 = scmp.lt.s32.totalorder %s4564_s21, %s4564_s21 }
 0x612   :  { %4471 = vtanh.f32 %v2176_v23 }
 0x613   :  { %4473 = vtanh.f32 %v2187_v59  ;;  %p4571_p13 = por %p4570_p12, %p4569_p11 }
 0x615   :  { %p4572_p0 = pnand %p4571_p13, %p4565_p10 }
 0x61a   :  { %v4468_v29 = vpop.eup %4467 }
 0x61b   :  { %v4470_v21 = vpop.eup %4469  ;;  %v2180_v55 = vmul.f32 0.5, %v4468_v29 }
 0x61c   :  { %v2184_v60 = vmul.f32 0.5, %v4470_v21  ;;  %v4472_v16 = vpop.eup %4471 }
 0x61d   :  { %v2181_v49 = vadd.f32 0.5, %v2180_v55  ;;  %v4474_v32 = vpop.eup %4473 }
 0x61e   :  { %v2185_v41 = vadd.f32 0.5, %v2184_v60  ;;  %v2189_v43 = vmul.f32 0.5, %v4474_v32 }
 0x61f   :  { %v2192_v9 = vmul.f32 %v4472_v16, %v2181_v49 }
 0x620   :  { %v2191_v28 = vmul.f32 %v2185_v41, %v5219_v13  ;;  %v2190_v50 = vadd.f32 0.5, %v2189_v43 }
 0x622   :  { %v5347_v40 = vadd.f32 %v2192_v9, %v2191_v28 }
 0x624   :  { %4475 = vtanh.f32 %v5347_v40 }
 0x62b   :  { %v2165_v36 = vpop.f32.mrb[16].mxu0 }
 0x62c   :  { %v2198_v26 = vadd.f32 %v5353_v62, %v2165_v36  ;;  %v3591_v39 = vpop.f32.mrb[17].mxu0 }
 0x62e   :  { %v4476_v23 = vpop.eup %4475  ;;  %v2200_v20 = vcombine.high %v2198_v26, %v2198_v26  ;;  %v2207_v13 = vrot.slane %v2198_v26, %v4946_v38 }
 0x62f   :  { %v2195_v52 = vmul.f32 %v4476_v23, %v2190_v50 }
 0x630   :  { %v2214_v59 = vrot.slane %v2200_v20, %v4946_v38  ;;  %v2215_v29 = vcombine.high %v2207_v13, %v2207_v13  ;;  %v2223_v21 = vrot.slane %v2207_v13, %v4946_v38  ;;  %3265 = vst.sshfl [vmem:[#allocation10 + $0x4] sm:$0x1 pattern:$0x73625140] %v2207_v13 }
 0x631   :  { %2412 = vmatmul.mubr.f32.vlgmr.msra.gmra.mrb[16].mxu1 %v2195_v52  ;;  %2483 = vmatmul.mubr.f32.vlgmr.msra.gmra.mrb[18].mxu0 %v2195_v52 }
 0x632   :  { %v2216_v55 = vcombine.high %v2214_v59, %v2214_v59  ;;  %v2230_v60 = vrot.slane %v2214_v59, %v4946_v38  ;;  %v2237_v49 = vrot.slane %v2215_v29, %v4946_v38  ;;  %v2245_v16 = vcombine.high %v2223_v21, %v2223_v21  ;;  %3266 = vst.sshfl [vmem:[#allocation10 + $0xc] sm:$0x1 pattern:$0x73625140] %v2215_v29 }
 0x633   :  { %3267 = vst.sshfl [vmem:[#allocation10 + $0x24] sm:$0x1 pattern:$0x73625140] %v2214_v59  ;;  %4267 = vmatpush3.bf16.msra.mxu1 %v5141_v56  ;;  %3624 = vmatprep.mubr.msk.f32.mxu1 %vm4647_vm0, %v5512_v14  ;;  %v2560_v56 = vld [vmem:[#allocation4 + $0xc0] sm:$0xff]  ;;  %v2686_v59 = vld [vmem:[#allocation7 + $0xe8] sm:$0xff] }
 0x634   :  { %4268 = vmatprep.subr.bf16.mxu1 %v5511_v27  ;;  %v2244_v41 = vrot.slane %v2216_v55, %v4946_v38  ;;  %v2246_v9 = vcombine.high %v2230_v60, %v2230_v60  ;;  %v2247_v28 = vcombine.high %v2237_v49, %v2237_v49  ;;  %2259 = vst [vmem:[#allocation10 + $0x14] sm:$0x1] %v2245_v16  ;;  %3268 = vst.sshfl [vmem:[#allocation10 + $0x2c] sm:$0x1 pattern:$0x73625140] %v2216_v55 }
 0x635   :  { %4292 = vmatpush1.bf16.msra.mxu0 %v5250_v46  ;;  %2801 = vmatprep.mubr.f32.mxu0 %v5512_v14  ;;  %v2691_v16 = vld [vmem:[#allocation7 + $0x110] sm:$0xff] }
 0x636   :  { %4294 = vmatprep.subr.bf16.mxu0 %v5259_v22  ;;  %v2248_v32 = vcombine.high %v2244_v41, %v2244_v41  ;;  %2260 = vst [vmem:[#allocation10 + $0x1c] sm:$0x1] %v2247_v28  ;;  %2263 = vst [vmem:[#allocation10 + $0x34] sm:$0x1] %v2246_v9  ;;  %v2696_v41 = vld [vmem:[#allocation7 + $0x138] sm:$0xff]  ;;  %v2706_v28 = vld [vmem:[#allocation7 + $0x188] sm:$0xff] }
 0x637   :  { %4270 = vmatpush3.bf16.msra.mxu1 %v5149_v51  ;;  %v2561_v51 = vld [vmem:[#allocation4 + $0xc8] sm:$0xff]  ;;  %v4363_v9 = vpack.c.bf16 %v2696_v41, %v2691_v16 }
 0x638   :  { %4271 = vmatprep.subr.bf16.mxu1 %v5511_v27  ;;  %2264 = vst [vmem:[#allocation10 + $0x3c] sm:$0x1] %v2248_v32 }
 0x639   :  { %4296 = vmatpush1.bf16.msra.mxu0 %v5262_v25  ;;  %v2563_v25 = vld [vmem:[#allocation4 + $0xd8] sm:$0xff] }
 0x63a   :  { %4298 = vmatprep.subr.bf16.mxu0 %v5271_v17 }
 0x63b   :  { %4273 = vmatpush3.bf16.msra.mxu1 %v5162_v33 }
 0x63c   :  { %4274 = vmatprep.subr.bf16.mxu1 %v5511_v27 }
 0x63d   :  { %4300 = vmatpush1.bf16.msra.mxu0 %v5274_v11 }
 0x63e   :  { %4302 = vmatprep.subr.bf16.mxu0 %v5283_v18 }
 0x63f   :  { %4276 = vmatpush3.bf16.msra.mxu1 %v5168_v44 }
 0x640   :  { %4277 = vmatprep.subr.bf16.mxu1 %v5511_v27 }
 0x641   :  { %4304 = vmatpush1.bf16.msra.mxu0 %v5286_v19 }
 0x642   :  { %4306 = vmatprep.subr.bf16.mxu0 %v5295_v53 }
 0x643   :  { %4279 = vmatpush3.bf16.msra.mxu1 %v5174_v1 }
 0x644   :  { %4280 = vmatprep.subr.bf16.mxu1 %v5511_v27 }
 0x645   :  { %4308 = vmatpush1.bf16.msra.mxu0 %v5298_v31 }
 0x646   :  { %4310 = vmatprep.subr.bf16.mxu0 %v5307_v30 }
 0x647   :  { %4282 = vmatpush3.bf16.msra.mxu1 %v5180_v5 }
 0x648   :  { %4283 = vmatprep.subr.bf16.mxu1 %v5511_v27 }
 0x649   :  { %4312 = vmatpush1.bf16.msra.mxu0 %v5310_v24  ;;  %v2661_v24 = vld [vmem:[#allocation7 + $0x20] sm:$0xff] }
 0x64a   :  { %4314 = vmatprep.subr.bf16.mxu0 %v5319_v54 }
 0x64b   :  { %4285 = vmatpush3.bf16.msra.mxu1 %v5186_v6 }
 0x64c   :  { %4286 = vmatprep.subr.bf16.mxu1 %v5511_v27 }
 0x64d   :  { %4316 = vmatpush1.bf16.msra.mxu0 %v5322_v0 }
 0x64e   :  { %4318 = vmatprep.subr.bf16.mxu0 %v5331_v12 }
 0x64f   :  { %4288 = vmatpush3.bf16.msra.mxu1 %v5192_v4  ;;  %v2562_v4 = vld [vmem:[#allocation4 + $0xd0] sm:$0xff] }
 0x650   :  { %4322 = vmatprep.subr.bf16.mxu1 %v5253_v47 }
 0x651   :  { %4320 = vmatpush1.bf16.msra.mxu0 %v5334_v2 }
 0x652   :  { %3625 = vmatmul.mubr.f32.vlgmr.msra.gmra.mrb[18].mxu1 %v2195_v52  ;;  %4353 = vmatprep.subr.bf16.mxu0 %v5511_v27  ;;  %v2681_v52 = vld [vmem:[#allocation7 + $0xc0] sm:$0xff] }
 0x653   :  { %4324 = vmatpush1.bf16.msra.mxu1 %v5255_v45  ;;  %2872 = vmatprep.mubr.f32.mxu1 %v5512_v14  ;;  %v4360_v49 = vpack.c.bf16 %v2686_v59, %v2681_v52 }
 0x654   :  { %4326 = vmatprep.subr.bf16.mxu1 %v5265_v35 }
 0x657   :  { %4328 = vmatpush1.bf16.msra.mxu1 %v5267_v61 }
 0x658   :  { %4330 = vmatprep.subr.bf16.mxu1 %v5277_v3 }
 0x65b   :  { %4332 = vmatpush1.bf16.msra.mxu1 %v5279_v8 }
 0x65c   :  { %4334 = vmatprep.subr.bf16.mxu1 %v5289_v37 }
 0x65f   :  { %4336 = vmatpush1.bf16.msra.mxu1 %v5291_v15 }
 0x660   :  { %4338 = vmatprep.subr.bf16.mxu1 %v5301_v63 }
 0x663   :  { %4340 = vmatpush1.bf16.msra.mxu1 %v5303_v42 }
 0x664   :  { %4342 = vmatprep.subr.bf16.mxu1 %v5313_v57  ;;  %v2666_v57 = vld [vmem:[#allocation7 + $0x48] sm:$0xff] }
 0x665   :  { %v4354_v2 = vpack.c.bf16 %v2666_v57, %v2661_v24 }
 0x667   :  { %4344 = vmatpush1.bf16.msra.mxu1 %v5315_v34 }
 0x668   :  { %4346 = vmatprep.subr.bf16.mxu1 %v5325_v48 }
 0x66b   :  { %4348 = vmatpush1.bf16.msra.mxu1 %v5327_v10 }
 0x66c   :  { %4350 = vmatprep.subr.bf16.mxu1 %v5337_v58  ;;  %v2671_v58 = vld [vmem:[#allocation7 + $0x70] sm:$0xff] }
 0x66f   :  { %4352 = vmatpush1.bf16.msra.mxu1 %v5339_v7  ;;  %v2676_v7 = vld [vmem:[#allocation7 + $0x98] sm:$0xff] }
 0x670   :  { %4377 = vmatprep.subr.bf16.mxu1 %v5511_v27  ;;  %v4357_v39 = vpack.c.bf16 %v2676_v7, %v2671_v58 }
 0x704   :  { %v2413_v33 = vpop.f32.mrb[16].mxu1  ;;  %v2484_v44 = vpop.f32.mrb[18].mxu0 }
 0x705   :  { %v2564_v1 = vadd.f32 %v2560_v56, %v2413_v33  ;;  %v2415_v5 = vpop.f32.mrb[17].mxu1  ;;  %v2486_v6 = vpop.f32.mrb[19].mxu0  ;;  %v2566_v22 = vadd.f32 %v2562_v4, %v2484_v44  ;;  %v2711_v56 = vld [vmem:[#allocation7 + $0x1b0] sm:$0xff]  ;;  %v2721_v44 = vld [vmem:[#allocation7 + $0x200] sm:$0xff]  ;;  %v2736_v4 = vld [vmem:[#allocation7 + $0x278] sm:$0xff] }
 0x706   :  { %v2565_v46 = vadd.f32 %v2561_v51, %v2415_v5  ;;  %v2567_v35 = vadd.f32 %v2563_v25, %v2486_v6  ;;  %v2716_v51 = vld [vmem:[#allocation7 + $0x1d8] sm:$0xff]  ;;  %v2731_v6 = vld [vmem:[#allocation7 + $0x250] sm:$0xff] }
 0x707   :  { %v2568_v47 = vmul.f32 0.5, %v2564_v1  ;;  %v4369_v33 = vpack.c.bf16 %v2716_v51, %v2711_v56  ;;  %v2726_v1 = vld [vmem:[#allocation7 + $0x228] sm:$0xff] }
 0x708   :  { %v2572_v45 = vmul.f32 0.5, %v2565_v46  ;;  %v2577_v61 = vmul.f32 0.5, %v2567_v35  ;;  %v4372_v5 = vpack.c.bf16 %v2726_v1, %v2721_v44  ;;  %v4375_v46 = vpack.c.bf16 %v2736_v4, %v2731_v6 }
 0x709   :  { %4477 = vtanh.f32 %v2568_v47  ;;  %v2950_v47 = vld [vmem:[#allocation4 + $0xe0] sm:$0xff] }
 0x70a   :  { %4479 = vtanh.f32 %v2572_v45  ;;  %v2951_v45 = vld [vmem:[#allocation4 + $0xe8] sm:$0xff] }
 0x70b   :  { %4481 = vtanh.f32 %v2566_v22 }
 0x70c   :  { %4483 = vtanh.f32 %v2577_v61 }
 0x713   :  { %v4478_v17 = vpop.eup %4477 }
 0x714   :  { %v4480_v11 = vpop.eup %4479  ;;  %v2570_v3 = vmul.f32 0.5, %v4478_v17 }
 0x715   :  { %v2574_v8 = vmul.f32 0.5, %v4480_v11  ;;  %v4482_v19 = vpop.eup %4481  ;;  %v2952_v11 = vld [vmem:[#allocation4 + $0xf0] sm:$0xff] }
 0x716   :  { %v2571_v18 = vadd.f32 0.5, %v2570_v3  ;;  %v4484_v63 = vpop.eup %4483 }
 0x717   :  { %v2575_v37 = vadd.f32 0.5, %v2574_v8  ;;  %v2579_v42 = vmul.f32 0.5, %v4484_v63 }
 0x718   :  { %v2582_v15 = vmul.f32 %v4482_v19, %v2571_v18 }
 0x719   :  { %v2581_v53 = vmul.f32 %v2575_v37, %v5347_v40  ;;  %v2580_v0 = vadd.f32 0.5, %v2579_v42  ;;  %v2953_v37 = vld [vmem:[#allocation4 + $0xf8] sm:$0xff] }
 0x71b   :  { %v5415_v31 = vadd.f32 %v2582_v15, %v2581_v53 }
 0x71d   :  { %4485 = vtanh.f32 %v5415_v31 }
 0x725   :  { %v2555_v30 = vpop.f32.mrb[18].mxu1 }
 0x726   :  { %v2588_v34 = vadd.f32 %v5353_v62, %v2555_v30  ;;  %v3626_v54 = vpop.f32.mrb[19].mxu1 }
 0x727   :  { %v4486_v48 = vpop.eup %4485 }
 0x728   :  { %v2590_v10 = vcombine.high %v2588_v34, %v2588_v34  ;;  %v2597_v12 = vrot.slane %v2588_v34, %v4946_v38  ;;  %v5420_v40 = vmul.f32 %v4486_v48, %v2580_v0 }
 0x72a   :  { %v2604_v43 = vrot.slane %v2590_v10, %v4946_v38  ;;  %v2605_v36 = vcombine.high %v2597_v12, %v2597_v12  ;;  %v2613_v26 = vrot.slane %v2597_v12, %v4946_v38  ;;  %3269 = vst.sshfl [vmem:[#allocation10 + $0x5] sm:$0x1 pattern:$0x73625140] %v2597_v12  ;;  %2802 = vmatmul.mubr.f32.vlgmr.msra.gmra.mrb[20].mxu0 %v5420_v40 }
 0x72b   :  { %2873 = vmatmul.mubr.f32.vlgmr.msra.gmra.mrb[20].mxu1 %v5420_v40  ;;  %4355 = vmatpush3.bf16.msra.mxu0 %v4354_v2 }
 0x72c   :  { %v2606_v50 = vcombine.high %v2604_v43, %v2604_v43  ;;  %v2620_v23 = vrot.slane %v2604_v43, %v4946_v38  ;;  %v2627_v20 = vrot.slane %v2605_v36, %v4946_v38  ;;  %v2635_v13 = vcombine.high %v2613_v26, %v2613_v26  ;;  %3270 = vst.sshfl [vmem:[#allocation10 + $0xd] sm:$0x1 pattern:$0x73625140] %v2605_v36 }
 0x72d   :  { %3271 = vst.sshfl [vmem:[#allocation10 + $0x25] sm:$0x1 pattern:$0x73625140] %v2604_v43  ;;  %4356 = vmatprep.subr.bf16.mxu0 %v5511_v27  ;;  %3659 = vmatprep.mubr.msk.f32.mxu0 %vm4647_vm0, %v5512_v14 }
 0x72e   :  { %v2634_v29 = vrot.slane %v2606_v50, %v4946_v38  ;;  %v2636_v21 = vcombine.high %v2620_v23, %v2620_v23  ;;  %v2637_v55 = vcombine.high %v2627_v20, %v2627_v20  ;;  %2649 = vst [vmem:[#allocation10 + $0x15] sm:$0x1] %v2635_v13  ;;  %3272 = vst.sshfl [vmem:[#allocation10 + $0x2d] sm:$0x1 pattern:$0x73625140] %v2606_v50  ;;  %4379 = vmatpush3.bf16.msra.mxu1 %v4354_v2 }
 0x72f   :  { %3694 = vmatprep.mubr.msk.f32.mxu1 %vm4647_vm0, %v5512_v14  ;;  %4380 = vmatprep.subr.bf16.mxu1 %v5511_v27  ;;  %v2701_v14 = vld [vmem:[#allocation7 + $0x160] sm:$0xff] }
 0x730   :  { %v2638_v60 = vcombine.high %v2634_v29, %v2634_v29  ;;  %2650 = vst [vmem:[#allocation10 + $0x1d] sm:$0x1] %v2637_v55  ;;  %2653 = vst [vmem:[#allocation10 + $0x35] sm:$0x1] %v2636_v21  ;;  %4358 = vmatpush3.bf16.msra.mxu0 %v4357_v39  ;;  %v4366_v32 = vpack.c.bf16 %v2706_v28, %v2701_v14 }
 0x731   :  { %4359 = vmatprep.subr.bf16.mxu0 %v5511_v27 }
 0x732   :  { %2654 = vst [vmem:[#allocation10 + $0x3d] sm:$0x1] %v2638_v60  ;;  %4382 = vmatpush3.bf16.msra.mxu1 %v4357_v39 }
 0x733   :  { %4383 = vmatprep.subr.bf16.mxu1 %v5511_v27 }
 0x734   :  { %4361 = vmatpush3.bf16.msra.mxu0 %v4360_v49 }
 0x735   :  { %4362 = vmatprep.subr.bf16.mxu0 %v5511_v27 }
 0x736   :  { %4385 = vmatpush3.bf16.msra.mxu1 %v4360_v49 }
 0x737   :  { %4386 = vmatprep.subr.bf16.mxu1 %v5511_v27 }
 0x738   :  { %4364 = vmatpush3.bf16.msra.mxu0 %v4363_v9 }
 0x739   :  { %4365 = vmatprep.subr.bf16.mxu0 %v5511_v27 }
 0x73a   :  { %4388 = vmatpush3.bf16.msra.mxu1 %v4363_v9 }
 0x73b   :  { %4389 = vmatprep.subr.bf16.mxu1 %v5511_v27 }
 0x73c   :  { %4367 = vmatpush3.bf16.msra.mxu0 %v4366_v32 }
 0x73d   :  { %4368 = vmatprep.subr.bf16.mxu0 %v5511_v27 }
 0x73e   :  { %4391 = vmatpush3.bf16.msra.mxu1 %v4366_v32 }
 0x73f   :  { %4392 = vmatprep.subr.bf16.mxu1 %v5511_v27 }
 0x740   :  { %4370 = vmatpush3.bf16.msra.mxu0 %v4369_v33 }
 0x741   :  { %4371 = vmatprep.subr.bf16.mxu0 %v5511_v27 }
 0x742   :  { %4394 = vmatpush3.bf16.msra.mxu1 %v4369_v33 }
 0x743   :  { %4395 = vmatprep.subr.bf16.mxu1 %v5511_v27 }
 0x744   :  { %4373 = vmatpush3.bf16.msra.mxu0 %v4372_v5 }
 0x745   :  { %4374 = vmatprep.subr.bf16.mxu0 %v5511_v27 }
 0x746   :  { %4397 = vmatpush3.bf16.msra.mxu1 %v4372_v5 }
 0x747   :  { %4398 = vmatprep.subr.bf16.mxu1 %v5511_v27 }
 0x748   :  { %4376 = vmatpush3.bf16.msra.mxu0 %v4375_v46 }
 0x74a   :  { %4400 = vmatpush3.bf16.msra.mxu1 %v4375_v46 }
 0x74b   :  { %3660 = vmatmul.mubr.f32.vlgmr.msra.gmra.mrb[22].mxu0 %v5420_v40 }
 0x7fd   :  { %v2803_v22 = vpop.f32.mrb[20].mxu0 }
 0x7fe   :  { %v2874_v25 = vpop.f32.mrb[20].mxu1  ;;  %v2954_v35 = vadd.f32 %v2950_v47, %v2803_v22  ;;  %v2805_v61 = vpop.f32.mrb[21].mxu0 }
 0x7ff   :  { %v2876_v17 = vpop.f32.mrb[21].mxu1  ;;  %v2955_v3 = vadd.f32 %v2951_v45, %v2805_v61  ;;  %v2956_v19 = vadd.f32 %v2952_v11, %v2874_v25 }
 0x800   :  { %v2958_v8 = vmul.f32 0.5, %v2954_v35  ;;  %v2957_v27 = vadd.f32 %v2953_v37, %v2876_v17 }
 0x801   :  { %v2962_v18 = vmul.f32 0.5, %v2955_v3 }
 0x802   :  { %4487 = vtanh.f32 %v2958_v8  ;;  %v2967_v15 = vmul.f32 0.5, %v2957_v27 }
 0x803   :  { %4489 = vtanh.f32 %v2962_v18 }
 0x804   :  { %4491 = vtanh.f32 %v2956_v19 }
 0x805   :  { %4493 = vtanh.f32 %v2967_v15 }
 0x80c   :  { %v4488_v53 = vpop.eup %4487 }
 0x80d   :  { %v4490_v63 = vpop.eup %4489  ;;  %v2960_v42 = vmul.f32 0.5, %v4488_v53 }
 0x80e   :  { %v2964_v30 = vmul.f32 0.5, %v4490_v63  ;;  %v4492_v57 = vpop.eup %4491 }
 0x80f   :  { %v2961_v24 = vadd.f32 0.5, %v2960_v42  ;;  %v4494_v10 = vpop.eup %4493 }
 0x810   :  { %v2965_v34 = vadd.f32 0.5, %v2964_v30  ;;  %v2969_v12 = vmul.f32 0.5, %v4494_v10 }
 0x811   :  { %v2972_v54 = vmul.f32 %v4492_v57, %v2961_v24 }
 0x812   :  { %v2971_v0 = vmul.f32 %v2965_v34, %v5415_v31  ;;  %v2970_v40 = vadd.f32 0.5, %v2969_v12 }
 0x814   :  { %v2973_v48 = vadd.f32 %v2972_v54, %v2971_v0 }
 0x816   :  { %4495 = vtanh.f32 %v2973_v48  ;;  %3049 = vst [vmem:[#allocation13] sm:$0xff] %v2973_v48 }
 0x81e   :  { %v2945_v2 = vpop.f32.mrb[22].mxu0 }
 0x81f   :  { %v2978_v58 = vadd.f32 %v5353_v62, %v2945_v2  ;;  %v3661_v7 = vpop.f32.mrb[23].mxu0 }
 0x820   :  { %v4496_v43 = vpop.eup %4495 }
 0x821   :  { %v2980_v36 = vcombine.high %v2978_v58, %v2978_v58  ;;  %v2987_v26 = vrot.slane %v2978_v58, %v4946_v38  ;;  %v2975_v39 = vmul.f32 %v4496_v43, %v2970_v40 }
 0x823   :  { %v2994_v50 = vrot.slane %v2980_v36, %v4946_v38  ;;  %v2995_v23 = vcombine.high %v2987_v26, %v2987_v26  ;;  %v3003_v31 = vrot.slane %v2987_v26, %v4946_v38  ;;  %3273 = vst.sshfl [vmem:[#allocation10 + $0x6] sm:$0x1 pattern:$0x73625140] %v2987_v26  ;;  %3048 = vst [vmem:[#allocation11] sm:$0xff] %v2975_v39  ;;  %3695 = vmatmul.mubr.f32.vlgmr.msra.gmra.mrb[22].mxu1 %v2975_v39 }
 0x825   :  { %v2996_v20 = vcombine.high %v2994_v50, %v2994_v50  ;;  %v3010_v13 = vrot.slane %v2994_v50, %v4946_v38  ;;  %v3017_v52 = vrot.slane %v2995_v23, %v4946_v38  ;;  %v3025_v59 = vcombine.high %v3003_v31, %v3003_v31  ;;  %3274 = vst.sshfl [vmem:[#allocation10 + $0xe] sm:$0x1 pattern:$0x73625140] %v2995_v23 }
 0x826   :  { %3275 = vst.sshfl [vmem:[#allocation10 + $0x26] sm:$0x1 pattern:$0x73625140] %v2994_v50 }
 0x827   :  { %v3024_v29 = vrot.slane %v2996_v20, %v4946_v38  ;;  %v3026_v21 = vcombine.high %v3010_v13, %v3010_v13  ;;  %v3027_v55 = vcombine.high %v3017_v52, %v3017_v52  ;;  %3039 = vst [vmem:[#allocation10 + $0x16] sm:$0x1] %v3025_v59  ;;  %3276 = vst.sshfl [vmem:[#allocation10 + $0x2e] sm:$0x1 pattern:$0x73625140] %v2996_v20 }
 0x829   :  { %v3028_v60 = vcombine.high %v3024_v29, %v3024_v29  ;;  %3040 = vst [vmem:[#allocation10 + $0x1e] sm:$0x1] %v3027_v55  ;;  %3043 = vst [vmem:[#allocation10 + $0x36] sm:$0x1] %v3026_v21 }
 0x82b   :  { %3044 = vst [vmem:[#allocation10 + $0x3e] sm:$0x1] %v3028_v60 }
 0x82c   :  { %4575 = shalt.err (!%p4572_p0)
}
 0x82d   :  { %s4576_s24 = scalar_lea.hbm %s5505_s6, 128 }
 0x82e   :  { %p4577_p1 = scmp.ne.s32.totalorder %s5505_s6, %s4576_s24  ;;  %p4580_p2 = scmp.lt.u32.totalorder %s4576_s24, %s5505_s6 }
 0x830   :  { %p4582_p3 = pnand %p4580_p2, %p4577_p1 }
 0x832   :  { %4585 = shalt.err (!%p4582_p3)
}
 0x833   :  { %3224 = dma.vmem_to_hbm [thread:$0]  %s3222_s20, 128, %s5505_s6, [#allocation12]  }
 0x834   :  { %s4650_s30 = smov [#allocation13]  }
 0x835   :  { %s3231_s8 = sshll.u32 %s4650_s30, 4  ;;  %s3232_s8 = int_to_ptr.vmem [resolvable:$true] %s3231_s8 }
 0x836   :  { %s4586_s9 = scalar_lea.vmem %s3232_s8, 128  ;;  %p4591_p5 = scmp.lt.s32.totalorder %s3232_s8, %s3232_s8 }
 0x837   :  { %p4587_p4 = scmp.ne.s32.totalorder %s3232_s8, %s4586_s9  ;;  %p4592_p6 = scmp.lt.s32.totalorder %s4586_s9, %s4586_s9 }
 0x839   :  { %p4593_p7 = por %p4592_p6, %p4591_p5 }
 0x83b   :  { %p4594_p8 = pnand %p4593_p7, %p4587_p4 }
 0x83d   :  { %4597 = shalt.err (!%p4594_p8)
}
 0x83e   :  { %s4598_s12 = scalar_lea.hbm %s5506_s7, 128 }
 0x83f   :  { %p4599_p9 = scmp.ne.s32.totalorder %s5506_s7, %s4598_s12  ;;  %p4602_p10 = scmp.lt.u32.totalorder %s4598_s12, %s5506_s7 }
 0x841   :  { %p4604_p11 = pnand %p4602_p10, %p4599_p9 }
 0x843   :  { %4607 = shalt.err (!%p4604_p11)
}
 0x844   :  { %3234 = dma.vmem_to_hbm [thread:$0]  %s3232_s8, 128, %s5506_s7, [#allocation12]  }
 0x845   :  { %s4651_s7 = smov [#allocation10]  }
 0x846   :  { %s3208_s16 = sshll.u32 %s4651_s7, 4  ;;  %s3209_s16 = int_to_ptr.vmem [resolvable:$true] %s3208_s16 }
 0x847   :  { %s4608_s3 = scalar_lea.vmem %s3209_s16, 1024  ;;  %p4613_p13 = scmp.lt.s32.totalorder %s3209_s16, %s3209_s16 }
 0x848   :  { %p4609_p12 = scmp.ne.s32.totalorder %s3209_s16, %s4608_s3  ;;  %p4614_p0 = scmp.lt.s32.totalorder %s4608_s3, %s4608_s3 }
 0x84a   :  { %p4615_p1 = por %p4614_p0, %p4613_p13 }
 0x84c   :  { %p4616_p2 = pnand %p4615_p1, %p4609_p12 }
 0x8f6   :  { %v3133_v49 = vpop.f32.mrb[22].mxu1 }
 0x8f7   :  { %v3134_v16 = vadd.f32 %v5353_v62, %v3133_v49  ;;  %v3696_v41 = vpop.f32.mrb[23].mxu1 }
 0x8f9   :  { %v3138_v9 = vcombine.high %v3134_v16, %v3134_v16  ;;  %v3145_v14 = vrot.slane %v3134_v16, %v4946_v38 }
 0x8fb   :  { %v3152_v28 = vrot.slane %v3138_v9, %v4946_v38  ;;  %v3153_v32 = vcombine.high %v3145_v14, %v3145_v14  ;;  %v3161_v56 = vrot.slane %v3145_v14, %v4946_v38  ;;  %3277 = vst.sshfl [vmem:[#allocation10 + $0x7] sm:$0x1 pattern:$0x73625140] %v3145_v14 }
 0x8fd   :  { %v3154_v51 = vcombine.high %v3152_v28, %v3152_v28  ;;  %v3168_v33 = vrot.slane %v3152_v28, %v4946_v38  ;;  %v3175_v44 = vrot.slane %v3153_v32, %v4946_v38  ;;  %v3183_v1 = vcombine.high %v3161_v56, %v3161_v56  ;;  %3278 = vst.sshfl [vmem:[#allocation10 + $0xf] sm:$0x1 pattern:$0x73625140] %v3153_v32 }
 0x8fe   :  { %3279 = vst.sshfl [vmem:[#allocation10 + $0x27] sm:$0x1 pattern:$0x73625140] %v3152_v28 }
 0x8ff   :  { %v3182_v62 = vrot.slane %v3154_v51, %v4946_v38  ;;  %v3184_v5 = vcombine.high %v3168_v33, %v3168_v33  ;;  %v3185_v6 = vcombine.high %v3175_v44, %v3175_v44  ;;  %3197 = vst [vmem:[#allocation10 + $0x17] sm:$0x1] %v3183_v1  ;;  %3280 = vst.sshfl [vmem:[#allocation10 + $0x2f] sm:$0x1 pattern:$0x73625140] %v3154_v51 }
 0x901   :  { %v3186_v4 = vcombine.high %v3182_v62, %v3182_v62  ;;  %3198 = vst [vmem:[#allocation10 + $0x1f] sm:$0x1] %v3185_v6  ;;  %3201 = vst [vmem:[#allocation10 + $0x37] sm:$0x1] %v3184_v5 }
 0x903   :  { %3202 = vst [vmem:[#allocation10 + $0x3f] sm:$0x1] %v3186_v4 }
 0x904   :  { %4619 = shalt.err (!%p4616_p2)
}
 0x905   :  { %s4620_s19 = scalar_lea.hbm %s5504_s5, 1024 }
 0x906   :  { %p4621_p3 = scmp.ne.s32.totalorder %s5504_s5, %s4620_s19  ;;  %p4624_p4 = scmp.lt.u32.totalorder %s4620_s19, %s5504_s5 }
 0x908   :  { %p4626_p5 = pnand %p4624_p4, %p4621_p3 }
 0x90a   :  { %4629 = shalt.err (!%p4626_p5)
}
 0x90b   :  { %s4652_s23 = smov 128   ;;  %s4653_s24 = smov 8  }
 0x90c   :  { %3214 = dma.vmem_to_hbm [thread:$0]  %s3209_s16, 1024, %s5504_s5, [#allocation6], %s4652_s23, %s4652_s23, %s4653_s24  }
 0x90d   :  { %4634 = dma.done.wait [#allocation6], 1024  }
 0x90e   :  { %4635 = vsyncadd [#allocation6], 4294966272 }
 0x90f   :  { %4636 = dma.done.wait [#allocation12], 256  }
 0x910   :  { %4637 = vsyncadd [#allocation12], 4294967040 }
 0x911   :  { %3244 = vsyncpa [#allocation5], 1 }
 0x912   :  { %3245 = vsyncpa [#allocation8], 1 }
 0x913   :  { %3246 = vsyncpa [#allocation6], 1 }
 0x914   :  { %3247 = vsyncpa [#allocation12], 1 }

</bundles_post_ra>
